<compile_context>
chip_gen: v7x
topology: tpu7x:2x2x1
jax: 0.10.0
libtpu: 0.0.40
codegen_flags: <defaults>
</compile_context>

<pallas_src>
import functools

import jax
import jax.numpy as jnp
from jax.experimental import pallas as pl
from jax.experimental.pallas import tpu as pltpu

HI = jax.lax.Precision.HIGHEST


# ----------------------------------------------------------------------------
# helpers
# ----------------------------------------------------------------------------
def bn_fold(gamma, beta, rm, rv, eps=1e-5):
    """Fold inference-mode BatchNorm into per-channel scale/shift."""
    scale = gamma / jnp.sqrt(rv + eps)
    shift = beta - rm * scale
    return scale, shift


# ----------------------------------------------------------------------------
# the fused kernel: both encoders + both projectors in one invocation.
#   im_ref    : (B*L, 80)   im2col (39 taps + maxpool col) of branch t | f
#   wmain_ref : (80, 512)   block-diag inception(+convbottle) and shortcut
#   vecs_ref  : (4, 512)    packed bias/shift vectors
#   ln1_ref   : (512, 256)  block-diag ln_1 (bn_1 folded in)
#   w1_ref    : (256, 512)  block-diag projector Linear1 (proj BN folded in)
#   w2_ref    : (512, 256)  block-diag projector Linear2
#   h_ref     : (B, 256)    [h_time | h_freq]
#   z_ref     : (B, 256)    [z_time | z_freq]
# ----------------------------------------------------------------------------
def _conv_lead_kernel(im_ref, wmain_ref, vecs_ref, ln1_ref, w1_ref, w2_ref,
                      h_ref, z_ref):
    B = h_ref.shape[0]
    BL = im_ref.shape[0]
    L = BL // B
    inv_l = jnp.float32(1.0 / L)

    # packed small vectors (single DMA'd slab, static slices)
    shift = vecs_ref[0:1, :]          # (1,512) [yb_t | yb_f | sb_t | sb_f]
    l1b = vecs_ref[1:2, 0:256]        # (1,256) ln_1 bias (bn_1 folded)
    p1b = vecs_ref[2:3, :]            # (1,512) projector Linear1 bias (BN folded)
    p2b = vecs_ref[3:4, 0:256]        # (1,256) projector Linear2 bias

    # --- inception convs + convbottle + shortcut conv for BOTH branches and
    #     the whole batch: one lane-dense MXU matmul.
    pre = jnp.dot(im_ref[...], wmain_ref[...],
                  preferred_element_type=jnp.float32) + shift     # (B*L, 512)
    # cols 0:256   = bn_incep(inception) pre-ReLU   [t | f]
    # cols 256:512 = bn_short(shortcut conv)        [t | f]
    act = jnp.maximum(jnp.maximum(pre[:, 0:256], 0.0) + pre[:, 256:512], 0.0)

    # --- adaptive max / avg pooling over L per sample (B is tiny & static)
    mps, aps = [], []
    for b in range(B):
        blk = act[b * L:(b + 1) * L, :]                           # (L, 256)
        mps.append(jnp.max(blk, axis=0, keepdims=True))
        aps.append(jnp.sum(blk, axis=0, keepdims=True) * inv_l)
    mp = jnp.concatenate(mps, axis=0)                             # (B, 256)
    ap = jnp.concatenate(aps, axis=0)                             # (B, 256)
    feat = jnp.concatenate([mp, ap], axis=1)     # (B,512) [mp_t,mp_f,ap_t,ap_f]

    # --- bn_1 + ln_1 (folded), both branches & whole batch in one matmul
    h = jnp.dot(feat, ln1_ref[...], preferred_element_type=jnp.float32) + l1b
    h_ref[...] = h.astype(h_ref.dtype)                            # (B, 256)

    # --- projector: Linear -> BN -> ReLU -> Linear (block-diag over branches)
    t = jnp.maximum(
        jnp.dot(h, w1_ref[...], preferred_element_type=jnp.float32) + p1b, 0.0)
    z = jnp.dot(t, w2_ref[...], preferred_element_type=jnp.float32) + p2b
    z_ref[...] = z.astype(z_ref.dtype)                            # (B, 256)


# ----------------------------------------------------------------------------
# parameter folding (pure constant work; XLA constant-folds it under jit since
# `params` are closed over as constants)
# ----------------------------------------------------------------------------
def _fold_branch(enc, proj):
    K = 39
    wb = enc["w_bottleneck"][:, 0, 0]                 # (32,) 1x1 bottleneck

    def eff(w):                                       # (32,32,k) -> (k,32)
        return jnp.einsum("oik,i->ko", w, wb, precision=HI)

    # merged inception taps (39 taps + maxpool column as row 39)
    we = jnp.zeros((K + 1, 128), jnp.float32)
    we = we.at[0:K, 0:32].set(eff(enc["w_conv1"]))
    e2 = eff(enc["w_conv2"]); o2 = (K - e2.shape[0]) // 2
    we = we.at[o2:o2 + e2.shape[0], 32:64].set(e2)
    e3 = eff(enc["w_conv3"]); o3 = (K - e3.shape[0]) // 2
    we = we.at[o3:o3 + e3.shape[0], 64:96].set(e3)
    we = we.at[K, 96:128].set(enc["w_convbottle"][:, 0, 0])

    ys, yb = bn_fold(**enc["bn_incep"])
    ss, sb = bn_fold(**enc["bn_short"])
    we = we * ys[None, :]                             # fold bn_incep scale
    wsc = enc["w_shortcut"][:, 0, 0] * ss             # shortcut conv * bn scale

    fs, fb = bn_fold(**enc["bn1"])                    # (256,)
    ln1 = fs[:, None] * enc["ln1_w"].T                # (256,128) bn_1 folded
    l1b = jnp.dot(fb, enc["ln1_w"].T, precision=HI) + enc["ln1_b"]

    ps, pb = bn_fold(**proj["bn"])
    w1 = proj["w1"].T * ps[None, :]                   # (128,256) proj BN folded
    p1b = proj["b1"] * ps + pb
    w2 = proj["w2"].T                                 # (256,128)
    p2b = proj["b2"]
    return dict(we=we, yb=yb, wsc=wsc, sb=sb, ln1=ln1, l1b=l1b,
                w1=w1, p1b=p1b, w2=w2, p2b=p2b)


def _assemble(ft, ff):
    KE = 40   # 39 taps + maxpool column

    # main block-diag weight: cols 0:256 inception [t|f], 256:512 shortcut [t|f]
    wmain = jnp.zeros((2 * KE, 512), jnp.float32)
    wmain = wmain.at[0:KE, 0:128].set(ft["we"])
    wmain = wmain.at[KE:2 * KE, 128:256].set(ff["we"])
    wmain = wmain.at[19, 256:384].set(ft["wsc"])            # center tap x[l]
    wmain = wmain.at[KE + 19, 384:512].set(ff["wsc"])

    # ln_1 block-diag, row order matches feat = [mp_t, mp_f, ap_t, ap_f]
    ln1 = jnp.zeros((512, 256), jnp.float32)
    ln1 = ln1.at[0:128, 0:128].set(ft["ln1"][0:128])        # mp_t rows
    ln1 = ln1.at[128:256, 128:256].set(ff["ln1"][0:128])    # mp_f rows
    ln1 = ln1.at[256:384, 0:128].set(ft["ln1"][128:256])    # ap_t rows
    ln1 = ln1.at[384:512, 128:256].set(ff["ln1"][128:256])  # ap_f rows

    w1 = jnp.zeros((256, 512), jnp.float32)
    w1 = w1.at[0:128, 0:256].set(ft["w1"])
    w1 = w1.at[128:256, 256:512].set(ff["w1"])

    w2 = jnp.zeros((512, 256), jnp.float32)
    w2 = w2.at[0:256, 0:128].set(ft["w2"])
    w2 = w2.at[256:512, 128:256].set(ff["w2"])

    vecs = jnp.zeros((4, 512), jnp.float32)
    vecs = vecs.at[0, :].set(jnp.concatenate([ft["yb"], ff["yb"],
                                              ft["sb"], ff["sb"]]))
    vecs = vecs.at[1, 0:256].set(jnp.concatenate([ft["l1b"], ff["l1b"]]))
    vecs = vecs.at[2, :].set(jnp.concatenate([ft["p1b"], ff["p1b"]]))
    vecs = vecs.at[3, 0:256].set(jnp.concatenate([ft["p2b"], ff["p2b"]]))
    return wmain, vecs, ln1, w1, w2


# ----------------------------------------------------------------------------
# single fused pallas_call (grid collapsed to one step; everything fits VMEM)
# ----------------------------------------------------------------------------
def _run_fused(im_cat, wmain, vecs, ln1, w1, w2, B):
    ins = (im_cat, wmain, vecs, ln1, w1, w2)
    out_shape = (jax.ShapeDtypeStruct((B, 256), jnp.float32),
                 jax.ShapeDtypeStruct((B, 256), jnp.float32))
    return pl.pallas_call(
        _conv_lead_kernel,
        out_shape=out_shape,
        grid=(1,),
        in_specs=[pl.BlockSpec(a.shape, lambda i: (0, 0)) for a in ins],
        out_specs=(pl.BlockSpec((B, 256), lambda i: (0, 0)),
                   pl.BlockSpec((B, 256), lambda i: (0, 0))),
        compiler_params=pltpu.CompilerParams(
            dimension_semantics=("arbitrary",)),
    )(*ins)


# ----------------------------------------------------------------------------
# public forward pass
# ----------------------------------------------------------------------------
def conv_lead_forward(x_in_t, x_in_f, params):
    """x_in_t, x_in_f: (B, 1, L) NCL (PyTorch layout)."""
    assert x_in_t.shape == x_in_f.shape and x_in_t.shape[1] == 1
    B, _, L = x_in_t.shape
    K, pad = 39, 19

    ft = _fold_branch(params["enc_t"], params["proj_t"])
    ff = _fold_branch(params["enc_f"], params["proj_f"])
    wmain, vecs, ln1, w1, w2 = _assemble(ft, ff)

    # im2col (+ MaxPool1d(3,1,1) as column 39) of the raw 1-channel signal,
    # both branches concatenated along the tap axis -> one (B*L, 80) tile.
    xs = jnp.stack([x_in_t[:, 0, :], x_in_f[:, 0, :]], axis=0)       # (2,B,L)
    xp = jnp.pad(xs, ((0, 0), (0, 0), (pad, pad)))                   # zero pad
    cols = jnp.stack([xp[:, :, k:k + L] for k in range(K)], axis=-1)  # (2,B,L,39)
    xpn = jnp.pad(xs, ((0, 0), (0, 0), (1, 1)),
                  constant_values=-jnp.inf)                          # maxpool pad
    xmp = jnp.maximum(jnp.maximum(xpn[:, :, :-2], xpn[:, :, 1:-1]),
                      xpn[:, :, 2:])                                 # finite
    im = jnp.concatenate([cols, xmp[..., None]], axis=-1)            # (2,B,L,40)
    im_cat = jnp.concatenate([im[0].reshape(B * L, K + 1),
                              im[1].reshape(B * L, K + 1)], axis=1)  # (B*L, 80)

    h_cat, z_cat = _run_fused(im_cat, wmain, vecs, ln1, w1, w2, B)
    return (h_cat[:, 0:128], z_cat[:, 0:128],
            h_cat[:, 128:256], z_cat[:, 128:256])   # h_time, z_time, h_freq, z_freq


# ----------------------------------------------------------------------------
# pure-JAX reference of the original PyTorch module (for a numerical check)
# ----------------------------------------------------------------------------
def _reference_forward(x_in_t, x_in_f, params):
    def conv1d(x, w, pad):                      # x: (B,Cin,L), w: (Cout,Cin,K)
        return jax.lax.conv_general_dilated(
            x, w, window_strides=(1,), padding=[(pad, pad)],
            dimension_numbers=("NCH", "OIH", "NCH"), precision=HI)

    def bn(x, p):
        s, sh = bn_fold(**p)
        if x.ndim == 3:
            return x * s[None, :, None] + sh[None, :, None]
        return x * s[None, :] + sh[None, :]

    def encoder(x, p):                          # x: (B, 1, L)
        bott = conv1d(x, p["w_bottleneck"], 0)
        c1 = conv1d(bott, p["w_conv1"], 19)
        c2 = conv1d(bott, p["w_conv2"], 9)
        c3 = conv1d(bott, p["w_conv3"], 4)
        xpd = jnp.pad(x, ((0, 0), (0, 0), (1, 1)), constant_values=-jnp.inf)
        xmp = jnp.maximum(jnp.maximum(xpd[:, :, :-2], xpd[:, :, 1:-1]),
                          xpd[:, :, 2:])
        c4 = conv1d(xmp, p["w_convbottle"], 0)
        y = jnp.concatenate([c1, c2, c3, c4], axis=1)
        out = jax.nn.relu(bn(y, p["bn_incep"]))
        s = bn(conv1d(x, p["w_shortcut"], 0), p["bn_short"])
        z = jax.nn.relu(out + s)
        feat = jnp.concatenate([jnp.max(z, axis=2), jnp.mean(z, axis=2)], axis=1)
        feat = bn(feat, p["bn1"])               # dropout = identity (eval)
        return jnp.dot(feat, p["ln1_w"].T, precision=HI) + p["ln1_b"]

    def projector(h, p):
        z1 = jax.nn.relu(bn(jnp.dot(h, p["w1"].T, precision=HI) + p["b1"],
                            p["bn"]))
        return jnp.dot(z1, p["w2"].T, precision=HI) + p["b2"]

    h_t = encoder(x_in_t, params["enc_t"])
    z_t = projector(h_t, params["proj_t"])
    h_f = encoder(x_in_f, params["enc_f"])
    z_f = projector(h_f, params["proj_f"])
    return h_t, z_t, h_f, z_f


# ----------------------------------------------------------------------------
# deterministic parameter init (shapes from the PyTorch __init__)
# ----------------------------------------------------------------------------
def init_params(key):
    keys = iter(jax.random.split(key, 128))

    def nrm(shape, s=0.1):
        return jax.random.normal(next(keys), shape, jnp.float32) * s

    def bn_params(c):
        return dict(gamma=1.0 + nrm((c,)), beta=nrm((c,)), rm=nrm((c,)),
                    rv=0.5 + jax.random.uniform(next(keys), (c,), jnp.float32))

    def encoder_params():
        return dict(
            w_bottleneck=nrm((32, 1, 1)),
            w_conv1=nrm((32, 32, 39), 0.05),
            w_conv2=nrm((32, 32, 19), 0.05),
            w_conv3=nrm((32, 32, 9), 0.05),
            w_convbottle=nrm((32, 1, 1)),
            bn_incep=bn_params(128),
            w_shortcut=nrm((128, 1, 1)),
            bn_short=bn_params(128),
            bn1=bn_params(256),
            ln1_w=nrm((128, 256), 0.05),
            ln1_b=nrm((128,)),
        )

    def projector_params():
        return dict(
            w1=nrm((256, 128), 0.05), b1=nrm((256,)),
            bn=bn_params(256),
            w2=nrm((128, 256), 0.05), b2=nrm((128,)),
        )

    return dict(enc_t=encoder_params(), proj_t=projector_params(),
                enc_f=encoder_params(), proj_f=projector_params())


# ----------------------------------------------------------------------------
if __name__ == "__main__":
    key = jax.random.PRNGKey(0)
    kp, kt, kf = jax.random.split(key, 3)

    B, L = 2, 128
    x_in_t = jax.random.normal(kt, (B, 1, L), jnp.float32)   # NCL like PyTorch
    x_in_f = jax.random.normal(kf, (B, 1, L), jnp.float32)

    params = init_params(kp)
    fwd = jax.jit(functools.partial(conv_lead_forward, params=params))

    outs = fwd(x_in_t, x_in_f)
    jax.block_until_ready(outs)
    h_time, z_time, h_freq, z_freq = outs

    assert h_time.shape == (B, 128) and z_time.shape == (B, 128)
    assert h_freq.shape == (B, 128) and z_freq.shape == (B, 128)

    refs = jax.jit(_reference_forward)(x_in_t, x_in_f, params)
    for got, want in zip(outs, refs):
        assert bool(jnp.all(jnp.isfinite(got)))
        err = float(jnp.max(jnp.abs(got - want)))
        # tolerance documents the MXU's reduced-precision f32 matmul passes
        assert bool(jnp.allclose(got, want, rtol=2e-2, atol=2e-2)), err

    print("KERNEL_OK")
</pallas_src>

<mosaic_0001>
module attributes {stable_mosaic.version = 11 : i64} {
  func.func @_conv_lead_kernel(%arg0: i32, %arg1: memref<256x80xf32, #tpu.memory_space<vmem>>, %arg2: memref<80x512xf32, #tpu.memory_space<vmem>>, %arg3: memref<4x512xf32, #tpu.memory_space<vmem>>, %arg4: memref<512x256xf32, #tpu.memory_space<vmem>>, %arg5: memref<256x512xf32, #tpu.memory_space<vmem>>, %arg6: memref<512x256xf32, #tpu.memory_space<vmem>>, %arg7: memref<2x256xf32, #tpu.memory_space<vmem>>, %arg8: memref<2x256xf32, #tpu.memory_space<vmem>>) attributes {dimension_semantics = [#tpu.dimension_semantics<arbitrary>], iteration_bounds = array<i64: 1>, scalar_prefetch = 0 : i64, scratch_operands = 0 : i64, tpu.core_type = #tpu.core_type<tc>, window_params = [{pipeline_mode = #tpu.pipeline_mode<synchronous>, transform_indices = @transform_0, window_bounds = array<i64: 256, 80>}, {pipeline_mode = #tpu.pipeline_mode<synchronous>, transform_indices = @transform_1, window_bounds = array<i64: 80, 512>}, {pipeline_mode = #tpu.pipeline_mode<synchronous>, transform_indices = @transform_2, window_bounds = array<i64: 4, 512>}, {pipeline_mode = #tpu.pipeline_mode<synchronous>, transform_indices = @transform_3, window_bounds = array<i64: 512, 256>}, {pipeline_mode = #tpu.pipeline_mode<synchronous>, transform_indices = @transform_4, window_bounds = array<i64: 256, 512>}, {pipeline_mode = #tpu.pipeline_mode<synchronous>, transform_indices = @transform_5, window_bounds = array<i64: 512, 256>}, {pipeline_mode = #tpu.pipeline_mode<synchronous>, transform_indices = @transform_6, window_bounds = array<i64: 2, 256>}, {pipeline_mode = #tpu.pipeline_mode<synchronous>, transform_indices = @transform_7, window_bounds = array<i64: 2, 256>}]} {
    %c0 = arith.constant 0 : index
    %c0_0 = arith.constant 0 : index
    %0 = vector.load %arg3[%c0, %c0_0] : memref<4x512xf32, #tpu.memory_space<vmem>>, vector<1x512xf32>
    %c1 = arith.constant 1 : index
    %c0_1 = arith.constant 0 : index
    %1 = vector.load %arg3[%c1, %c0_1] : memref<4x512xf32, #tpu.memory_space<vmem>>, vector<1x256xf32>
    %c2 = arith.constant 2 : index
    %c0_2 = arith.constant 0 : index
    %2 = vector.load %arg3[%c2, %c0_2] : memref<4x512xf32, #tpu.memory_space<vmem>>, vector<1x512xf32>
    %c3 = arith.constant 3 : index
    %c0_3 = arith.constant 0 : index
    %3 = vector.load %arg3[%c3, %c0_3] : memref<4x512xf32, #tpu.memory_space<vmem>>, vector<1x256xf32>
    %c0_4 = arith.constant 0 : index
    %c0_5 = arith.constant 0 : index
    %4 = vector.load %arg1[%c0_4, %c0_5] : memref<256x80xf32, #tpu.memory_space<vmem>>, vector<256x80xf32>
    %c0_6 = arith.constant 0 : index
    %c0_7 = arith.constant 0 : index
    %5 = vector.load %arg2[%c0_6, %c0_7] : memref<80x512xf32, #tpu.memory_space<vmem>>, vector<80x512xf32>
    %cst = arith.constant dense<0.000000e+00> : vector<256x512xf32>
    %6 = tpu.matmul %4, %5, %cst {dimension_numbers = #tpu.dot_dimension_numbers<[1], [0], [0], [1], [0, 0, 1, 1], [], []>} : vector<256x80xf32>, vector<80x512xf32>, vector<256x512xf32> -> vector<256x512xf32>
    %7 = vector.broadcast %0 : vector<1x512xf32> to vector<256x512xf32>
    %8 = arith.addf %6, %7 : vector<256x512xf32>
    %9 = vector.extract_strided_slice %8 {offsets = [0, 0], sizes = [256, 256], strides = [1, 1]} : vector<256x512xf32> to vector<256x256xf32>
    %cst_8 = arith.constant 0.000000e+00 : f32
    %10 = vector.broadcast %cst_8 : f32 to vector<256x256xf32>
    %11 = arith.maximumf %9, %10 : vector<256x256xf32>
    %12 = vector.extract_strided_slice %8 {offsets = [0, 256], sizes = [256, 256], strides = [1, 1]} : vector<256x512xf32> to vector<256x256xf32>
    %13 = arith.addf %11, %12 : vector<256x256xf32>
    %cst_9 = arith.constant 0.000000e+00 : f32
    %14 = vector.broadcast %cst_9 : f32 to vector<256x256xf32>
    %15 = arith.maximumf %13, %14 : vector<256x256xf32>
    %16 = vector.extract_strided_slice %15 {offsets = [0, 0], sizes = [128, 256], strides = [1, 1]} : vector<256x256xf32> to vector<128x256xf32>
    %cst_10 = arith.constant dense<0xFF800000> : vector<256xf32>
    %17 = vector.multi_reduction <maximumf>, %16, %cst_10 [0] : vector<128x256xf32> to vector<256xf32>
    %18 = vector.shape_cast %17 : vector<256xf32> to vector<1x256xf32>
    %cst_11 = arith.constant dense<0.000000e+00> : vector<256xf32>
    %19 = vector.multi_reduction <add>, %16, %cst_11 [0] : vector<128x256xf32> to vector<256xf32>
    %20 = vector.shape_cast %19 : vector<256xf32> to vector<1x256xf32>
    %cst_12 = arith.constant 7.812500e-03 : f32
    %21 = vector.broadcast %cst_12 : f32 to vector<1x256xf32>
    %22 = arith.mulf %20, %21 : vector<1x256xf32>
    %23 = vector.extract_strided_slice %15 {offsets = [128, 0], sizes = [128, 256], strides = [1, 1]} : vector<256x256xf32> to vector<128x256xf32>
    %cst_13 = arith.constant dense<0xFF800000> : vector<256xf32>
    %24 = vector.multi_reduction <maximumf>, %23, %cst_13 [0] : vector<128x256xf32> to vector<256xf32>
    %25 = vector.shape_cast %24 : vector<256xf32> to vector<1x256xf32>
    %cst_14 = arith.constant dense<0.000000e+00> : vector<256xf32>
    %26 = vector.multi_reduction <add>, %23, %cst_14 [0] : vector<128x256xf32> to vector<256xf32>
    %27 = vector.shape_cast %26 : vector<256xf32> to vector<1x256xf32>
    %cst_15 = arith.constant 7.812500e-03 : f32
    %28 = vector.broadcast %cst_15 : f32 to vector<1x256xf32>
    %29 = arith.mulf %27, %28 : vector<1x256xf32>
    %30 = tpu.concatenate %18, %25 in 0 : vector<1x256xf32>, vector<1x256xf32> -> vector<2x256xf32>
    %31 = tpu.concatenate %22, %29 in 0 : vector<1x256xf32>, vector<1x256xf32> -> vector<2x256xf32>
    %32 = tpu.concatenate %30, %31 in 1 : vector<2x256xf32>, vector<2x256xf32> -> vector<2x512xf32>
    %c0_16 = arith.constant 0 : index
    %c0_17 = arith.constant 0 : index
    %33 = vector.load %arg4[%c0_16, %c0_17] : memref<512x256xf32, #tpu.memory_space<vmem>>, vector<512x256xf32>
    %cst_18 = arith.constant dense<0.000000e+00> : vector<2x256xf32>
    %34 = tpu.matmul %32, %33, %cst_18 {dimension_numbers = #tpu.dot_dimension_numbers<[1], [0], [0], [1], [0, 0, 1, 1], [], []>} : vector<2x512xf32>, vector<512x256xf32>, vector<2x256xf32> -> vector<2x256xf32>
    %35 = vector.broadcast %1 : vector<1x256xf32> to vector<2x256xf32>
    %36 = arith.addf %34, %35 : vector<2x256xf32>
    %c0_19 = arith.constant 0 : index
    %c0_20 = arith.constant 0 : index
    %37 = vector.load %arg7[%c0_19, %c0_20] : memref<2x256xf32, #tpu.memory_space<vmem>>, vector<2x256xf32>
    tpu.vector_store %arg7[%c0_19, %c0_20], %36 {strides = array<i32>} : memref<2x256xf32, #tpu.memory_space<vmem>>, vector<2x256xf32>,
    %c0_21 = arith.constant 0 : index
    %c0_22 = arith.constant 0 : index
    %38 = vector.load %arg5[%c0_21, %c0_22] : memref<256x512xf32, #tpu.memory_space<vmem>>, vector<256x512xf32>
    %cst_23 = arith.constant dense<0.000000e+00> : vector<2x512xf32>
    %39 = tpu.matmul %36, %38, %cst_23 {dimension_numbers = #tpu.dot_dimension_numbers<[1], [0], [0], [1], [0, 0, 1, 1], [], []>} : vector<2x256xf32>, vector<256x512xf32>, vector<2x512xf32> -> vector<2x512xf32>
    %40 = vector.broadcast %2 : vector<1x512xf32> to vector<2x512xf32>
    %41 = arith.addf %39, %40 : vector<2x512xf32>
    %cst_24 = arith.constant 0.000000e+00 : f32
    %42 = vector.broadcast %cst_24 : f32 to vector<2x512xf32>
    %43 = arith.maximumf %41, %42 : vector<2x512xf32>
    %c0_25 = arith.constant 0 : index
    %c0_26 = arith.constant 0 : index
    %44 = vector.load %arg6[%c0_25, %c0_26] : memref<512x256xf32, #tpu.memory_space<vmem>>, vector<512x256xf32>
    %cst_27 = arith.constant dense<0.000000e+00> : vector<2x256xf32>
    %45 = tpu.matmul %43, %44, %cst_27 {dimension_numbers = #tpu.dot_dimension_numbers<[1], [0], [0], [1], [0, 0, 1, 1], [], []>} : vector<2x512xf32>, vector<512x256xf32>, vector<2x256xf32> -> vector<2x256xf32>
    %46 = vector.broadcast %3 : vector<1x256xf32> to vector<2x256xf32>
    %47 = arith.addf %45, %46 : vector<2x256xf32>
    %c0_28 = arith.constant 0 : index
    %c0_29 = arith.constant 0 : index
    %48 = vector.load %arg8[%c0_28, %c0_29] : memref<2x256xf32, #tpu.memory_space<vmem>>, vector<2x256xf32>
    tpu.vector_store %arg8[%c0_28, %c0_29], %47 {strides = array<i32>} : memref<2x256xf32, #tpu.memory_space<vmem>>, vector<2x256xf32>,
    return
  }
  func.func @transform_0(%arg0: i32) -> (i32, i32) {
    %c0_i32 = arith.constant 0 : i32
    %c0_i32_0 = arith.constant 0 : i32
    %c0_i32_1 = arith.constant 0 : i32
    return %c0_i32, %c0_i32_0 : i32, i32
  }
  func.func @transform_1(%arg0: i32) -> (i32, i32) {
    %c0_i32 = arith.constant 0 : i32
    %c0_i32_0 = arith.constant 0 : i32
    %c0_i32_1 = arith.constant 0 : i32
    return %c0_i32, %c0_i32_0 : i32, i32
  }
  func.func @transform_2(%arg0: i32) -> (i32, i32) {
    %c0_i32 = arith.constant 0 : i32
    %c0_i32_0 = arith.constant 0 : i32
    %c0_i32_1 = arith.constant 0 : i32
    return %c0_i32, %c0_i32_0 : i32, i32
  }
  func.func @transform_3(%arg0: i32) -> (i32, i32) {
    %c0_i32 = arith.constant 0 : i32
    %c0_i32_0 = arith.constant 0 : i32
    %c0_i32_1 = arith.constant 0 : i32
    return %c0_i32, %c0_i32_0 : i32, i32
  }
  func.func @transform_4(%arg0: i32) -> (i32, i32) {
    %c0_i32 = arith.constant 0 : i32
    %c0_i32_0 = arith.constant 0 : i32
    %c0_i32_1 = arith.constant 0 : i32
    return %c0_i32, %c0_i32_0 : i32, i32
  }
  func.func @transform_5(%arg0: i32) -> (i32, i32) {
    %c0_i32 = arith.constant 0 : i32
    %c0_i32_0 = arith.constant 0 : i32
    %c0_i32_1 = arith.constant 0 : i32
    return %c0_i32, %c0_i32_0 : i32, i32
  }
  func.func @transform_6(%arg0: i32) -> (i32, i32) {
    %c0_i32 = arith.constant 0 : i32
    %c0_i32_0 = arith.constant 0 : i32
    %c0_i32_1 = arith.constant 0 : i32
    return %c0_i32, %c0_i32_0 : i32, i32
  }
  func.func @transform_7(%arg0: i32) -> (i32, i32) {
    %c0_i32 = arith.constant 0 : i32
    %c0_i32_0 = arith.constant 0 : i32
    %c0_i32_1 = arith.constant 0 : i32
    return %c0_i32, %c0_i32_0 : i32, i32
  }
}

</mosaic_0001>

<bundles_post_ra>
// kernel: conv_lead_forward.1
= control target key start
LH: loop header
LB: loop body
LE: loop exit
PB: predicated region body
PF: predicated region fallthrough
CT: control target
= control target key end

     0   :  { %13 = vsyncpa [#allocation3], 0  ;;  %s4179_s0 = inlined_call_operand.vmem [shape: f32[256,80], index: 0, kind: input, shape index: {}]   ;;  %s4180_s1 = inlined_call_operand.hbm [shape: f32[80,512], index: 1, kind: input, shape index: {}]   ;;  %s4181_s2 = inlined_call_operand.vmem [shape: f32[4,512], index: 2, kind: input, shape index: {}]   ;;  %s4182_s3 = inlined_call_operand.hbm [shape: f32[512,256], index: 3, kind: input, shape index: {}]   ;;  %s4183_s4 = inlined_call_operand.vmem [shape: f32[256,512], index: 4, kind: input, shape index: {}]   ;;  %s4184_s5 = inlined_call_operand.vmem [shape: f32[512,256], index: 5, kind: input, shape index: {}]   ;;  %s4185_s6 = inlined_call_operand.vmem [shape: f32[2,256], index: 6, kind: output, shape index: {0}]   ;;  %s4186_s7 = inlined_call_operand.vmem [shape: f32[2,256], index: 7, kind: output, shape index: {1}]  }
   0x1   :  { %14 = vsyncpa [#allocation5], 0  ;;  %s2590_s24 = smov [#allocation2]   ;;  %s2542_s28 = scalar_lea.hbm %s4180_s1, 5120 }
   0x2   :  { %s22_s25 = sshll.u32 %s2590_s24, 4  ;;  %p2543_p0 = scmp.ne.s32.totalorder %s4180_s1, %s2542_s28  ;;  %s23_s25 = int_to_ptr.vmem [resolvable:$true] %s22_s25 }
   0x3   :  { %p2546_p1 = scmp.lt.u32.totalorder %s2542_s28, %s4180_s1 }
   0x5   :  { %p2548_p2 = pnand %p2546_p1, %p2543_p0 }
   0x7   :  { %2551 = shalt.err (!%p2548_p2)
}
   0x8   :  { %s2552_s10 = scalar_lea.vmem %s23_s25, 5120  ;;  %p2557_p4 = scmp.lt.s32.totalorder %s23_s25, %s23_s25 }
   0x9   :  { %p2553_p3 = scmp.ne.s32.totalorder %s23_s25, %s2552_s10  ;;  %p2558_p5 = scmp.lt.s32.totalorder %s2552_s10, %s2552_s10 }
   0xb   :  { %p2559_p6 = por %p2558_p5, %p2557_p4 }
   0xd   :  { %p2560_p7 = pnand %p2559_p6, %p2553_p3 }
   0xf   :  { %2563 = shalt.err (!%p2560_p7)
}
  0x10   :  { %s2591_s11 = smov 512   ;;  %s2592_s12 = smov 32  }
  0x11   :  { %28 = dma.hbm_to_vmem [thread:$0]  %s4180_s1, 5120, %s23_s25, [#allocation3], %s2591_s11, %s2591_s11, %s2592_s12  }
  0x12   :  { %s2593_s15 = smov [#allocation4]   ;;  %s2564_s19 = scalar_lea.hbm %s4182_s3, 16384 }
  0x13   :  { %s36_s16 = sshll.u32 %s2593_s15, 4  ;;  %p2565_p8 = scmp.ne.s32.totalorder %s4182_s3, %s2564_s19  ;;  %s37_s16 = int_to_ptr.vmem [resolvable:$true] %s36_s16 }
  0x14   :  { %p2568_p9 = scmp.lt.u32.totalorder %s2564_s19, %s4182_s3 }
  0x16   :  { %p2570_p10 = pnand %p2568_p9, %p2565_p8 }
  0x18   :  { %2573 = shalt.err (!%p2570_p10)
}
  0x19   :  { %s2574_s24 = scalar_lea.vmem %s37_s16, 16384  ;;  %p2579_p12 = scmp.lt.s32.totalorder %s37_s16, %s37_s16 }
  0x1a   :  { %p2575_p11 = scmp.ne.s32.totalorder %s37_s16, %s2574_s24  ;;  %p2580_p13 = scmp.lt.s32.totalorder %s2574_s24, %s2574_s24 }
  0x1c   :  { %p2581_p0 = por %p2580_p13, %p2579_p12 }
  0x1e   :  { %p2582_p1 = pnand %p2581_p0, %p2575_p11 }
  0x20   :  { %2585 = shalt.err (!%p2582_p1)
}
  0x21   :  { %s2594_s1 = smov 256   ;;  %s2595_s25 = smov 16  }
  0x22   :  { %42 = dma.hbm_to_vmem [thread:$0]  %s4182_s3, 16384, %s37_s16, [#allocation5], %s2594_s1, %s2594_s1, %s2595_s25  }
  0x23   :  { %2586 = dma.done.wait [#allocation3], 5120  }
  0x24   :  { %2587 = vsyncadd [#allocation3], 4294962176 }
  0x25   :  { %2588 = dma.done.wait [#allocation5], 16384  }
  0x26   :  { %2589 = vsyncadd [#allocation5], 4294950912  ;;  %v2596_v0 = vmov 0.0   ;;  %v93_v1 = vld [vmem:[#allocation2 + $0x8] sm:$0xff]  ;;  %v92_v3 = vld [vmem:[#allocation2] sm:$0xff]  ;;  %vm153_vm0 = vcmask 654336  }
  0x27   :  { %410 = vmatprep.mubr.f32.mxu1 %v2596_v0  ;;  %314 = vmatprep.mubr.f32.mxu0 %v2596_v0  ;;  %v97_v2 = vld [vmem:[#allocation2 + $0x28] sm:$0xff]  ;;  %v96_v5 = vld [vmem:[#allocation2 + $0x20] sm:$0xff]  ;;  %v95_v30 = vld [vmem:[#allocation2 + $0x18] sm:$0xff]  ;;  %vm1128_vm1 = vcmask 1040384  }
  0x28   :  { %v2093_v4 = vpack.c.bf16 %v97_v2, %v93_v1  ;;  %v101_v6 = vld [vmem:[#allocation2 + $0x48] sm:$0xff]  ;;  %v2095_v8 = vpack.c.bf16 %v96_v5, %v92_v3  ;;  %v100_v10 = vld [vmem:[#allocation2 + $0x40] sm:$0xff]  ;;  %v99_v31 = vld [vmem:[#allocation2 + $0x38] sm:$0xff] }
  0x29   :  { %v105_v7 = vld [vmem:[#allocation2 + $0x68] sm:$0xff]  ;;  %v104_v11 = vld [vmem:[#allocation2 + $0x60] sm:$0xff]  ;;  %v2113_v33 = vpack.c.bf16 %v99_v31, %v95_v30  ;;  %v94_v34 = vld [vmem:[#allocation2 + $0x10] sm:$0xff] }
  0x2a   :  { %v2097_v9 = vpack.c.bf16 %v105_v7, %v101_v6  ;;  %v109_v12 = vld [vmem:[#allocation2 + $0x88] sm:$0xff]  ;;  %2517 = vmatprep.subr.bf16.mxu1 %v2093_v4  ;;  %2094 = vmatprep.subr.bf16.mxu0 %v2093_v4  ;;  %v2099_v14 = vpack.c.bf16 %v104_v11, %v100_v10  ;;  %v108_v16 = vld [vmem:[#allocation2 + $0x80] sm:$0xff]  ;;  %v98_v35 = vld [vmem:[#allocation2 + $0x30] sm:$0xff] }
  0x2b   :  { %v113_v13 = vld [vmem:[#allocation2 + $0xa8] sm:$0xff]  ;;  %2522 = vmatpush1.bf16.msra.mxu1 %v2095_v8  ;;  %2096 = vmatpush1.bf16.msra.mxu0 %v2095_v8  ;;  %v112_v17 = vld [vmem:[#allocation2 + $0xa0] sm:$0xff]  ;;  %v103_v36 = vld [vmem:[#allocation2 + $0x58] sm:$0xff]  ;;  %v2115_v39 = vpack.c.bf16 %v98_v35, %v94_v34 }
  0x2c   :  { %2518 = vmatprep.subr.bf16.mxu1 %v2097_v9  ;;  %v2101_v15 = vpack.c.bf16 %v113_v13, %v109_v12  ;;  %2098 = vmatprep.subr.bf16.mxu0 %v2097_v9  ;;  %v117_v18 = vld [vmem:[#allocation2 + $0xc8] sm:$0xff]  ;;  %v2103_v20 = vpack.c.bf16 %v112_v17, %v108_v16  ;;  %v116_v22 = vld [vmem:[#allocation2 + $0xc0] sm:$0xff]  ;;  %v107_v37 = vld [vmem:[#allocation2 + $0x78] sm:$0xff] }
  0x2d   :  { %v121_v19 = vld [vmem:[#allocation2 + $0xe8] sm:$0xff]  ;;  %v120_v23 = vld [vmem:[#allocation2 + $0xe0] sm:$0xff]  ;;  %v2117_v41 = vpack.c.bf16 %v107_v37, %v103_v36  ;;  %v102_v42 = vld [vmem:[#allocation2 + $0x50] sm:$0xff] }
  0x2e   :  { %v2105_v21 = vpack.c.bf16 %v121_v19, %v117_v18  ;;  %v125_v24 = vld [vmem:[#allocation2 + $0x108] sm:$0xff]  ;;  %v2107_v26 = vpack.c.bf16 %v120_v23, %v116_v22  ;;  %v124_v28 = vld [vmem:[#allocation2 + $0x100] sm:$0xff]  ;;  %v106_v43 = vld [vmem:[#allocation2 + $0x70] sm:$0xff] }
  0x2f   :  { %2523 = vmatpush1.bf16.msra.mxu1 %v2099_v14  ;;  %2100 = vmatpush1.bf16.msra.mxu0 %v2099_v14  ;;  %v129_v25 = vld [vmem:[#allocation2 + $0x128] sm:$0xff]  ;;  %v128_v29 = vld [vmem:[#allocation2 + $0x120] sm:$0xff]  ;;  %v111_v44 = vld [vmem:[#allocation2 + $0x98] sm:$0xff]  ;;  %v2119_v47 = vpack.c.bf16 %v106_v43, %v102_v42 }
  0x30   :  { %2519 = vmatprep.subr.bf16.mxu1 %v2101_v15  ;;  %2102 = vmatprep.subr.bf16.mxu0 %v2101_v15  ;;  %v2109_v27 = vpack.c.bf16 %v129_v25, %v125_v24  ;;  %v2111_v32 = vpack.c.bf16 %v128_v29, %v124_v28  ;;  %v2666_v38 = vld [vmem:[%s4179_s0 + $0x80] sm:$0xff]  ;;  %v115_v45 = vld [vmem:[#allocation2 + $0xb8] sm:$0xff]  ;;  %v2681_v46 = vld [vmem:[%s4179_s0 + $0x88] sm:$0xff] }
  0x31   :  { %v2671_v40 = vld [vmem:[%s4179_s0] sm:$0xff]  ;;  %v2686_v48 = vld [vmem:[%s4179_s0 + $0x8] sm:$0xff]  ;;  %v2121_v49 = vpack.c.bf16 %v115_v45, %v111_v44  ;;  %v110_v50 = vld [vmem:[#allocation2 + $0x90] sm:$0xff] }
  0x32   :  { %v114_v51 = vld [vmem:[#allocation2 + $0xb0] sm:$0xff]  ;;  %v119_v52 = vld [vmem:[#allocation2 + $0xd8] sm:$0xff]  ;;  %v2729_v5 = vld [vmem:[%s4179_s0 + $0xa0] sm:$0xff] }
  0x33   :  { %2524 = vmatpush1.bf16.msra.mxu1 %v2103_v20  ;;  %2104 = vmatpush1.bf16.msra.mxu0 %v2103_v20  ;;  %v123_v53 = vld [vmem:[#allocation2 + $0xf8] sm:$0xff]  ;;  %v2697_v54 = vld [vmem:[%s4179_s0 + $0x90] sm:$0xff]  ;;  %v2123_v55 = vpack.c.bf16 %v114_v51, %v110_v50  ;;  %v2734_v7 = vld [vmem:[%s4179_s0 + $0x20] sm:$0xff] }
  0x34   :  { %2520 = vmatprep.subr.bf16.mxu1 %v2105_v21  ;;  %2106 = vmatprep.subr.bf16.mxu0 %v2105_v21  ;;  %v2702_v56 = vld [vmem:[%s4179_s0 + $0x10] sm:$0xff]  ;;  %v2125_v57 = vpack.c.bf16 %v123_v53, %v119_v52  ;;  %v127_v60 = vld [vmem:[#allocation2 + $0x118] sm:$0xff]  ;;  %v2745_v8 = vld [vmem:[%s4179_s0 + $0xa8] sm:$0xff] }
  0x35   :  { %v118_v58 = vld [vmem:[#allocation2 + $0xd0] sm:$0xff]  ;;  %v131_v61 = vld [vmem:[#allocation2 + $0x138] sm:$0xff]  ;;  %v2750_v9 = vld [vmem:[%s4179_s0 + $0x28] sm:$0xff] }
  0x36   :  { %v122_v59 = vld [vmem:[#allocation2 + $0xf0] sm:$0xff]  ;;  %v2713_v62 = vld [vmem:[%s4179_s0 + $0x98] sm:$0xff]  ;;  %v2129_v2 = vpack.c.bf16 %v131_v61, %v127_v60  ;;  %v2793_v14 = vld [vmem:[%s4179_s0 + $0xc0] sm:$0xff] }
  0x37   :  { %2525 = vmatpush1.bf16.msra.mxu1 %v2107_v26  ;;  %2108 = vmatpush1.bf16.msra.mxu0 %v2107_v26  ;;  %v2127_v63 = vpack.c.bf16 %v122_v59, %v118_v58  ;;  %v2718_v1 = vld [vmem:[%s4179_s0 + $0x18] sm:$0xff]  ;;  %v126_v3 = vld [vmem:[#allocation2 + $0x110] sm:$0xff]  ;;  %v68_v15 = vld [vmem:[%s4179_s0 + $0x40] sm:$0xff] }
  0x38   :  { %2521 = vmatprep.subr.bf16.mxu1 %v2109_v27  ;;  %2110 = vmatprep.subr.bf16.mxu0 %v2109_v27  ;;  %v130_v4 = vld [vmem:[#allocation2 + $0x130] sm:$0xff]  ;;  %v2777_v12 = vld [vmem:[%s4179_s0 + $0xb8] sm:$0xff]  ;;  %v2806_v16 = vld [vmem:[%s4179_s0 + $0xc8] sm:$0xff] }
  0x39   :  { %v2131_v6 = vpack.c.bf16 %v130_v4, %v126_v3  ;;  %v2761_v10 = vld [vmem:[%s4179_s0 + $0xb0] sm:$0xff]  ;;  %v2783_v13 = vld [vmem:[%s4179_s0 + $0x38] sm:$0xff]  ;;  %v69_v17 = vld [vmem:[%s4179_s0 + $0x48] sm:$0xff] }
  0x3a   :  { %v2767_v11 = vld [vmem:[%s4179_s0 + $0x30] sm:$0xff]  ;;  %v2832_v20 = vld [vmem:[%s4179_s0 + $0xd8] sm:$0xff]  ;;  %v2845_v22 = vld [vmem:[%s4179_s0 + $0xe0] sm:$0xff] }
  0x3b   :  { %2526 = vmatpush1.bf16.msra.mxu1 %v2111_v32  ;;  %2112 = vmatpush1.bf16.msra.mxu0 %v2111_v32  ;;  %v2819_v18 = vld [vmem:[%s4179_s0 + $0xd0] sm:$0xff]  ;;  %v71_v21 = vld [vmem:[%s4179_s0 + $0x58] sm:$0xff]  ;;  %v72_v23 = vld [vmem:[%s4179_s0 + $0x60] sm:$0xff] }
  0x3c   :  { %2114 = vmatprep.subr.bf16.mxu1 %v2113_v33  ;;  %v70_v19 = vld [vmem:[%s4179_s0 + $0x50] sm:$0xff]  ;;  %v2858_v24 = vld [vmem:[%s4179_s0 + $0xe8] sm:$0xff]  ;;  %v2884_v28 = vld [vmem:[%s4179_s0 + $0xf8] sm:$0xff] }
  0x3d   :  { %v73_v25 = vld [vmem:[%s4179_s0 + $0x68] sm:$0xff]  ;;  %v2871_v26 = vld [vmem:[%s4179_s0 + $0xf0] sm:$0xff]  ;;  %v75_v29 = vld [vmem:[%s4179_s0 + $0x78] sm:$0xff] }
  0x3e   :  { %2043 = vmatmul.mubr.msk.f32.vlgmr.msra.gmra.mrb[0].mxu1 %vm153_vm0, %v2666_v38  ;;  %2027 = vmatmul.mubr.msk.f32.vlgmr.msra.gmra.mrb[0].mxu0 %vm153_vm0, %v2671_v40  ;;  %v74_v27 = vld [vmem:[%s4179_s0 + $0x70] sm:$0xff]  ;;  %v1136_v50 = vld [vmem:[#allocation4 + $0x18] sm:$0xff]  ;;  %v1133_v52 = vld [vmem:[#allocation4] sm:$0xff] }
  0x3f   :  { %2116 = vmatpush1.bf16.msra.mxu1 %v2115_v39  ;;  %416 = vmatprep.mubr.f32.mxu1 %v2596_v0  ;;  %v1135_v53 = vld [vmem:[#allocation4 + $0x10] sm:$0xff]  ;;  %v1138_v59 = vld [vmem:[#allocation4 + $0x28] sm:$0xff]  ;;  %v1140_v60 = vld [vmem:[#allocation4 + $0x38] sm:$0xff] }
  0x40   :  { %2118 = vmatprep.subr.bf16.mxu1 %v2117_v41  ;;  %320 = vmatprep.mubr.f32.mxu0 %v2596_v0  ;;  %v2137_v61 = vpack.c.bf16 %v1140_v60, %v1138_v59  ;;  %v1154_v59 = vld [vmem:[#allocation4 + $0xa8] sm:$0xff]  ;;  %v1156_v60 = vld [vmem:[#allocation4 + $0xb8] sm:$0xff] }
  0x42   :  { %2044 = vmatmul.mubr.msk.f32.gmra.mrb[2].mxu1 %vm153_vm0, %v2681_v46  ;;  %2028 = vmatmul.mubr.msk.f32.gmra.mrb[2].mxu0 %vm153_vm0, %v2686_v48 }
  0x43   :  { %422 = vmatprep.mubr.f32.mxu1 %v2596_v0  ;;  %2120 = vmatpush1.bf16.msra.mxu1 %v2119_v47 }
  0x44   :  { %2122 = vmatprep.subr.bf16.mxu1 %v2121_v49  ;;  %326 = vmatprep.mubr.f32.mxu0 %v2596_v0  ;;  %v1134_v49 = vld [vmem:[#allocation4 + $0x8] sm:$0xff] }
  0x45   :  { %v2133_v51 = vpack.c.bf16 %v1136_v50, %v1134_v49  ;;  %v1151_v49 = vld [vmem:[#allocation4 + $0x90] sm:$0xff] }
  0x46   :  { %2045 = vmatmul.mubr.msk.f32.gmra.mrb[4].mxu1 %vm153_vm0, %v2697_v54  ;;  %2029 = vmatmul.mubr.msk.f32.gmra.mrb[4].mxu0 %vm153_vm0, %v2702_v56 }
  0x47   :  { %428 = vmatprep.mubr.f32.mxu1 %v2596_v0  ;;  %2124 = vmatpush1.bf16.msra.mxu1 %v2123_v55 }
  0x48   :  { %2126 = vmatprep.subr.bf16.mxu1 %v2125_v57  ;;  %332 = vmatprep.mubr.f32.mxu0 %v2596_v0 }
  0x49   :  { %2134 = vmatprep.subr.bf16.mxu0 %v2133_v51 }
  0x4a   :  { %2046 = vmatmul.mubr.msk.f32.gmra.mrb[6].mxu1 %vm153_vm0, %v2713_v62  ;;  %2030 = vmatmul.mubr.msk.f32.gmra.mrb[6].mxu0 %vm153_vm0, %v2718_v1 }
  0x4b   :  { %434 = vmatprep.mubr.f32.mxu1 %v2596_v0  ;;  %2128 = vmatpush1.bf16.msra.mxu1 %v2127_v63  ;;  %v1139_v63 = vld [vmem:[#allocation4 + $0x30] sm:$0xff] }
  0x4c   :  { %2130 = vmatprep.subr.bf16.mxu1 %v2129_v2  ;;  %338 = vmatprep.mubr.f32.mxu0 %v2596_v0 }
  0x4e   :  { %2047 = vmatmul.mubr.msk.f32.gmra.mrb[8].mxu1 %vm153_vm0, %v2729_v5  ;;  %2031 = vmatmul.mubr.msk.f32.gmra.mrb[8].mxu0 %vm153_vm0, %v2734_v7 }
  0x4f   :  { %440 = vmatprep.mubr.f32.mxu1 %v2596_v0  ;;  %2132 = vmatpush1.bf16.msra.mxu1 %v2131_v6  ;;  %v1142_v6 = vld [vmem:[#allocation4 + $0x48] sm:$0xff] }
  0x50   :  { %344 = vmatprep.mubr.f32.mxu0 %v2596_v0 }
  0x52   :  { %2048 = vmatmul.mubr.msk.f32.gmra.mrb[10].mxu1 %vm153_vm0, %v2745_v8  ;;  %2032 = vmatmul.mubr.msk.f32.gmra.mrb[10].mxu0 %vm153_vm0, %v2750_v9 }
  0x53   :  { %446 = vmatprep.mubr.f32.mxu1 %v2596_v0  ;;  %350 = vmatprep.mubr.f32.mxu0 %v2596_v0 }
  0x56   :  { %2049 = vmatmul.mubr.msk.f32.gmra.mrb[12].mxu1 %vm153_vm0, %v2761_v10  ;;  %2033 = vmatmul.mubr.msk.f32.gmra.mrb[12].mxu0 %vm153_vm0, %v2767_v11 }
  0x57   :  { %452 = vmatprep.mubr.f32.mxu1 %v2596_v0  ;;  %356 = vmatprep.mubr.f32.mxu0 %v2596_v0 }
  0x5a   :  { %2050 = vmatmul.mubr.msk.f32.gmra.mrb[14].mxu1 %vm153_vm0, %v2777_v12  ;;  %2034 = vmatmul.mubr.msk.f32.gmra.mrb[14].mxu0 %vm153_vm0, %v2783_v13 }
  0x5b   :  { %458 = vmatprep.mubr.f32.mxu1 %v2596_v0  ;;  %362 = vmatprep.mubr.f32.mxu0 %v2596_v0 }
  0x5e   :  { %2051 = vmatmul.mubr.msk.f32.gmra.mrb[16].mxu1 %vm153_vm0, %v2793_v14  ;;  %2035 = vmatmul.mubr.msk.f32.gmra.mrb[16].mxu0 %vm153_vm0, %v68_v15 }
  0x5f   :  { %464 = vmatprep.mubr.f32.mxu1 %v2596_v0  ;;  %368 = vmatprep.mubr.f32.mxu0 %v2596_v0 }
  0x62   :  { %2052 = vmatmul.mubr.msk.f32.gmra.mrb[18].mxu1 %vm153_vm0, %v2806_v16  ;;  %2036 = vmatmul.mubr.msk.f32.gmra.mrb[18].mxu0 %vm153_vm0, %v69_v17 }
  0x63   :  { %470 = vmatprep.mubr.f32.mxu1 %v2596_v0  ;;  %374 = vmatprep.mubr.f32.mxu0 %v2596_v0 }
  0x66   :  { %2053 = vmatmul.mubr.msk.f32.gmra.mrb[20].mxu1 %vm153_vm0, %v2819_v18  ;;  %2037 = vmatmul.mubr.msk.f32.gmra.mrb[20].mxu0 %vm153_vm0, %v70_v19 }
  0x67   :  { %476 = vmatprep.mubr.f32.mxu1 %v2596_v0  ;;  %380 = vmatprep.mubr.f32.mxu0 %v2596_v0 }
  0x6a   :  { %2054 = vmatmul.mubr.msk.f32.gmra.mrb[22].mxu1 %vm153_vm0, %v2832_v20  ;;  %2038 = vmatmul.mubr.msk.f32.gmra.mrb[22].mxu0 %vm153_vm0, %v71_v21 }
  0x6b   :  { %482 = vmatprep.mubr.f32.mxu1 %v2596_v0  ;;  %386 = vmatprep.mubr.f32.mxu0 %v2596_v0 }
  0x6e   :  { %2055 = vmatmul.mubr.msk.f32.gmra.mrb[24].mxu1 %vm153_vm0, %v2845_v22  ;;  %2039 = vmatmul.mubr.msk.f32.gmra.mrb[24].mxu0 %vm153_vm0, %v72_v23 }
  0x6f   :  { %488 = vmatprep.mubr.f32.mxu1 %v2596_v0  ;;  %392 = vmatprep.mubr.f32.mxu0 %v2596_v0 }
  0x72   :  { %2056 = vmatmul.mubr.msk.f32.gmra.mrb[26].mxu1 %vm153_vm0, %v2858_v24  ;;  %2040 = vmatmul.mubr.msk.f32.gmra.mrb[26].mxu0 %vm153_vm0, %v73_v25 }
  0x73   :  { %494 = vmatprep.mubr.f32.mxu1 %v2596_v0  ;;  %398 = vmatprep.mubr.f32.mxu0 %v2596_v0 }
  0x76   :  { %2057 = vmatmul.mubr.msk.f32.gmra.mrb[28].mxu1 %vm153_vm0, %v2871_v26  ;;  %2041 = vmatmul.mubr.msk.f32.gmra.mrb[28].mxu0 %vm153_vm0, %v74_v27 }
  0x77   :  { %500 = vmatprep.mubr.f32.mxu1 %v2596_v0  ;;  %404 = vmatprep.mubr.f32.mxu0 %v2596_v0 }
  0x7a   :  { %2058 = vmatmul.mubr.msk.f32.gmra.mrb[30].mxu1 %vm153_vm0, %v2884_v28  ;;  %2042 = vmatmul.mubr.msk.f32.gmra.mrb[30].mxu0 %vm153_vm0, %v75_v29 }
  0x7b   :  { %571 = vmatprep.mubr.f32.mxu1 %v2596_v0 }
  0x7e   :  { %2059 = vmatmul.mubr.msk.f32.vlgmr.msra.gmra.mrb[32].mxu1 %vm153_vm0, %v2671_v40 }
  0x7f   :  { %577 = vmatprep.mubr.f32.mxu1 %v2596_v0 }
  0x82   :  { %2060 = vmatmul.mubr.msk.f32.gmra.mrb[34].mxu1 %vm153_vm0, %v2686_v48 }
  0x83   :  { %583 = vmatprep.mubr.f32.mxu1 %v2596_v0 }
  0x86   :  { %2061 = vmatmul.mubr.msk.f32.gmra.mrb[36].mxu1 %vm153_vm0, %v2702_v56  ;;  %v2135_v56 = vpack.c.bf16 %v1135_v53, %v1133_v52 }
  0x87   :  { %589 = vmatprep.mubr.f32.mxu1 %v2596_v0 }
  0x88   :  { %2136 = vmatpush1.bf16.msra.mxu0 %v2135_v56 }
  0x89   :  { %2138 = vmatprep.subr.bf16.mxu0 %v2137_v61  ;;  %v2153_v61 = vpack.c.bf16 %v1156_v60, %v1154_v59  ;;  %v1161_v59 = vld [vmem:[#allocation4 + $0xe0] sm:$0xff]  ;;  %v1163_v60 = vld [vmem:[#allocation4 + $0xf0] sm:$0xff] }
  0x8a   :  { %2062 = vmatmul.mubr.msk.f32.gmra.mrb[38].mxu1 %vm153_vm0, %v2718_v1 }
  0x8b   :  { %595 = vmatprep.mubr.f32.mxu1 %v2596_v0 }
  0x8e   :  { %2063 = vmatmul.mubr.msk.f32.gmra.mrb[40].mxu1 %vm153_vm0, %v2734_v7  ;;  %v1144_v7 = vld [vmem:[#allocation4 + $0x58] sm:$0xff] }
  0x8f   :  { %601 = vmatprep.mubr.f32.mxu1 %v2596_v0 }
  0x92   :  { %2064 = vmatmul.mubr.msk.f32.gmra.mrb[42].mxu1 %vm153_vm0, %v2750_v9  ;;  %v1141_v9 = vld [vmem:[#allocation4 + $0x40] sm:$0xff] }
  0x93   :  { %607 = vmatprep.mubr.f32.mxu1 %v2596_v0 }
  0x96   :  { %2065 = vmatmul.mubr.msk.f32.gmra.mrb[44].mxu1 %vm153_vm0, %v2767_v11 }
  0x97   :  { %613 = vmatprep.mubr.f32.mxu1 %v2596_v0 }
  0x9a   :  { %2066 = vmatmul.mubr.msk.f32.gmra.mrb[46].mxu1 %vm153_vm0, %v2783_v13 }
  0x9b   :  { %619 = vmatprep.mubr.f32.mxu1 %v2596_v0 }
  0x9e   :  { %2067 = vmatmul.mubr.msk.f32.gmra.mrb[48].mxu1 %vm153_vm0, %v68_v15 }
  0x9f   :  { %625 = vmatprep.mubr.f32.mxu1 %v2596_v0 }
  0xa2   :  { %2068 = vmatmul.mubr.msk.f32.gmra.mrb[50].mxu1 %vm153_vm0, %v69_v17  ;;  %v1148_v17 = vld [vmem:[#allocation4 + $0x78] sm:$0xff] }
  0xa3   :  { %631 = vmatprep.mubr.f32.mxu1 %v2596_v0 }
  0xa6   :  { %2069 = vmatmul.mubr.msk.f32.gmra.mrb[52].mxu1 %vm153_vm0, %v70_v19  ;;  %v1145_v19 = vld [vmem:[#allocation4 + $0x60] sm:$0xff] }
  0xa7   :  { %637 = vmatprep.mubr.f32.mxu1 %v2596_v0 }
  0xaa   :  { %2070 = vmatmul.mubr.msk.f32.gmra.mrb[54].mxu1 %vm153_vm0, %v71_v21 }
  0xab   :  { %643 = vmatprep.mubr.f32.mxu1 %v2596_v0 }
  0xae   :  { %2071 = vmatmul.mubr.msk.f32.gmra.mrb[56].mxu1 %vm153_vm0, %v72_v23 }
  0xaf   :  { %649 = vmatprep.mubr.f32.mxu1 %v2596_v0 }
  0xb2   :  { %2072 = vmatmul.mubr.msk.f32.gmra.mrb[58].mxu1 %vm153_vm0, %v73_v25 }
  0xb3   :  { %655 = vmatprep.mubr.f32.mxu1 %v2596_v0 }
  0xb6   :  { %2073 = vmatmul.mubr.msk.f32.gmra.mrb[60].mxu1 %vm153_vm0, %v74_v27  ;;  %v1152_v27 = vld [vmem:[#allocation4 + $0x98] sm:$0xff] }
  0xb7   :  { %661 = vmatprep.mubr.f32.mxu1 %v2596_v0 }
  0xba   :  { %2074 = vmatmul.mubr.msk.f32.gmra.mrb[62].mxu1 %vm153_vm0, %v75_v29  ;;  %v1149_v29 = vld [vmem:[#allocation4 + $0x80] sm:$0xff] }
  0xbb   :  { %667 = vmatprep.mubr.f32.mxu1 %v2596_v0  ;;  %v2151_v52 = vpack.c.bf16 %v1151_v49, %v1149_v29  ;;  %v1162_v29 = vld [vmem:[#allocation4 + $0xe8] sm:$0xff]  ;;  %v1164_v49 = vld [vmem:[#allocation4 + $0xf8] sm:$0xff] }
  0xbe   :  { %2075 = vmatmul.mubr.msk.f32.gmra.mrb[64].mxu1 %vm153_vm0, %v2666_v38 }
  0xbf   :  { %673 = vmatprep.mubr.f32.mxu1 %v2596_v0 }
  0xc2   :  { %2076 = vmatmul.mubr.msk.f32.gmra.mrb[66].mxu1 %vm153_vm0, %v2681_v46 }
  0xc3   :  { %679 = vmatprep.mubr.f32.mxu1 %v2596_v0 }
  0xc6   :  { %2077 = vmatmul.mubr.msk.f32.gmra.mrb[68].mxu1 %vm153_vm0, %v2697_v54 }
  0xc7   :  { %685 = vmatprep.mubr.f32.mxu1 %v2596_v0 }
  0xca   :  { %2078 = vmatmul.mubr.msk.f32.gmra.mrb[70].mxu1 %vm153_vm0, %v2713_v62  ;;  %v1137_v62 = vld [vmem:[#allocation4 + $0x20] sm:$0xff] }
  0xcb   :  { %691 = vmatprep.mubr.f32.mxu1 %v2596_v0  ;;  %v2139_v3 = vpack.c.bf16 %v1139_v63, %v1137_v62  ;;  %v1153_v62 = vld [vmem:[#allocation4 + $0xa0] sm:$0xff]  ;;  %v1155_v63 = vld [vmem:[#allocation4 + $0xb0] sm:$0xff] }
  0xcd   :  { %2140 = vmatpush1.bf16.msra.mxu0 %v2139_v3 }
  0xce   :  { %2079 = vmatmul.mubr.msk.f32.gmra.mrb[72].mxu1 %vm153_vm0, %v2729_v5 }
  0xcf   :  { %697 = vmatprep.mubr.f32.mxu1 %v2596_v0 }
  0xd2   :  { %2080 = vmatmul.mubr.msk.f32.gmra.mrb[74].mxu1 %vm153_vm0, %v2745_v8  ;;  %v2141_v8 = vpack.c.bf16 %v1144_v7, %v1142_v6  ;;  %v2155_v7 = vpack.c.bf16 %v1155_v63, %v1153_v62  ;;  %v2163_v63 = vpack.c.bf16 %v1163_v60, %v1161_v59 }
  0xd3   :  { %703 = vmatprep.mubr.f32.mxu1 %v2596_v0 }
  0xd4   :  { %2142 = vmatprep.subr.bf16.mxu0 %v2141_v8 }
  0xd6   :  { %2081 = vmatmul.mubr.msk.f32.gmra.mrb[76].mxu1 %vm153_vm0, %v2761_v10  ;;  %v1143_v10 = vld [vmem:[#allocation4 + $0x50] sm:$0xff] }
  0xd7   :  { %709 = vmatprep.mubr.f32.mxu1 %v2596_v0  ;;  %v2143_v13 = vpack.c.bf16 %v1143_v10, %v1141_v9  ;;  %v1158_v10 = vld [vmem:[#allocation4 + $0xc8] sm:$0xff] }
  0xd9   :  { %2144 = vmatpush1.bf16.msra.mxu0 %v2143_v13  ;;  %v1160_v13 = vld [vmem:[#allocation4 + $0xd8] sm:$0xff] }
  0xda   :  { %2082 = vmatmul.mubr.msk.f32.gmra.mrb[78].mxu1 %vm153_vm0, %v2777_v12 }
  0xdb   :  { %715 = vmatprep.mubr.f32.mxu1 %v2596_v0 }
  0xde   :  { %2083 = vmatmul.mubr.msk.f32.gmra.mrb[80].mxu1 %vm153_vm0, %v2793_v14 }
  0xdf   :  { %721 = vmatprep.mubr.f32.mxu1 %v2596_v0 }
  0xe2   :  { %2084 = vmatmul.mubr.msk.f32.gmra.mrb[82].mxu1 %vm153_vm0, %v2806_v16  ;;  %v1146_v16 = vld [vmem:[#allocation4 + $0x68] sm:$0xff] }
  0xe3   :  { %727 = vmatprep.mubr.f32.mxu1 %v2596_v0 }
  0xe6   :  { %2085 = vmatmul.mubr.msk.f32.gmra.mrb[84].mxu1 %vm153_vm0, %v2819_v18  ;;  %v2145_v18 = vpack.c.bf16 %v1148_v17, %v1146_v16  ;;  %v2157_v16 = vpack.c.bf16 %v1160_v13, %v1158_v10  ;;  %v1157_v17 = vld [vmem:[#allocation4 + $0xc0] sm:$0xff] }
  0xe7   :  { %733 = vmatprep.mubr.f32.mxu1 %v2596_v0 }
  0xe8   :  { %2146 = vmatprep.subr.bf16.mxu0 %v2145_v18  ;;  %v1159_v18 = vld [vmem:[#allocation4 + $0xd0] sm:$0xff] }
  0xea   :  { %2086 = vmatmul.mubr.msk.f32.gmra.mrb[86].mxu1 %vm153_vm0, %v2832_v20  ;;  %v1147_v20 = vld [vmem:[#allocation4 + $0x70] sm:$0xff] }
  0xeb   :  { %739 = vmatprep.mubr.f32.mxu1 %v2596_v0  ;;  %v2147_v23 = vpack.c.bf16 %v1147_v20, %v1145_v19 }
  0xed   :  { %2148 = vmatpush1.bf16.msra.mxu0 %v2147_v23  ;;  %v2159_v23 = vpack.c.bf16 %v1159_v18, %v1157_v17  ;;  %v1168_v17 = vld [vmem:[#allocation4 + $0x118] sm:$0xff] }
  0xee   :  { %2087 = vmatmul.mubr.msk.f32.gmra.mrb[88].mxu1 %vm153_vm0, %v2845_v22 }
  0xef   :  { %745 = vmatprep.mubr.f32.mxu1 %v2596_v0 }
  0xf2   :  { %2088 = vmatmul.mubr.msk.f32.gmra.mrb[90].mxu1 %vm153_vm0, %v2858_v24 }
  0xf3   :  { %751 = vmatprep.mubr.f32.mxu1 %v2596_v0 }
  0xf6   :  { %2089 = vmatmul.mubr.msk.f32.gmra.mrb[92].mxu1 %vm153_vm0, %v2871_v26  ;;  %v1150_v26 = vld [vmem:[#allocation4 + $0x88] sm:$0xff] }
  0xf7   :  { %757 = vmatprep.mubr.f32.mxu1 %v2596_v0 }
  0xfa   :  { %2090 = vmatmul.mubr.msk.f32.gmra.mrb[94].mxu1 %vm153_vm0, %v2884_v28  ;;  %v2149_v28 = vpack.c.bf16 %v1152_v27, %v1150_v26  ;;  %v133_v26 = vlaneseq }
  0xfc   :  { %2150 = vmatprep.subr.bf16.mxu0 %v2149_v28 }
  0xfd   :  { %2152 = vmatpush1.bf16.msra.mxu0 %v2151_v52  ;;  %v2161_v52 = vpack.c.bf16 %v1164_v49, %v1162_v29  ;;  %v1167_v29 = vld [vmem:[#allocation4 + $0x110] sm:$0xff] }
  0xfe   :  { %2154 = vmatprep.subr.bf16.mxu0 %v2153_v61 }
 0x101   :  { %2156 = vmatpush1.bf16.msra.mxu0 %v2155_v7  ;;  %v3081_v7 = vshrl.u32 %v133_v26, 7 }
 0x102   :  { %2158 = vmatprep.subr.bf16.mxu0 %v2157_v16  ;;  %v1166_v16 = vld [vmem:[#allocation4 + $0x108] sm:$0xff] }
 0x103   :  { %4213 = vst [vmem:[#allocation28_spill] sm:$0xff] %v3081_v7  ;;  %v2165_v18 = vpack.c.bf16 %v1168_v17, %v1166_v16  ;;  %v3092_v59 = vsub.s32 0, %v3081_v7  ;;  %v1170_v16 = vld [vmem:[#allocation4 + $0x128] sm:$0xff]  ;;  %v1172_v17 = vld [vmem:[#allocation4 + $0x138] sm:$0xff] }
 0x105   :  { %2160 = vmatpush1.bf16.msra.mxu0 %v2159_v23  ;;  %v1165_v23 = vld [vmem:[#allocation4 + $0x100] sm:$0xff]  ;;  %4216 = vst [vmem:[#allocation31_spill] sm:$0xff] %v3092_v59 }
 0x106   :  { %2162 = vmatprep.subr.bf16.mxu0 %v2161_v52  ;;  %v53_v52 = vld [vmem:[%s4181_s2] ss:$4 sm:$0xf] }
 0x109   :  { %2164 = vmatpush1.bf16.msra.mxu0 %v2163_v63  ;;  %v3102_v63 = vsub.s32 1, %v3081_v7 }
 0x10a   :  { %2166 = vmatprep.subr.bf16.mxu0 %v2165_v18  ;;  %v3109_v18 = vrot.slane %v53_v52, %v3092_v59  ;;  %v1173_v59 = vld [vmem:[#allocation4 + $0x140] sm:$0xff] }
 0x10b   :  { %4218 = vst [vmem:[#allocation33_spill] sm:$0xff] %v3102_v63 }
 0x111   :  { %v2981_v30 = vpop.f32.mrb[0].mxu1  ;;  %v2983_v31 = vpop.f32.mrb[0].mxu0 }
 0x112   :  { %v2985_v32 = vpop.f32.mrb[1].mxu1  ;;  %v2987_v33 = vpop.f32.mrb[1].mxu0 }
 0x115   :  { %v2989_v34 = vpop.f32.mrb[2].mxu1  ;;  %v2991_v35 = vpop.f32.mrb[2].mxu0 }
 0x116   :  { %v2993_v36 = vpop.f32.mrb[3].mxu1  ;;  %v2995_v37 = vpop.f32.mrb[3].mxu0 }
 0x119   :  { %v2997_v0 = vpop.f32.mrb[4].mxu1  ;;  %v2999_v38 = vpop.f32.mrb[4].mxu0 }
 0x11a   :  { %v3001_v39 = vpop.f32.mrb[5].mxu1  ;;  %v3003_v40 = vpop.f32.mrb[5].mxu0 }
 0x11b   :  { %4193 = vst [vmem:[#allocation8_spill] sm:$0xff] %v3001_v39 }
 0x11d   :  { %v3005_v41 = vpop.f32.mrb[6].mxu1  ;;  %v3007_v42 = vpop.f32.mrb[6].mxu0 }
 0x11e   :  { %4194 = vst [vmem:[#allocation9_spill] sm:$0xff] %v3005_v41  ;;  %v3009_v43 = vpop.f32.mrb[7].mxu1  ;;  %v3011_v44 = vpop.f32.mrb[7].mxu0 }
 0x11f   :  { %4195 = vst [vmem:[#allocation10_spill] sm:$0xff] %v3009_v43 }
 0x121   :  { %v3013_v45 = vpop.f32.mrb[8].mxu1  ;;  %v3015_v46 = vpop.f32.mrb[8].mxu0 }
 0x122   :  { %4196 = vst [vmem:[#allocation11_spill] sm:$0xff] %v3013_v45  ;;  %v3017_v47 = vpop.f32.mrb[9].mxu1  ;;  %v3019_v48 = vpop.f32.mrb[9].mxu0 }
 0x123   :  { %4197 = vst [vmem:[#allocation12_spill] sm:$0xff] %v3017_v47 }
 0x125   :  { %v3021_v54 = vpop.f32.mrb[10].mxu1  ;;  %v3023_v55 = vpop.f32.mrb[10].mxu0 }
 0x126   :  { %4198 = vst [vmem:[#allocation13_spill] sm:$0xff] %v3021_v54  ;;  %v3025_v57 = vpop.f32.mrb[11].mxu1  ;;  %v3027_v58 = vpop.f32.mrb[11].mxu0 }
 0x127   :  { %4199 = vst [vmem:[#allocation14_spill] sm:$0xff] %v3025_v57  ;;  %v1183_v57 = vld [vmem:[#allocation4 + $0x190] sm:$0xff] }
 0x129   :  { %v3029_v1 = vpop.f32.mrb[12].mxu1  ;;  %v3031_v2 = vpop.f32.mrb[12].mxu0 }
 0x12a   :  { %4200 = vst [vmem:[#allocation15_spill] sm:$0xff] %v3029_v1  ;;  %v3033_v4 = vpop.f32.mrb[13].mxu1  ;;  %v3035_v5 = vpop.f32.mrb[13].mxu0 }
 0x12b   :  { %4201 = vst [vmem:[#allocation16_spill] sm:$0xff] %v3033_v4 }
 0x12d   :  { %v3037_v11 = vpop.f32.mrb[14].mxu1  ;;  %v3039_v12 = vpop.f32.mrb[14].mxu0 }
 0x12e   :  { %4202 = vst [vmem:[#allocation17_spill] sm:$0xff] %v3037_v11  ;;  %v3041_v14 = vpop.f32.mrb[15].mxu1  ;;  %v3043_v15 = vpop.f32.mrb[15].mxu0 }
 0x12f   :  { %4203 = vst [vmem:[#allocation18_spill] sm:$0xff] %v3041_v14  ;;  %v1179_v14 = vld [vmem:[#allocation4 + $0x170] sm:$0xff] }
 0x131   :  { %v3045_v21 = vpop.f32.mrb[16].mxu1  ;;  %v3047_v22 = vpop.f32.mrb[16].mxu0 }
 0x132   :  { %4204 = vst [vmem:[#allocation19_spill] sm:$0xff] %v3045_v21  ;;  %v3049_v24 = vpop.f32.mrb[17].mxu1  ;;  %v3051_v25 = vpop.f32.mrb[17].mxu0 }
 0x133   :  { %4205 = vst [vmem:[#allocation20_spill] sm:$0xff] %v3049_v24 }
 0x135   :  { %v3053_v50 = vpop.f32.mrb[18].mxu1  ;;  %v3055_v51 = vpop.f32.mrb[18].mxu0 }
 0x136   :  { %4206 = vst [vmem:[#allocation21_spill] sm:$0xff] %v3053_v50  ;;  %v3057_v53 = vpop.f32.mrb[19].mxu1  ;;  %v3059_v56 = vpop.f32.mrb[19].mxu0  ;;  %v1175_v50 = vld [vmem:[#allocation4 + $0x150] sm:$0xff] }
 0x137   :  { %4207 = vst [vmem:[#allocation22_spill] sm:$0xff] %v3057_v53 }
 0x139   :  { %v3061_v3 = vpop.f32.mrb[20].mxu1  ;;  %v3063_v6 = vpop.f32.mrb[20].mxu0 }
 0x13a   :  { %4208 = vst [vmem:[#allocation23_spill] sm:$0xff] %v3061_v3  ;;  %v3065_v8 = vpop.f32.mrb[21].mxu1  ;;  %v3067_v9 = vpop.f32.mrb[21].mxu0 }
 0x13b   :  { %4209 = vst [vmem:[#allocation24_spill] sm:$0xff] %v3065_v8 }
 0x13d   :  { %v3069_v19 = vpop.f32.mrb[22].mxu1  ;;  %v3071_v20 = vpop.f32.mrb[22].mxu0 }
 0x13e   :  { %4210 = vst [vmem:[#allocation25_spill] sm:$0xff] %v3069_v19  ;;  %v3073_v27 = vpop.f32.mrb[23].mxu1  ;;  %v3075_v28 = vpop.f32.mrb[23].mxu0 }
 0x13f   :  { %4211 = vst [vmem:[#allocation26_spill] sm:$0xff] %v3073_v27 }
 0x141   :  { %v3077_v61 = vpop.f32.mrb[24].mxu1  ;;  %v3079_v62 = vpop.f32.mrb[24].mxu0 }
 0x142   :  { %4212 = vst [vmem:[#allocation27_spill] sm:$0xff] %v3077_v61  ;;  %v3083_v10 = vpop.f32.mrb[25].mxu1  ;;  %v3085_v13 = vpop.f32.mrb[25].mxu0  ;;  %v2167_v61 = vpack.c.bf16 %v1167_v29, %v1165_v23  ;;  %v1169_v23 = vld [vmem:[#allocation4 + $0x120] sm:$0xff]  ;;  %v1171_v29 = vld [vmem:[#allocation4 + $0x130] sm:$0xff] }
 0x143   :  { %4214 = vst [vmem:[#allocation29_spill] sm:$0xff] %v3083_v10 }
 0x144   :  { %2168 = vmatpush1.bf16.msra.mxu0 %v2167_v61  ;;  %v3117_v61 = vrot.slane %v53_v52, %v3102_v63  ;;  %v2175_v63 = vpack.c.bf16 %v1175_v50, %v1173_v59  ;;  %v323_v50 = vadd.f32 %v2991_v35, %v3109_v18 }
 0x145   :  { %v3087_v49 = vpop.f32.mrb[26].mxu1  ;;  %v3089_v27 = vpop.f32.mrb[26].mxu0 }
 0x146   :  { %4215 = vst [vmem:[#allocation30_spill] sm:$0xff] %v3087_v49  ;;  %v3094_v26 = vpop.f32.mrb[27].mxu1  ;;  %v3096_v60 = vpop.f32.mrb[27].mxu0  ;;  %v2169_v49 = vpack.c.bf16 %v1172_v17, %v1170_v16  ;;  %v1174_v17 = vld [vmem:[#allocation4 + $0x148] sm:$0xff]  ;;  %v319_v3 = vadd.f32 %v2987_v33, %v3117_v61  ;;  %v325_v4 = vadd.f32 %v2995_v37, %v3117_v61  ;;  %v766_v35 = vmax.f32 %v323_v50, 0.0 }
 0x147   :  { %4217 = vst [vmem:[#allocation32_spill] sm:$0xff] %v3094_v26  ;;  %v2171_v26 = vpack.c.bf16 %v1171_v29, %v1169_v23  ;;  %v317_v23 = vadd.f32 %v2983_v31, %v3109_v18  ;;  %v4224_v31 = vsub.s32 3, %v3081_v7 }
 0x148   :  { %2170 = vmatprep.subr.bf16.mxu0 %v2169_v49  ;;  %v765_v11 = vmax.f32 %v319_v3, 0.0  ;;  %v329_v3 = vadd.f32 %v2999_v38, %v3109_v18  ;;  %v1188_v38 = vld [vmem:[#allocation4 + $0x1b8] sm:$0xff] }
 0x149   :  { %v3104_v10 = vpop.f32.mrb[28].mxu1  ;;  %v3106_v19 = vpop.f32.mrb[28].mxu0  ;;  %2172 = vmatpush1.bf16.msra.mxu0 %v2171_v26  ;;  %v4223_v26 = vsub.s32 2, %v3081_v7  ;;  %v764_v33 = vmax.f32 %v317_v23, 0.0  ;;  %v1182_v23 = vld [vmem:[#allocation4 + $0x188] sm:$0xff] }
 0x14a   :  { %4219 = vst [vmem:[#allocation34_spill] sm:$0xff] %v3104_v10  ;;  %v3111_v8 = vpop.f32.mrb[29].mxu1  ;;  %v3114_v53 = vpop.f32.mrb[29].mxu0  ;;  %v1176_v10 = vld [vmem:[#allocation4 + $0x158] sm:$0xff] }
 0x14b   :  { %4220 = vst [vmem:[#allocation35_spill] sm:$0xff] %v3111_v8  ;;  %v2173_v29 = vpack.c.bf16 %v1176_v10, %v1174_v17  ;;  %v3132_v16 = vrot.slane %v53_v52, %v4223_v26  ;;  %v3138_v10 = vrot.slane %v53_v52, %v4224_v31  ;;  %v1178_v17 = vld [vmem:[#allocation4 + $0x168] sm:$0xff]  ;;  %v1184_v31 = vld [vmem:[#allocation4 + $0x198] sm:$0xff] }
 0x14d   :  { %v3122_v8 = vpop.f32.mrb[30].mxu1  ;;  %v3126_v49 = vpop.f32.mrb[30].mxu0  ;;  %2174 = vmatprep.subr.bf16.mxu0 %v2173_v29 }
 0x14e   :  { %4221 = vst [vmem:[#allocation36_spill] sm:$0xff] %v3122_v8  ;;  %v3128_v24 = vpop.f32.mrb[31].mxu1  ;;  %v3134_v21 = vpop.f32.mrb[31].mxu0  ;;  %2176 = vmatpush1.bf16.msra.mxu0 %v2175_v63  ;;  %v1180_v8 = vld [vmem:[#allocation4 + $0x178] sm:$0xff] }
 0x14f   :  { %4222 = vst [vmem:[#allocation37_spill] sm:$0xff] %v3128_v24  ;;  %v2177_v59 = vpack.c.bf16 %v1180_v8, %v1178_v17  ;;  %v1177_v24 = vld [vmem:[#allocation4 + $0x160] sm:$0xff]  ;;  %v2181_v8 = vpack.c.bf16 %v1184_v31, %v1182_v23  ;;  %v768_v23 = vmax.f32 %v329_v3, 0.0  ;;  %v1187_v31 = vld [vmem:[#allocation4 + $0x1b0] sm:$0xff] }
 0x150   :  { %v2179_v29 = vpack.c.bf16 %v1179_v14, %v1177_v24  ;;  %v1181_v17 = vld [vmem:[#allocation4 + $0x180] sm:$0xff]  ;;  %v767_v14 = vmax.f32 %v325_v4, 0.0  ;;  %v335_v4 = vadd.f32 %v3007_v42, %v3109_v18  ;;  %v341_v42 = vadd.f32 %v3015_v46, %v3109_v18 }
 0x151   :  { %v573_v26 = vpop.f32.mrb[32].mxu1  ;;  %2178 = vmatprep.subr.bf16.mxu0 %v2177_v59  ;;  %v331_v59 = vadd.f32 %v3003_v40, %v3117_v61 }
 0x152   :  { %v574_v7 = vadd.f32 %v573_v26, %v3132_v16  ;;  %v575_v52 = vpop.f32.mrb[33].mxu1  ;;  %2180 = vmatpush1.bf16.msra.mxu0 %v2179_v29  ;;  %v2183_v26 = vpack.c.bf16 %v1183_v57, %v1181_v17  ;;  %v772_v43 = vmax.f32 %v341_v42, 0.0 }
 0x153   :  { %v576_v63 = vadd.f32 %v575_v52, %v3138_v10  ;;  %2182 = vmatprep.subr.bf16.mxu0 %v2181_v8  ;;  %v769_v57 = vmax.f32 %v331_v59, 0.0  ;;  %v337_v8 = vadd.f32 %v3011_v44, %v3117_v61  ;;  %v343_v44 = vadd.f32 %v3019_v48, %v3117_v61 }
 0x154   :  { %v3146_v1 = vadd.f32 %v764_v33, %v574_v7  ;;  %v1186_v33 = vld [vmem:[#allocation4 + $0x1a8] sm:$0xff]  ;;  %v347_v48 = vadd.f32 %v3023_v55, %v3109_v18  ;;  %v349_v55 = vadd.f32 %v3027_v58, %v3117_v61 }
 0x155   :  { %v3150_v37 = vadd.f32 %v765_v11, %v576_v63  ;;  %v579_v24 = vpop.f32.mrb[34].mxu1  ;;  %v2185_v11 = vpack.c.bf16 %v1188_v38, %v1186_v33  ;;  %v1185_v63 = vld [vmem:[#allocation4 + $0x1a0] sm:$0xff]  ;;  %v771_v54 = vmax.f32 %v337_v8, 0.0  ;;  %v1195_v8 = vld [vmem:[#allocation4 + $0x1f0] sm:$0xff] }
 0x156   :  { %v580_v29 = vadd.f32 %v579_v24, %v3132_v16  ;;  %v581_v52 = vpop.f32.mrb[35].mxu1  ;;  %2184 = vmatpush1.bf16.msra.mxu0 %v2183_v26  ;;  %v2187_v24 = vpack.c.bf16 %v1187_v31, %v1185_v63  ;;  %v892_v26 = vmax.f32 %v3146_v1, 0.0  ;;  %v1190_v1 = vld [vmem:[#allocation4 + $0x1c8] sm:$0xff]  ;;  %v1189_v31 = vld [vmem:[#allocation4 + $0x1c0] sm:$0xff] }
 0x157   :  { %v582_v7 = vadd.f32 %v581_v52, %v3138_v10  ;;  %2186 = vmatprep.subr.bf16.mxu0 %v2185_v11 }
 0x158   :  { %v3156_v50 = vadd.f32 %v766_v35, %v580_v29 }
 0x159   :  { %v3160_v40 = vadd.f32 %v767_v14, %v582_v7  ;;  %v585_v17 = vpop.f32.mrb[36].mxu1  ;;  %v893_v14 = vmax.f32 %v3150_v37, 0.0  ;;  %v1192_v7 = vld [vmem:[#allocation4 + $0x1d8] sm:$0xff] }
 0x15a   :  { %v894_v35 = vmax.f32 %v3156_v50, 0.0  ;;  %v586_v3 = vadd.f32 %v585_v17, %v3132_v16  ;;  %v587_v29 = vpop.f32.mrb[37].mxu1  ;;  %2188 = vmatpush1.bf16.msra.mxu0 %v2187_v24  ;;  %v770_v50 = vmax.f32 %v335_v4, 0.0  ;;  %v2189_v63 = vpack.c.bf16 %v1192_v7, %v1190_v1  ;;  %v1191_v17 = vld [vmem:[#allocation4 + $0x1d0] sm:$0xff]  ;;  %v1194_v24 = vld [vmem:[#allocation4 + $0x1e8] sm:$0xff]  ;;  %v1193_v4 = vld [vmem:[#allocation4 + $0x1e0] sm:$0xff] }
 0x15b   :  { %v895_v59 = vmax.f32 %v3160_v40, 0.0  ;;  %v588_v52 = vadd.f32 %v587_v29, %v3138_v10  ;;  %v2191_v47 = vpack.c.bf16 %v1191_v17, %v1189_v31  ;;  %v773_v7 = vmax.f32 %v343_v44, 0.0 }
 0x15c   :  { %v998_v33 = vadd.f32 %v894_v35, %v892_v26  ;;  %v832_v38 = vadd.f32 %v768_v23, %v586_v3  ;;  %2190 = vmatprep.subr.bf16.mxu0 %v2189_v63  ;;  %v1196_v23 = vld [vmem:[#allocation4 + $0x1f8] sm:$0xff]  ;;  %v2195_v17 = vpack.c.bf16 %v1195_v8, %v1193_v4  ;;  %v774_v44 = vmax.f32 %v347_v48, 0.0 }
 0x15d   :  { %v1019_v46 = vadd.f32 %v895_v59, %v893_v14  ;;  %v833_v11 = vadd.f32 %v769_v57, %v588_v52  ;;  %v591_v37 = vpop.f32.mrb[38].mxu1  ;;  %v2193_v57 = vpack.c.bf16 %v1196_v23, %v1194_v24  ;;  %v775_v48 = vmax.f32 %v349_v55, 0.0 }
 0x15e   :  { %v896_v40 = vmax.f32 %v832_v38, 0.0  ;;  %v592_v29 = vadd.f32 %v591_v37, %v3132_v16  ;;  %v593_v45 = vpop.f32.mrb[39].mxu1  ;;  %2192 = vmatpush1.bf16.msra.mxu0 %v2191_v47  ;;  %v361_v55 = vadd.f32 %v3043_v15, %v3117_v61 }
 0x15f   :  { %v897_v3 = vmax.f32 %v833_v11, 0.0  ;;  %v594_v1 = vadd.f32 %v593_v45, %v3138_v10  ;;  %2194 = vmatprep.subr.bf16.mxu0 %v2193_v57 }
 0x160   :  { %v956_v52 = vmax.f32 %v892_v26, %v896_v40  ;;  %v999_v38 = vadd.f32 %v998_v33, %v896_v40  ;;  %v834_v31 = vadd.f32 %v770_v50, %v592_v29  ;;  %v353_v26 = vadd.f32 %v3031_v2, %v3109_v18  ;;  %v1200_v33 = vld [vmem:[#allocation4 + $0x218] sm:$0xff] }
 0x161   :  { %v977_v37 = vmax.f32 %v893_v14, %v897_v3  ;;  %v1020_v42 = vadd.f32 %v1019_v46, %v897_v3  ;;  %v835_v41 = vadd.f32 %v771_v54, %v594_v1  ;;  %v597_v39 = vpop.f32.mrb[40].mxu1  ;;  %v355_v14 = vadd.f32 %v3035_v5, %v3117_v61  ;;  %v1198_v54 = vld [vmem:[#allocation4 + $0x208] sm:$0xff] }
 0x162   :  { %v898_v63 = vmax.f32 %v834_v31, 0.0  ;;  %v598_v11 = vadd.f32 %v597_v39, %v3132_v16  ;;  %v599_v45 = vpop.f32.mrb[41].mxu1  ;;  %2196 = vmatpush1.bf16.msra.mxu0 %v2195_v17  ;;  %v2197_v40 = vpack.c.bf16 %v1200_v33, %v1198_v54  ;;  %v776_v57 = vmax.f32 %v353_v26, 0.0 }
 0x163   :  { %v899_v47 = vmax.f32 %v835_v41, 0.0  ;;  %v600_v24 = vadd.f32 %v599_v45, %v3138_v10  ;;  %v777_v8 = vmax.f32 %v355_v14, 0.0 }
 0x164   :  { %v957_v50 = vmax.f32 %v894_v35, %v898_v63  ;;  %v1000_v58 = vadd.f32 %v999_v38, %v898_v63  ;;  %v836_v46 = vadd.f32 %v772_v43, %v598_v11  ;;  %2198 = vmatprep.subr.bf16.mxu0 %v2197_v40  ;;  %v359_v43 = vadd.f32 %v3039_v12, %v3109_v18 }
 0x165   :  { %v978_v29 = vmax.f32 %v895_v59, %v899_v47  ;;  %v1021_v39 = vadd.f32 %v1020_v42, %v899_v47  ;;  %v837_v23 = vadd.f32 %v773_v7, %v600_v24  ;;  %v603_v41 = vpop.f32.mrb[42].mxu1  ;;  %v367_v12 = vadd.f32 %v3051_v25, %v3117_v61 }
 0x166   :  { %v900_v4 = vmax.f32 %v836_v46, 0.0  ;;  %v604_v3 = vadd.f32 %v603_v41, %v3132_v16  ;;  %v605_v1 = vpop.f32.mrb[43].mxu1  ;;  %v778_v14 = vmax.f32 %v359_v43, 0.0 }
 0x167   :  { %v901_v2 = vmax.f32 %v837_v23, 0.0  ;;  %v606_v5 = vadd.f32 %v605_v1, %v3138_v10  ;;  %v371_v1 = vadd.f32 %v3055_v51, %v3109_v18  ;;  %v379_v51 = vadd.f32 %v3067_v9, %v3117_v61 }
 0x168   :  { %v958_v31 = vmax.f32 %v956_v52, %v900_v4  ;;  %v1001_v35 = vadd.f32 %v1000_v58, %v900_v4  ;;  %v838_v38 = vadd.f32 %v774_v44, %v604_v3  ;;  %v365_v52 = vadd.f32 %v3047_v22, %v3109_v18 }
 0x169   :  { %v979_v59 = vmax.f32 %v977_v37, %v901_v2  ;;  %v1022_v7 = vadd.f32 %v1021_v39, %v901_v2  ;;  %v839_v17 = vadd.f32 %v775_v48, %v606_v5  ;;  %v609_v42 = vpop.f32.mrb[44].mxu1  ;;  %v779_v58 = vmax.f32 %v361_v55, 0.0 }
 0x16a   :  { %v902_v63 = vmax.f32 %v838_v38, 0.0  ;;  %v610_v11 = vadd.f32 %v609_v42, %v3132_v16  ;;  %v611_v45 = vpop.f32.mrb[45].mxu1  ;;  %v780_v22 = vmax.f32 %v365_v52, 0.0  ;;  %v781_v4 = vmax.f32 %v367_v12, 0.0 }
 0x16b   :  { %v903_v47 = vmax.f32 %v839_v17, 0.0  ;;  %v612_v24 = vadd.f32 %v611_v45, %v3138_v10 }
 0x16c   :  { %v959_v37 = vmax.f32 %v957_v50, %v902_v63  ;;  %v1002_v44 = vadd.f32 %v1001_v35, %v902_v63  ;;  %v840_v26 = vadd.f32 %v776_v57, %v610_v11  ;;  %v782_v63 = vmax.f32 %v371_v1, 0.0 }
 0x16d   :  { %v980_v54 = vmax.f32 %v978_v29, %v903_v47  ;;  %v1023_v33 = vadd.f32 %v1022_v7, %v903_v47  ;;  %v841_v15 = vadd.f32 %v777_v8, %v612_v24  ;;  %v615_v46 = vpop.f32.mrb[46].mxu1  ;;  %v373_v8 = vadd.f32 %v3059_v56, %v3117_v61 }
 0x16e   :  { %v904_v40 = vmax.f32 %v840_v26, 0.0  ;;  %v616_v39 = vadd.f32 %v615_v46, %v3132_v16  ;;  %v617_v23 = vpop.f32.mrb[47].mxu1 }
 0x16f   :  { %v905_v48 = vmax.f32 %v841_v15, 0.0  ;;  %v618_v41 = vadd.f32 %v617_v23, %v3138_v10  ;;  %v783_v47 = vmax.f32 %v373_v8, 0.0  ;;  %v385_v23 = vadd.f32 %v3075_v28, %v3117_v61 }
 0x170   :  { %v960_v3 = vmax.f32 %v958_v31, %v904_v40  ;;  %v1003_v25 = vadd.f32 %v1002_v44, %v904_v40  ;;  %v842_v50 = vadd.f32 %v778_v14, %v616_v39  ;;  %v377_v31 = vadd.f32 %v3063_v6, %v3109_v18 }
 0x171   :  { %v981_v29 = vmax.f32 %v979_v59, %v905_v48  ;;  %v1024_v2 = vadd.f32 %v1023_v33, %v905_v48  ;;  %v843_v5 = vadd.f32 %v779_v58, %v618_v41  ;;  %v621_v57 = vpop.f32.mrb[48].mxu1  ;;  %v785_v33 = vmax.f32 %v379_v51, 0.0 }
 0x172   :  { %v906_v35 = vmax.f32 %v842_v50, 0.0  ;;  %v622_v38 = vadd.f32 %v621_v57, %v3132_v16  ;;  %v623_v43 = vpop.f32.mrb[49].mxu1  ;;  %v784_v6 = vmax.f32 %v377_v31, 0.0  ;;  %v383_v58 = vadd.f32 %v3071_v20, %v3109_v18 }
 0x173   :  { %v907_v7 = vmax.f32 %v843_v5, 0.0  ;;  %v624_v17 = vadd.f32 %v623_v43, %v3138_v10  ;;  %v391_v20 = vadd.f32 %v3085_v13, %v3117_v61  ;;  %v787_v8 = vmax.f32 %v385_v23, 0.0 }
 0x174   :  { %v961_v59 = vmax.f32 %v959_v37, %v906_v35  ;;  %v1004_v42 = vadd.f32 %v1003_v25, %v906_v35  ;;  %v844_v55 = vadd.f32 %v780_v22, %v622_v38 }
 0x175   :  { %v982_v11 = vmax.f32 %v980_v54, %v907_v7  ;;  %v1025_v45 = vadd.f32 %v1024_v2, %v907_v7  ;;  %v845_v56 = vadd.f32 %v781_v4, %v624_v17  ;;  %v627_v24 = vpop.f32.mrb[50].mxu1  ;;  %v786_v2 = vmax.f32 %v383_v58, 0.0 }
 0x176   :  { %v908_v52 = vmax.f32 %v844_v55, 0.0  ;;  %v628_v12 = vadd.f32 %v627_v24, %v3132_v16  ;;  %v629_v44 = vpop.f32.mrb[51].mxu1  ;;  %v789_v51 = vmax.f32 %v391_v20, 0.0  ;;  %v395_v55 = vadd.f32 %v3089_v27, %v3109_v18 }
 0x177   :  { %v909_v26 = vmax.f32 %v845_v56, 0.0  ;;  %v630_v14 = vadd.f32 %v629_v44, %v3138_v10  ;;  %v403_v27 = vadd.f32 %v3114_v53, %v3117_v61 }
 0x178   :  { %v962_v15 = vmax.f32 %v960_v3, %v908_v52  ;;  %v1005_v9 = vadd.f32 %v1004_v42, %v908_v52  ;;  %v846_v37 = vadd.f32 %v782_v63, %v628_v12  ;;  %v389_v3 = vadd.f32 %v3079_v62, %v3109_v18 }
 0x179   :  { %v983_v54 = vmax.f32 %v981_v29, %v909_v26  ;;  %v1026_v46 = vadd.f32 %v1025_v45, %v909_v26  ;;  %v847_v40 = vadd.f32 %v783_v47, %v630_v14  ;;  %v633_v39 = vpop.f32.mrb[52].mxu1  ;;  %v397_v47 = vadd.f32 %v3096_v60, %v3117_v61 }
 0x17a   :  { %v910_v48 = vmax.f32 %v846_v37, 0.0  ;;  %v634_v41 = vadd.f32 %v633_v39, %v3132_v16  ;;  %v635_v22 = vpop.f32.mrb[53].mxu1  ;;  %v788_v62 = vmax.f32 %v389_v3, 0.0  ;;  %v401_v14 = vadd.f32 %v3106_v19, %v3109_v18 }
 0x17b   :  { %v911_v4 = vmax.f32 %v847_v40, 0.0  ;;  %v636_v25 = vadd.f32 %v635_v22, %v3138_v10  ;;  %v793_v22 = vmax.f32 %v403_v27, 0.0  ;;  %v407_v3 = vadd.f32 %v3126_v49, %v3109_v18 }
 0x17c   :  { %v963_v50 = vmax.f32 %v961_v59, %v910_v48  ;;  %v1006_v1 = vadd.f32 %v1005_v9, %v910_v48  ;;  %v848_v29 = vadd.f32 %v784_v6, %v634_v41  ;;  %v790_v9 = vmax.f32 %v395_v55, 0.0 }
 0x17d   :  { %v984_v5 = vmax.f32 %v982_v11, %v911_v4  ;;  %v1027_v57 = vadd.f32 %v1026_v46, %v911_v4  ;;  %v849_v28 = vadd.f32 %v785_v33, %v636_v25  ;;  %v639_v35 = vpop.f32.mrb[54].mxu1  ;;  %v792_v19 = vmax.f32 %v401_v14, 0.0 }
 0x17e   :  { %v912_v38 = vmax.f32 %v848_v29, 0.0  ;;  %v640_v43 = vadd.f32 %v639_v35, %v3132_v16  ;;  %v641_v7 = vpop.f32.mrb[55].mxu1 }
 0x17f   :  { %v913_v17 = vmax.f32 %v849_v28, 0.0  ;;  %v642_v31 = vadd.f32 %v641_v7, %v3138_v10 }
 0x180   :  { %v964_v42 = vmax.f32 %v962_v15, %v912_v38  ;;  %v1007_v13 = vadd.f32 %v1006_v1, %v912_v38  ;;  %v850_v59 = vadd.f32 %v786_v2, %v640_v43  ;;  %v409_v2 = vadd.f32 %v3134_v21, %v3117_v61 }
 0x181   :  { %v985_v63 = vmax.f32 %v983_v54, %v913_v17  ;;  %v1028_v11 = vadd.f32 %v1027_v57, %v913_v17  ;;  %v851_v45 = vadd.f32 %v787_v8, %v642_v31  ;;  %v645_v56 = vpop.f32.mrb[56].mxu1  ;;  %v791_v54 = vmax.f32 %v397_v47, 0.0 }
 0x182   :  { %v914_v24 = vmax.f32 %v850_v59, 0.0  ;;  %v646_v52 = vadd.f32 %v645_v56, %v3132_v16  ;;  %v647_v12 = vpop.f32.mrb[57].mxu1  ;;  %v794_v17 = vmax.f32 %v407_v3, 0.0 }
 0x183   :  { %v915_v44 = vmax.f32 %v851_v45, 0.0  ;;  %v648_v26 = vadd.f32 %v647_v12, %v3138_v10 }
 0x184   :  { %v965_v6 = vmax.f32 %v963_v50, %v914_v24  ;;  %v1008_v33 = vadd.f32 %v1007_v13, %v914_v24  ;;  %v852_v15 = vadd.f32 %v788_v62, %v646_v52  ;;  %v413_v13 = vadd.f32 %v2981_v30, %v3109_v18 }
 0x185   :  { %v986_v37 = vmax.f32 %v984_v5, %v915_v44  ;;  %v1029_v58 = vadd.f32 %v1028_v11, %v915_v44  ;;  %v853_v60 = vadd.f32 %v789_v51, %v648_v26  ;;  %v651_v46 = vpop.f32.mrb[58].mxu1  ;;  %v795_v51 = vmax.f32 %v409_v2, 0.0 }
 0x186   :  { %v916_v40 = vmax.f32 %v852_v15, 0.0  ;;  %v652_v39 = vadd.f32 %v651_v46, %v3132_v16  ;;  %v653_v23 = vpop.f32.mrb[59].mxu1  ;;  %v796_v14 = vmax.f32 %v413_v13, 0.0  ;;  %v419_v30 = vadd.f32 %v2989_v34, %v3109_v18  ;;  %v4225_v34 = vld [vmem:[#allocation8_spill] sm:$0xff] }
 0x187   :  { %v917_v48 = vmax.f32 %v853_v60, 0.0  ;;  %v654_v41 = vadd.f32 %v653_v23, %v3138_v10 }
 0x188   :  { %v966_v4 = vmax.f32 %v964_v42, %v916_v40  ;;  %v1009_v53 = vadd.f32 %v1008_v33, %v916_v40  ;;  %v854_v25 = vadd.f32 %v790_v9, %v652_v39  ;;  %v427_v40 = vadd.f32 %v4225_v34, %v3117_v61  ;;  %v4233_v34 = vld [vmem:[#allocation16_spill] sm:$0xff] }
 0x189   :  { %v987_v20 = vmax.f32 %v985_v63, %v917_v48  ;;  %v1030_v50 = vadd.f32 %v1029_v58, %v917_v48  ;;  %v855_v1 = vadd.f32 %v791_v54, %v654_v41  ;;  %v657_v29 = vpop.f32.mrb[60].mxu1  ;;  %v415_v63 = vadd.f32 %v2985_v32, %v3117_v61 }
 0x18a   :  { %v918_v5 = vmax.f32 %v854_v25, 0.0  ;;  %v658_v57 = vadd.f32 %v657_v29, %v3132_v16  ;;  %v659_v28 = vpop.f32.mrb[61].mxu1  ;;  %v421_v32 = vadd.f32 %v2993_v36, %v3117_v61  ;;  %v425_v58 = vadd.f32 %v2997_v0, %v3109_v18 }
 0x18b   :  { %v919_v8 = vmax.f32 %v855_v1, 0.0  ;;  %v660_v35 = vadd.f32 %v659_v28, %v3138_v10  ;;  %v797_v15 = vmax.f32 %v415_v63, 0.0  ;;  %v4226_v1 = vld [vmem:[#allocation9_spill] sm:$0xff] }
 0x18c   :  { %v967_v38 = vmax.f32 %v965_v6, %v918_v5  ;;  %v1010_v43 = vadd.f32 %v1009_v53, %v918_v5  ;;  %v856_v7 = vadd.f32 %v792_v19, %v658_v57  ;;  %v798_v19 = vmax.f32 %v419_v30, 0.0  ;;  %v4227_v57 = vld [vmem:[#allocation10_spill] sm:$0xff] }
 0x18d   :  { %v988_v31 = vmax.f32 %v986_v37, %v919_v8  ;;  %v1031_v49 = vadd.f32 %v1030_v50, %v919_v8  ;;  %v857_v62 = vadd.f32 %v793_v22, %v660_v35  ;;  %v663_v42 = vpop.f32.mrb[62].mxu1  ;;  %v799_v53 = vmax.f32 %v421_v32, 0.0 }
 0x18e   :  { %v920_v21 = vmax.f32 %v856_v7, 0.0  ;;  %v664_v59 = vadd.f32 %v663_v42, %v3132_v16  ;;  %v665_v55 = vpop.f32.mrb[63].mxu1  ;;  %v801_v50 = vmax.f32 %v427_v40, 0.0  ;;  %v431_v29 = vadd.f32 %v4226_v1, %v3109_v18  ;;  %v4228_v7 = vld [vmem:[#allocation11_spill] sm:$0xff] }
 0x18f   :  { %v921_v11 = vmax.f32 %v857_v62, 0.0  ;;  %v666_v45 = vadd.f32 %v665_v55, %v3138_v10  ;;  %v433_v28 = vadd.f32 %v4227_v57, %v3117_v61  ;;  %v3288_v40 = vadd.f32 %v4233_v34, %v3117_v61 }
 0x190   :  { %v968_v56 = vmax.f32 %v966_v4, %v920_v21  ;;  %v1011_v47 = vadd.f32 %v1010_v43, %v920_v21  ;;  %v858_v24 = vadd.f32 %v794_v17, %v664_v59  ;;  %v437_v17 = vadd.f32 %v4228_v7, %v3109_v18 }
 0x191   :  { %v989_v52 = vmax.f32 %v987_v20, %v921_v11  ;;  %v1032_v12 = vadd.f32 %v1031_v49, %v921_v11  ;;  %v859_v44 = vadd.f32 %v795_v51, %v666_v45  ;;  %v669_v26 = vpop.f32.mrb[64].mxu1  ;;  %v800_v20 = vmax.f32 %v425_v58, 0.0 }
 0x192   :  { %v922_v27 = vmax.f32 %v858_v24, 0.0  ;;  %v670_v6 = vadd.f32 %v669_v26, %v3132_v16  ;;  %v671_v33 = vpop.f32.mrb[65].mxu1  ;;  %v802_v55 = vmax.f32 %v431_v29, 0.0  ;;  %v803_v63 = vmax.f32 %v433_v28, 0.0  ;;  %v4229_v24 = vld [vmem:[#allocation12_spill] sm:$0xff]  ;;  %v4230_v26 = vld [vmem:[#allocation13_spill] sm:$0xff] }
 0x193   :  { %v923_v9 = vmax.f32 %v859_v44, 0.0  ;;  %v672_v37 = vadd.f32 %v671_v33, %v3138_v10  ;;  %v4231_v33 = vld [vmem:[#allocation14_spill] sm:$0xff] }
 0x194   :  { %v969_v60 = vmax.f32 %v967_v38, %v922_v27  ;;  %v3256_v54 = vadd.f32 %v1011_v47, %v922_v27  ;;  %v860_v46 = vadd.f32 %v796_v14, %v670_v6  ;;  %v804_v47 = vmax.f32 %v437_v17, 0.0 }
 0x195   :  { %v990_v39 = vmax.f32 %v988_v31, %v923_v9  ;;  %v3260_v23 = vadd.f32 %v1032_v12, %v923_v9  ;;  %v861_v48 = vadd.f32 %v797_v15, %v672_v37  ;;  %v675_v41 = vpop.f32.mrb[66].mxu1  ;;  %v443_v14 = vadd.f32 %v4230_v26, %v3109_v18 }
 0x196   :  { %v3262_v36 = vmax.f32 %v968_v56, %v969_v60  ;;  %v676_v22 = vadd.f32 %v675_v41, %v3132_v16  ;;  %v677_v4 = vpop.f32.mrb[67].mxu1  ;;  %v924_v8 = vmax.f32 %v860_v46, 0.0  ;;  %v445_v15 = vadd.f32 %v4231_v33, %v3117_v61  ;;  %v4232_v60 = vld [vmem:[#allocation15_spill] sm:$0xff] }
 0x197   :  { %v3265_v0 = vmax.f32 %v989_v52, %v990_v39  ;;  %v678_v25 = vadd.f32 %v677_v4, %v3138_v10  ;;  %v925_v31 = vmax.f32 %v861_v48, 0.0  ;;  %v439_v52 = vadd.f32 %v4229_v24, %v3117_v61  ;;  %v4236_v24 = vld [vmem:[#allocation19_spill] sm:$0xff] }
 0x198   :  { %v862_v3 = vadd.f32 %v798_v19, %v676_v22  ;;  %v449_v46 = vadd.f32 %v4232_v60, %v3109_v18  ;;  %v4234_v22 = vld [vmem:[#allocation17_spill] sm:$0xff]  ;;  %v807_v29 = vmax.f32 %v445_v15, 0.0 }
 0x199   :  { %v863_v2 = vadd.f32 %v799_v53, %v678_v25  ;;  %v681_v5 = vpop.f32.mrb[68].mxu1  ;;  %v805_v19 = vmax.f32 %v439_v52, 0.0  ;;  %v3293_v4 = vadd.f32 %v4234_v22, %v3109_v18  ;;  %v3324_v52 = vadd.f32 %v4236_v24, %v3109_v18  ;;  %v1454_v24 = vld [vmem:[%s4183_s4 + $0xe0] sm:$0xff] }
 0x19a   :  { %v926_v35 = vmax.f32 %v862_v3, 0.0  ;;  %v682_v38 = vadd.f32 %v681_v5, %v3132_v16  ;;  %v683_v43 = vpop.f32.mrb[69].mxu1  ;;  %v806_v3 = vmax.f32 %v443_v14, 0.0 }
 0x19b   :  { %v927_v49 = vmax.f32 %v863_v2, 0.0  ;;  %v684_v62 = vadd.f32 %v683_v43, %v3138_v10 }
 0x19c   :  { %v1084_v51 = vadd.f32 %v926_v35, %v924_v8  ;;  %v864_v42 = vadd.f32 %v800_v20, %v682_v38  ;;  %v809_v38 = vmax.f32 %v3288_v40, 0.0 }
 0x19d   :  { %v1105_v13 = vadd.f32 %v927_v49, %v925_v31  ;;  %v865_v21 = vadd.f32 %v801_v50, %v684_v62  ;;  %v687_v59 = vpop.f32.mrb[70].mxu1  ;;  %v4235_v62 = vld [vmem:[#allocation18_spill] sm:$0xff] }
 0x19e   :  { %v928_v11 = vmax.f32 %v864_v42, 0.0  ;;  %v688_v45 = vadd.f32 %v687_v59, %v3132_v16  ;;  %v689_v56 = vpop.f32.mrb[71].mxu1 }
 0x19f   :  { %v929_v12 = vmax.f32 %v865_v21, 0.0  ;;  %v690_v44 = vadd.f32 %v689_v56, %v3138_v10  ;;  %v1426_v21 = vld [vmem:[%s4183_s4] sm:$0xff]  ;;  %v1435_v56 = vld [vmem:[%s4183_s4 + $0x48] sm:$0xff] }
 0x1a0   :  { %v1042_v30 = vmax.f32 %v924_v8, %v928_v11  ;;  %v1085_v27 = vadd.f32 %v1084_v51, %v928_v11  ;;  %v866_v6 = vadd.f32 %v802_v55, %v688_v45  ;;  %v808_v8 = vmax.f32 %v449_v46, 0.0  ;;  %v1430_v45 = vld [vmem:[%s4183_s4 + $0x20] sm:$0xff] }
 0x1a1   :  { %v1063_v32 = vmax.f32 %v925_v31, %v929_v12  ;;  %v1106_v9 = vadd.f32 %v1105_v13, %v929_v12  ;;  %v867_v37 = vadd.f32 %v803_v63, %v690_v44  ;;  %v693_v58 = vpop.f32.mrb[72].mxu1  ;;  %v810_v31 = vmax.f32 %v3293_v4, 0.0  ;;  %v1431_v13 = vld [vmem:[%s4183_s4 + $0x28] sm:$0xff]  ;;  %v4237_v46 = vld [vmem:[#allocation20_spill] sm:$0xff] }
 0x1a2   :  { %v930_v39 = vmax.f32 %v866_v6, 0.0  ;;  %v694_v48 = vadd.f32 %v693_v58, %v3132_v16  ;;  %v695_v41 = vpop.f32.mrb[73].mxu1  ;;  %v3301_v51 = vadd.f32 %v4235_v62, %v3117_v61  ;;  %v1447_v58 = vld [vmem:[%s4183_s4 + $0xa8] sm:$0xff]  ;;  %v463_v34 = vadd.f32 %v4237_v46, %v3117_v61 }
 0x1a3   :  { %v931_v53 = vmax.f32 %v867_v37, 0.0  ;;  %v696_v25 = vadd.f32 %v695_v41, %v3138_v10 }
 0x1a4   :  { %v1043_v20 = vmax.f32 %v926_v35, %v930_v39  ;;  %v1086_v50 = vadd.f32 %v1085_v27, %v930_v39  ;;  %v868_v1 = vadd.f32 %v804_v47, %v694_v48  ;;  %v1439_v47 = vld [vmem:[%s4183_s4 + $0x68] sm:$0xff]  ;;  %v1438_v27 = vld [vmem:[%s4183_s4 + $0x60] sm:$0xff]  ;;  %v811_v60 = vmax.f32 %v3301_v51, 0.0 }
 0x1a5   :  { %v1064_v2 = vmax.f32 %v927_v49, %v931_v53  ;;  %v1107_v5 = vadd.f32 %v1106_v9, %v931_v53  ;;  %v869_v57 = vadd.f32 %v805_v19, %v696_v25  ;;  %v699_v28 = vpop.f32.mrb[74].mxu1  ;;  %v1427_v49 = vld [vmem:[%s4183_s4 + $0x8] sm:$0xff]  ;;  %v2263_v9 = vpack.c.bf16 %v1430_v45, %v1426_v21 }
 0x1a6   :  { %v932_v43 = vmax.f32 %v868_v1, 0.0  ;;  %v700_v7 = vadd.f32 %v699_v28, %v3132_v16  ;;  %v701_v17 = vpop.f32.mrb[75].mxu1  ;;  %v2261_v11 = vpack.c.bf16 %v1431_v13, %v1427_v49  ;;  %v2265_v37 = vpack.c.bf16 %v1439_v47, %v1435_v56  ;;  %v1442_v1 = vld [vmem:[%s4183_s4 + $0x80] sm:$0xff] }
 0x1a7   :  { %v933_v35 = vmax.f32 %v869_v57, 0.0  ;;  %v702_v42 = vadd.f32 %v701_v17, %v3138_v10  ;;  %v4239_v17 = vld [vmem:[#allocation22_spill] sm:$0xff]  ;;  %v1450_v47 = vld [vmem:[%s4183_s4 + $0xc0] sm:$0xff] }
 0x1a8   :  { %v1044_v59 = vmax.f32 %v1042_v30, %v932_v43  ;;  %v1087_v55 = vadd.f32 %v1086_v50, %v932_v43  ;;  %v870_v63 = vadd.f32 %v806_v3, %v700_v7  ;;  %v1434_v30 = vld [vmem:[%s4183_s4 + $0x40] sm:$0xff]  ;;  %2262 = vmatprep.subr.bf16.mxu1 %v2261_v11  ;;  %v1455_v43 = vld [vmem:[%s4183_s4 + $0xe8] sm:$0xff]  ;;  %v813_v7 = vmax.f32 %v463_v34, 0.0 }
 0x1a9   :  { %v1065_v12 = vmax.f32 %v1063_v32, %v933_v35  ;;  %v1108_v44 = vadd.f32 %v1107_v5, %v933_v35  ;;  %v871_v26 = vadd.f32 %v807_v29, %v702_v42  ;;  %v705_v14 = vpop.f32.mrb[76].mxu1  ;;  %v1443_v32 = vld [vmem:[%s4183_s4 + $0x88] sm:$0xff]  ;;  %2264 = vmatpush1.bf16.msra.mxu1 %v2263_v9  ;;  %v2267_v22 = vpack.c.bf16 %v1438_v27, %v1434_v30  ;;  %v1446_v29 = vld [vmem:[%s4183_s4 + $0xa0] sm:$0xff] }
 0x1aa   :  { %v934_v6 = vmax.f32 %v870_v63, 0.0  ;;  %v706_v33 = vadd.f32 %v705_v14, %v3132_v16  ;;  %v707_v15 = vpop.f32.mrb[77].mxu1  ;;  %2266 = vmatprep.subr.bf16.mxu1 %v2265_v37  ;;  %v2269_v50 = vpack.c.bf16 %v1447_v58, %v1443_v32  ;;  %v4238_v5 = vld [vmem:[#allocation21_spill] sm:$0xff]  ;;  %v469_v62 = vadd.f32 %v4239_v17, %v3117_v61 }
 0x1ab   :  { %v935_v40 = vmax.f32 %v871_v26, 0.0  ;;  %v708_v39 = vadd.f32 %v707_v15, %v3138_v10  ;;  %v467_v57 = vadd.f32 %v4238_v5, %v3109_v18  ;;  %v2271_v21 = vpack.c.bf16 %v1446_v29, %v1442_v1  ;;  %v1459_v14 = vld [vmem:[%s4183_s4 + $0x108] sm:$0xff]  ;;  %v4243_v5 = vld [vmem:[#allocation26_spill] sm:$0xff] }
 0x1ac   :  { %v1045_v48 = vmax.f32 %v1043_v20, %v934_v6  ;;  %v1088_v41 = vadd.f32 %v1087_v55, %v934_v6  ;;  %v872_v19 = vadd.f32 %v808_v8, %v706_v33  ;;  %v812_v20 = vmax.f32 %v3324_v52, 0.0  ;;  %v1463_v30 = vld [vmem:[%s4183_s4 + $0x128] sm:$0xff]  ;;  %v4241_v6 = vld [vmem:[#allocation24_spill] sm:$0xff] }
 0x1ad   :  { %v1066_v4 = vmax.f32 %v1064_v2, %v935_v40  ;;  %v1109_v53 = vadd.f32 %v1108_v44, %v935_v40  ;;  %v873_v25 = vadd.f32 %v809_v38, %v708_v39  ;;  %v711_v3 = vpop.f32.mrb[78].mxu1  ;;  %v1451_v38 = vld [vmem:[%s4183_s4 + $0xc8] sm:$0xff]  ;;  %2268 = vmatpush1.bf16.msra.mxu1 %v2267_v22  ;;  %v814_v52 = vmax.f32 %v467_v57, 0.0  ;;  %v1462_v22 = vld [vmem:[%s4183_s4 + $0x120] sm:$0xff] }
 0x1ae   :  { %v936_v28 = vmax.f32 %v872_v19, 0.0  ;;  %v712_v2 = vadd.f32 %v711_v3, %v3132_v16  ;;  %v713_v8 = vpop.f32.mrb[79].mxu1  ;;  %2270 = vmatprep.subr.bf16.mxu1 %v2269_v50  ;;  %v2273_v56 = vpack.c.bf16 %v1455_v43, %v1451_v38  ;;  %v815_v27 = vmax.f32 %v469_v62, 0.0  ;;  %v1458_v19 = vld [vmem:[%s4183_s4 + $0x100] sm:$0xff]  ;;  %v1467_v1 = vld [vmem:[%s4183_s4 + $0x148] sm:$0xff] }
 0x1af   :  { %v937_v51 = vmax.f32 %v873_v25, 0.0  ;;  %v714_v35 = vadd.f32 %v713_v8, %v3138_v10  ;;  %v475_v33 = vadd.f32 %v4241_v6, %v3117_v61  ;;  %v1471_v29 = vld [vmem:[%s4183_s4 + $0x168] sm:$0xff]  ;;  %v481_v57 = vadd.f32 %v4243_v5, %v3117_v61 }
 0x1b0   :  { %v1046_v42 = vmax.f32 %v1044_v59, %v936_v28  ;;  %v1089_v49 = vadd.f32 %v1088_v41, %v936_v28  ;;  %v874_v13 = vadd.f32 %v810_v31, %v712_v2  ;;  %v4240_v59 = vld [vmem:[#allocation23_spill] sm:$0xff]  ;;  %v2277_v41 = vpack.c.bf16 %v1463_v30, %v1459_v14 }
 0x1b1   :  { %v1067_v55 = vmax.f32 %v1065_v12, %v937_v51  ;;  %v1110_v63 = vadd.f32 %v1109_v53, %v937_v51  ;;  %v875_v11 = vadd.f32 %v811_v60, %v714_v35  ;;  %v717_v45 = vpop.f32.mrb[80].mxu1  ;;  %v473_v31 = vadd.f32 %v4240_v59, %v3109_v18  ;;  %2272 = vmatpush1.bf16.msra.mxu1 %v2271_v21  ;;  %v1470_v21 = vld [vmem:[%s4183_s4 + $0x160] sm:$0xff]  ;;  %v4245_v59 = vld [vmem:[#allocation29_spill] sm:$0xff] }
 0x1b2   :  { %v938_v44 = vmax.f32 %v874_v13, 0.0  ;;  %v718_v12 = vadd.f32 %v717_v45, %v3132_v16  ;;  %v719_v26 = vpop.f32.mrb[81].mxu1  ;;  %v2275_v60 = vpack.c.bf16 %v1454_v24, %v1450_v47  ;;  %2274 = vmatprep.subr.bf16.mxu1 %v2273_v56  ;;  %v1466_v13 = vld [vmem:[%s4183_s4 + $0x140] sm:$0xff]  ;;  %v1475_v47 = vld [vmem:[%s4183_s4 + $0x188] sm:$0xff] }
 0x1b3   :  { %v939_v15 = vmax.f32 %v875_v11, 0.0  ;;  %v720_v9 = vadd.f32 %v719_v26, %v3138_v10  ;;  %v816_v53 = vmax.f32 %v473_v31, 0.0  ;;  %v1479_v24 = vld [vmem:[%s4183_s4 + $0x1a8] sm:$0xff]  ;;  %v487_v31 = vadd.f32 %v4245_v59, %v3117_v61 }
 0x1b4   :  { %v1047_v37 = vmax.f32 %v1045_v48, %v938_v44  ;;  %v1090_v32 = vadd.f32 %v1089_v49, %v938_v44  ;;  %v876_v58 = vadd.f32 %v812_v20, %v718_v12  ;;  %v4242_v48 = vld [vmem:[#allocation25_spill] sm:$0xff]  ;;  %v817_v20 = vmax.f32 %v475_v33, 0.0 }
 0x1b5   :  { %v1068_v46 = vmax.f32 %v1066_v4, %v939_v15  ;;  %v1111_v34 = vadd.f32 %v1110_v63, %v939_v15  ;;  %v877_v40 = vadd.f32 %v813_v7, %v720_v9  ;;  %v723_v39 = vpop.f32.mrb[82].mxu1  ;;  %v479_v25 = vadd.f32 %v4242_v48, %v3109_v18  ;;  %2276 = vmatpush1.bf16.msra.mxu1 %v2275_v60  ;;  %v1478_v60 = vld [vmem:[%s4183_s4 + $0x1a0] sm:$0xff] }
 0x1b6   :  { %v940_v3 = vmax.f32 %v876_v58, 0.0  ;;  %v724_v4 = vadd.f32 %v723_v39, %v3132_v16  ;;  %v725_v50 = vpop.f32.mrb[83].mxu1  ;;  %v2279_v7 = vpack.c.bf16 %v1462_v22, %v1458_v19  ;;  %2278 = vmatprep.subr.bf16.mxu1 %v2277_v41  ;;  %v2281_v49 = vpack.c.bf16 %v1471_v29, %v1467_v1  ;;  %v1474_v58 = vld [vmem:[%s4183_s4 + $0x180] sm:$0xff]  ;;  %v1483_v19 = vld [vmem:[%s4183_s4 + $0x1c8] sm:$0xff] }
 0x1b7   :  { %v941_v28 = vmax.f32 %v877_v40, 0.0  ;;  %v726_v2 = vadd.f32 %v725_v50, %v3138_v10  ;;  %v818_v63 = vmax.f32 %v479_v25, 0.0  ;;  %v1487_v22 = vld [vmem:[%s4183_s4 + $0x1e8] sm:$0xff]  ;;  %v4247_v48 = vld [vmem:[#allocation32_spill] sm:$0xff] }
 0x1b8   :  { %v1048_v8 = vmax.f32 %v1046_v42, %v940_v3  ;;  %v1091_v38 = vadd.f32 %v1090_v32, %v940_v3  ;;  %v878_v43 = vadd.f32 %v814_v52, %v724_v4  ;;  %v4244_v42 = vld [vmem:[#allocation27_spill] sm:$0xff]  ;;  %v819_v52 = vmax.f32 %v481_v57, 0.0 }
 0x1b9   :  { %v1069_v17 = vmax.f32 %v1067_v55, %v941_v28  ;;  %v1112_v62 = vadd.f32 %v1111_v34, %v941_v28  ;;  %v879_v51 = vadd.f32 %v815_v27, %v726_v2  ;;  %v729_v35 = vpop.f32.mrb[84].mxu1  ;;  %v485_v11 = vadd.f32 %v4244_v42, %v3109_v18  ;;  %2280 = vmatpush1.bf16.msra.mxu1 %v2279_v7  ;;  %v1486_v7 = vld [vmem:[%s4183_s4 + $0x1e0] sm:$0xff]  ;;  %v4249_v42 = vld [vmem:[#allocation35_spill] sm:$0xff] }
 0x1ba   :  { %v942_v45 = vmax.f32 %v878_v43, 0.0  ;;  %v730_v55 = vadd.f32 %v729_v35, %v3132_v16  ;;  %v731_v56 = vpop.f32.mrb[85].mxu1  ;;  %v2283_v27 = vpack.c.bf16 %v1470_v21, %v1466_v13  ;;  %2282 = vmatprep.subr.bf16.mxu1 %v2281_v49  ;;  %v2285_v32 = vpack.c.bf16 %v1479_v24, %v1475_v47  ;;  %v1482_v43 = vld [vmem:[%s4183_s4 + $0x1c0] sm:$0xff]  ;;  %v1491_v13 = vld [vmem:[%s4183_s4 + $0x208] sm:$0xff] }
 0x1bb   :  { %v943_v44 = vmax.f32 %v879_v51, 0.0  ;;  %v732_v12 = vadd.f32 %v731_v56, %v3138_v10  ;;  %v820_v34 = vmax.f32 %v485_v11, 0.0  ;;  %v493_v25 = vadd.f32 %v4247_v48, %v3117_v61  ;;  %v1495_v21 = vld [vmem:[%s4183_s4 + $0x228] sm:$0xff] }
 0x1bc   :  { %v1049_v26 = vmax.f32 %v1047_v37, %v942_v45  ;;  %v1092_v14 = vadd.f32 %v1091_v38, %v942_v45  ;;  %v880_v30 = vadd.f32 %v816_v53, %v730_v55  ;;  %v4246_v37 = vld [vmem:[#allocation30_spill] sm:$0xff]  ;;  %v821_v53 = vmax.f32 %v487_v31, 0.0 }
 0x1bd   :  { %v1070_v6 = vmax.f32 %v1068_v46, %v943_v44  ;;  %v1113_v33 = vadd.f32 %v1112_v62, %v943_v44  ;;  %v881_v15 = vadd.f32 %v817_v20, %v732_v12  ;;  %v735_v9 = vpop.f32.mrb[86].mxu1  ;;  %v491_v40 = vadd.f32 %v4246_v37, %v3109_v18  ;;  %2284 = vmatpush1.bf16.msra.mxu1 %v2283_v27  ;;  %v1494_v27 = vld [vmem:[%s4183_s4 + $0x220] sm:$0xff]  ;;  %v4251_v37 = vld [vmem:[#allocation37_spill] sm:$0xff] }
 0x1be   :  { %v944_v39 = vmax.f32 %v880_v30, 0.0  ;;  %v736_v46 = vadd.f32 %v735_v9, %v3132_v16  ;;  %v737_v41 = vpop.f32.mrb[87].mxu1  ;;  %v2287_v20 = vpack.c.bf16 %v1478_v60, %v1474_v58  ;;  %2286 = vmatprep.subr.bf16.mxu1 %v2285_v32  ;;  %v2289_v38 = vpack.c.bf16 %v1487_v22, %v1483_v19  ;;  %v1490_v30 = vld [vmem:[%s4183_s4 + $0x200] sm:$0xff]  ;;  %v1499_v58 = vld [vmem:[%s4183_s4 + $0x248] sm:$0xff] }
 0x1bf   :  { %v945_v3 = vmax.f32 %v881_v15, 0.0  ;;  %v738_v4 = vadd.f32 %v737_v41, %v3138_v10  ;;  %v822_v62 = vmax.f32 %v491_v40, 0.0  ;;  %v499_v11 = vadd.f32 %v4249_v42, %v3117_v61  ;;  %v1503_v60 = vld [vmem:[%s4183_s4 + $0x268] sm:$0xff] }
 0x1c0   :  { %v1050_v50 = vmax.f32 %v1048_v8, %v944_v39  ;;  %v1093_v1 = vadd.f32 %v1092_v14, %v944_v39  ;;  %v882_v29 = vadd.f32 %v818_v63, %v736_v46  ;;  %v4248_v8 = vld [vmem:[#allocation34_spill] sm:$0xff]  ;;  %v823_v63 = vmax.f32 %v493_v25, 0.0 }
 0x1c1   :  { %v1071_v5 = vmax.f32 %v1069_v17, %v945_v3  ;;  %v1114_v57 = vadd.f32 %v1113_v33, %v945_v3  ;;  %v883_v28 = vadd.f32 %v819_v52, %v738_v4  ;;  %v741_v2 = vpop.f32.mrb[88].mxu1  ;;  %v497_v51 = vadd.f32 %v4248_v8, %v3109_v18  ;;  %2288 = vmatpush1.bf16.msra.mxu1 %v2287_v20 }
 0x1c2   :  { %v946_v35 = vmax.f32 %v882_v29, 0.0  ;;  %v742_v17 = vadd.f32 %v741_v2, %v3132_v16  ;;  %v743_v49 = vpop.f32.mrb[89].mxu1  ;;  %v2291_v52 = vpack.c.bf16 %v1486_v7, %v1482_v43  ;;  %2290 = vmatprep.subr.bf16.mxu1 %v2289_v38  ;;  %v2293_v14 = vpack.c.bf16 %v1495_v21, %v1491_v13  ;;  %v1511_v2 = vld [vmem:[%s4183_s4 + $0x2a8] sm:$0xff] }
 0x1c3   :  { %v947_v45 = vmax.f32 %v883_v28, 0.0  ;;  %v744_v55 = vadd.f32 %v743_v49, %v3138_v10  ;;  %v824_v33 = vmax.f32 %v497_v51, 0.0  ;;  %v505_v40 = vadd.f32 %v4251_v37, %v3117_v61  ;;  %v1502_v61 = vld [vmem:[%s4183_s4 + $0x260] sm:$0xff]  ;;  %v1507_v28 = vld [vmem:[%s4183_s4 + $0x288] sm:$0xff] }
 0x1c4   :  { %v1051_v56 = vmax.f32 %v1049_v26, %v946_v35  ;;  %v1094_v47 = vadd.f32 %v1093_v1, %v946_v35  ;;  %v884_v24 = vadd.f32 %v820_v34, %v742_v17  ;;  %v4250_v26 = vld [vmem:[#allocation36_spill] sm:$0xff]  ;;  %v825_v34 = vmax.f32 %v499_v11, 0.0  ;;  %v1527_v37 = vld [vmem:[%s4183_s4 + $0x328] sm:$0xff] }
 0x1c5   :  { %v1072_v59 = vmax.f32 %v1070_v6, %v947_v45  ;;  %v1115_v31 = vadd.f32 %v1114_v57, %v947_v45  ;;  %v885_v44 = vadd.f32 %v821_v53, %v744_v55  ;;  %v747_v12 = vpop.f32.mrb[90].mxu1  ;;  %v503_v15 = vadd.f32 %v4250_v26, %v3109_v18  ;;  %2292 = vmatpush1.bf16.msra.mxu1 %v2291_v52  ;;  %v1498_v1 = vld [vmem:[%s4183_s4 + $0x240] sm:$0xff] }
 0x1c6   :  { %v948_v9 = vmax.f32 %v884_v24, 0.0  ;;  %v748_v6 = vadd.f32 %v747_v12, %v3132_v16  ;;  %v749_v32 = vpop.f32.mrb[91].mxu1  ;;  %v2295_v22 = vpack.c.bf16 %v1494_v27, %v1490_v30  ;;  %2294 = vmatprep.subr.bf16.mxu1 %v2293_v14  ;;  %v2297_v4 = vpack.c.bf16 %v1503_v60, %v1499_v58  ;;  %v1506_v11 = vld [vmem:[%s4183_s4 + $0x280] sm:$0xff] }
 0x1c7   :  { %v949_v39 = vmax.f32 %v885_v44, 0.0  ;;  %v750_v46 = vadd.f32 %v749_v32, %v3138_v10  ;;  %v826_v29 = vmax.f32 %v503_v15, 0.0  ;;  %v827_v38 = vmax.f32 %v505_v40, 0.0  ;;  %v1510_v45 = vld [vmem:[%s4183_s4 + $0x2a0] sm:$0xff] }
 0x1c8   :  { %v1052_v18 = vmax.f32 %v1050_v50, %v948_v9  ;;  %v1095_v41 = vadd.f32 %v1094_v47, %v948_v9  ;;  %v886_v19 = vadd.f32 %v822_v62, %v748_v6  ;;  %v1013_v50 = vrot.slane %v3256_v54, 4  ;;  %v1514_v32 = vld [vmem:[%s4183_s4 + $0x2c0] sm:$0xff] }
 0x1c9   :  { %v1073_v53 = vmax.f32 %v1071_v5, %v949_v39  ;;  %v1116_v48 = vadd.f32 %v1115_v31, %v949_v39  ;;  %v887_v25 = vadd.f32 %v823_v63, %v750_v46  ;;  %v753_v3 = vpop.f32.mrb[92].mxu1  ;;  %v1034_v43 = vrot.slane %v3260_v23, 4  ;;  %2296 = vmatpush1.bf16.msra.mxu1 %v2295_v22  ;;  %v1519_v31 = vld [vmem:[%s4183_s4 + $0x2e8] sm:$0xff] }
 0x1ca   :  { %v950_v20 = vmax.f32 %v886_v19, 0.0  ;;  %v754_v57 = vadd.f32 %v753_v3, %v3132_v16  ;;  %v755_v5 = vpop.f32.mrb[93].mxu1  ;;  %v2299_v17 = vpack.c.bf16 %v1502_v61, %v1498_v1  ;;  %2298 = vmatprep.subr.bf16.mxu1 %v2297_v4  ;;  %v2301_v42 = vpack.c.bf16 %v1511_v2, %v1507_v28  ;;  %v1531_v61 = vld [vmem:[%s4183_s4 + $0x348] sm:$0xff] }
 0x1cb   :  { %v951_v7 = vmax.f32 %v887_v25, 0.0  ;;  %v756_v62 = vadd.f32 %v755_v5, %v3138_v10  ;;  %v971_v55 = vrot.slane %v3262_v36, 4  ;;  %v992_v44 = vrot.slane %v3265_v0, 4  ;;  %v1526_v25 = vld [vmem:[%s4183_s4 + $0x320] sm:$0xff] }
 0x1cc   :  { %v1053_v8 = vmax.f32 %v1051_v56, %v950_v20  ;;  %v1096_v51 = vadd.f32 %v1095_v41, %v950_v20  ;;  %v888_v35 = vadd.f32 %v824_v33, %v754_v57  ;;  %v1014_v56 = vadd.f32 %v1013_v50, %v3256_v54 }
 0x1cd   :  { %v1074_v49 = vmax.f32 %v1072_v59, %v951_v7  ;;  %v1117_v13 = vadd.f32 %v1116_v48, %v951_v7  ;;  %v889_v21 = vadd.f32 %v825_v34, %v756_v62  ;;  %v759_v63 = vpop.f32.mrb[94].mxu1  ;;  %v1515_v59 = vld [vmem:[%s4183_s4 + $0x2c8] sm:$0xff]  ;;  %v1035_v12 = vadd.f32 %v1034_v43, %v3260_v23  ;;  %2300 = vmatpush1.bf16.msra.mxu1 %v2299_v17  ;;  %v1518_v23 = vld [vmem:[%s4183_s4 + $0x2e0] sm:$0xff] }
 0x1ce   :  { %v952_v47 = vmax.f32 %v888_v35, 0.0  ;;  %v760_v24 = vadd.f32 %v759_v63, %v3132_v16  ;;  %v761_v52 = vpop.f32.mrb[95].mxu1  ;;  %v2303_v16 = vpack.c.bf16 %v1510_v45, %v1506_v11  ;;  %2302 = vmatprep.subr.bf16.mxu1 %v2301_v42  ;;  %v2305_v6 = vpack.c.bf16 %v1519_v31, %v1515_v59  ;;  %v1523_v34 = vld [vmem:[%s4183_s4 + $0x308] sm:$0xff]  ;;  %v1522_v48 = vld [vmem:[%s4183_s4 + $0x300] sm:$0xff] }
 0x1cf   :  { %v953_v14 = vmax.f32 %v889_v21, 0.0  ;;  %v762_v30 = vadd.f32 %v761_v52, %v3138_v10  ;;  %v972_v10 = vmax.f32 %v3262_v36, %v971_v55  ;;  %v1015_v58 = vrot.slane %v1014_v56, 2  ;;  %v1539_v21 = vld [vmem:[%s4183_s4 + $0x388] sm:$0xff] }
 0x1d0   :  { %v1054_v54 = vmax.f32 %v1052_v18, %v952_v47  ;;  %v1097_v27 = vadd.f32 %v1096_v51, %v952_v47  ;;  %v890_v33 = vadd.f32 %v826_v29, %v760_v24  ;;  %v993_v40 = vmax.f32 %v3265_v0, %v992_v44  ;;  %v1535_v29 = vld [vmem:[%s4183_s4 + $0x368] sm:$0xff]  ;;  %v1534_v51 = vld [vmem:[%s4183_s4 + $0x360] sm:$0xff] }
 0x1d1   :  { %v1075_v26 = vmax.f32 %v1073_v53, %v953_v14  ;;  %v1118_v15 = vadd.f32 %v1117_v13, %v953_v14  ;;  %v891_v9 = vadd.f32 %v827_v38, %v762_v30  ;;  %v1036_v39 = vrot.slane %v1035_v12, 2  ;;  %2304 = vmatpush1.bf16.msra.mxu1 %v2303_v16  ;;  %v1543_v63 = vld [vmem:[%s4183_s4 + $0x3a8] sm:$0xff]  ;;  %v1538_v44 = vld [vmem:[%s4183_s4 + $0x380] sm:$0xff] }
 0x1d2   :  { %v954_v60 = vmax.f32 %v890_v33, 0.0  ;;  %v2307_v19 = vpack.c.bf16 %v1518_v23, %v1514_v32  ;;  %2306 = vmatprep.subr.bf16.mxu1 %v2305_v6  ;;  %v2309_v53 = vpack.c.bf16 %v1527_v37, %v1523_v34  ;;  %v973_v3 = vrot.slane %v972_v10, 2  ;;  %v1547_v33 = vld [vmem:[%s4183_s4 + $0x3c8] sm:$0xff]  ;;  %v1199_v34 = vld [vmem:[#allocation4 + $0x210] sm:$0xff] }
 0x1d3   :  { %v955_v46 = vmax.f32 %v891_v9, 0.0  ;;  %v1016_v0 = vadd.f32 %v1015_v58, %v1014_v56  ;;  %v994_v57 = vrot.slane %v993_v40, 2  ;;  %v1037_v5 = vadd.f32 %v1036_v39, %v1035_v12  ;;  %v1542_v12 = vld [vmem:[%s4183_s4 + $0x3a0] sm:$0xff]  ;;  %v1551_v16 = vld [vmem:[%s4183_s4 + $0x3e8] sm:$0xff] }
 0x1d4   :  { %v1055_v18 = vmax.f32 %v1053_v8, %v954_v60  ;;  %v1098_v41 = vadd.f32 %v1097_v27, %v954_v60  ;;  %v2311_v38 = vpack.c.bf16 %v1526_v25, %v1522_v48  ;;  %v2313_v62 = vpack.c.bf16 %v1535_v29, %v1531_v61  ;;  %v1530_v8 = vld [vmem:[%s4183_s4 + $0x340] sm:$0xff] }
 0x1d5   :  { %v1076_v22 = vmax.f32 %v1074_v49, %v955_v46  ;;  %v1119_v36 = vadd.f32 %v1118_v15, %v955_v46  ;;  %2308 = vmatpush1.bf16.msra.mxu1 %v2307_v19  ;;  %v974_v35 = vmax.f32 %v972_v10, %v973_v3  ;;  %v1017_v13 = vrot.slane %v1016_v0, 1  ;;  %v1197_v60 = vld [vmem:[#allocation4 + $0x200] sm:$0xff] }
 0x1d6   :  { %v1056_v4 = vmax.f32 %v1054_v54, %v1055_v18  ;;  %v1099_v1 = vrot.slane %v1098_v41, 4  ;;  %2310 = vmatprep.subr.bf16.mxu1 %v2309_v53  ;;  %v995_v45 = vmax.f32 %v993_v40, %v994_v57  ;;  %v1038_v55 = vrot.slane %v1037_v5, 1  ;;  %v1202_v40 = vld [vmem:[#allocation4 + $0x228] sm:$0xff]  ;;  %v1550_v53 = vld [vmem:[%s4183_s4 + $0x3e0] sm:$0xff] }
 0x1d7   :  { %v1077_v50 = vmax.f32 %v1075_v26, %v1076_v22  ;;  %v1120_v20 = vrot.slane %v1119_v36, 4  ;;  %v2315_v24 = vpack.c.bf16 %v1534_v51, %v1530_v8  ;;  %v2317_v31 = vpack.c.bf16 %v1543_v63, %v1539_v21  ;;  %v1201_v57 = vld [vmem:[#allocation4 + $0x220] sm:$0xff]  ;;  %v1207_v8 = vld [vmem:[#allocation4 + $0x250] sm:$0xff]  ;;  %v1210_v51 = vld [vmem:[#allocation4 + $0x268] sm:$0xff] }
 0x1d8   :  { %v1057_v28 = vrot.slane %v1056_v4, 4  ;;  %v1100_v2 = vadd.f32 %v1099_v1, %v1098_v41  ;;  %v975_v30 = vrot.slane %v974_v35, 1  ;;  %v1018_v54 = vadd.f32 %v1017_v13, %v1016_v0  ;;  %v1204_v41 = vld [vmem:[#allocation4 + $0x238] sm:$0xff]  ;;  %v1209_v13 = vld [vmem:[#allocation4 + $0x260] sm:$0xff]  ;;  %v1211_v21 = vld [vmem:[#allocation4 + $0x270] sm:$0xff] }
 0x1d9   :  { %v1078_v43 = vrot.slane %v1077_v50, 4  ;;  %v1121_v7 = vadd.f32 %v1120_v20, %v1119_v36  ;;  %2312 = vmatpush1.bf16.msra.mxu1 %v2311_v38  ;;  %v996_v26 = vrot.slane %v995_v45, 1  ;;  %v1039_v9 = vadd.f32 %v1038_v55, %v1037_v5  ;;  %v1546_v36 = vld [vmem:[%s4183_s4 + $0x3c0] sm:$0xff]  ;;  %v1203_v5 = vld [vmem:[#allocation4 + $0x230] sm:$0xff]  ;;  %v1208_v38 = vld [vmem:[#allocation4 + $0x258] sm:$0xff] }
 0x1da   :  { %v1058_v17 = vmax.f32 %v1056_v4, %v1057_v28  ;;  %v1101_v49 = vrot.slane %v1100_v2, 2  ;;  %2314 = vmatprep.subr.bf16.mxu1 %v2313_v62  ;;  %v2319_v10 = vpack.c.bf16 %v1542_v12, %v1538_v44  ;;  %v2321_v39 = vpack.c.bf16 %v1551_v16, %v1547_v33  ;;  %v1205_v62 = vld [vmem:[#allocation4 + $0x240] sm:$0xff]  ;;  %v1214_v63 = vld [vmem:[#allocation4 + $0x288] sm:$0xff]  ;;  %v1219_v44 = vld [vmem:[#allocation4 + $0x2b0] sm:$0xff] }
 0x1db   :  { %v1079_v42 = vmax.f32 %v1077_v50, %v1078_v43  ;;  %v1122_v11 = vrot.slane %v1121_v7, 2  ;;  %v976_v46 = vmax.f32 %v974_v35, %v975_v30  ;;  %v1040_v19 = vmul.f32 0.0078125, %v1018_v54  ;;  %v1212_v35 = vld [vmem:[#allocation4 + $0x278] sm:$0xff]  ;;  %v1213_v55 = vld [vmem:[#allocation4 + $0x280] sm:$0xff]  ;;  %v1222_v12 = vld [vmem:[#allocation4 + $0x2c8] sm:$0xff] }
 0x1dc   :  { %v1059_v56 = vrot.slane %v1058_v17, 2  ;;  %v1102_v47 = vadd.f32 %v1101_v49, %v1100_v2  ;;  %v997_v48 = vmax.f32 %v995_v45, %v996_v26  ;;  %v1041_v3 = vmul.f32 0.0078125, %v1039_v9  ;;  %v1206_v2 = vld [vmem:[#allocation4 + $0x248] sm:$0xff]  ;;  %v1223_v33 = vld [vmem:[#allocation4 + $0x2d0] sm:$0xff]  ;;  %v1228_v26 = vld [vmem:[#allocation4 + $0x2f8] sm:$0xff] }
 0x1dd   :  { %v1080_v52 = vrot.slane %v1079_v42, 2  ;;  %v1123_v59 = vadd.f32 %v1122_v11, %v1121_v7  ;;  %2316 = vmatpush1.bf16.msra.mxu1 %v2315_v24  ;;  %v2199_v1 = vpack.c.bf16 %v1199_v34, %v1197_v60  ;;  %v2201_v20 = vpack.c.bf16 %v1204_v41, %v1202_v40  ;;  %v1220_v24 = vld [vmem:[#allocation4 + $0x2b8] sm:$0xff]  ;;  %v1226_v16 = vld [vmem:[#allocation4 + $0x2e8] sm:$0xff]  ;;  %v1229_v34 = vld [vmem:[#allocation4 + $0x300] sm:$0xff] }
 0x1de   :  { %v1060_v14 = vmax.f32 %v1058_v17, %v1059_v56  ;;  %v1103_v27 = vrot.slane %v1102_v47, 1  ;;  %2318 = vmatprep.subr.bf16.mxu1 %v2317_v31  ;;  %v2323_v28 = vpack.c.bf16 %v1550_v53, %v1546_v36  ;;  %v2203_v43 = vpack.c.bf16 %v1203_v5, %v1201_v57  ;;  %v1215_v56 = vld [vmem:[#allocation4 + $0x290] sm:$0xff]  ;;  %v1217_v31 = vld [vmem:[#allocation4 + $0x2a0] sm:$0xff]  ;;  %v1234_v40 = vld [vmem:[#allocation4 + $0x328] sm:$0xff] }
 0x1df   :  { %v1081_v15 = vmax.f32 %v1079_v42, %v1080_v52  ;;  %v1124_v6 = vrot.slane %v1123_v59, 1  ;;  %v2205_v7 = vpack.c.bf16 %v1208_v38, %v1206_v2  ;;  %v2207_v17 = vpack.c.bf16 %v1207_v8, %v1205_v62  ;;  %v1216_v42 = vld [vmem:[#allocation4 + $0x298] sm:$0xff]  ;;  %v1233_v41 = vld [vmem:[#allocation4 + $0x320] sm:$0xff]  ;;  %v1246_v57 = vld [vmem:[#allocation4 + $0x388] sm:$0xff] }
 0x1e0   :  { %v1061_v32 = vrot.slane %v1060_v14, 1  ;;  %v1104_v23 = vadd.f32 %v1103_v27, %v1102_v47  ;;  %v2209_v49 = vpack.c.bf16 %v1212_v35, %v1210_v51  ;;  %v2211_v11 = vpack.c.bf16 %v1211_v21, %v1209_v13  ;;  %v1218_v47 = vld [vmem:[#allocation4 + $0x2a8] sm:$0xff]  ;;  %v1221_v27 = vld [vmem:[#allocation4 + $0x2c0] sm:$0xff]  ;;  %v1240_v36 = vld [vmem:[#allocation4 + $0x358] sm:$0xff] }
 0x1e1   :  { %v1082_v58 = vrot.slane %v1081_v15, 1  ;;  %v1125_v37 = vadd.f32 %v1124_v6, %v1123_v59  ;;  %2320 = vmatpush1.bf16.msra.mxu1 %v2319_v10  ;;  %v2213_v45 = vpack.c.bf16 %v1216_v42, %v1214_v63  ;;  %v2215_v52 = vpack.c.bf16 %v1215_v56, %v1213_v55  ;;  %v1225_v6 = vld [vmem:[#allocation4 + $0x2e0] sm:$0xff]  ;;  %v1232_v10 = vld [vmem:[#allocation4 + $0x318] sm:$0xff] }
 0x1e2   :  { %v1062_v18 = vmax.f32 %v1060_v14, %v1061_v32  ;;  %v1126_v22 = vmul.f32 0.0078125, %v1104_v23  ;;  %2322 = vmatprep.subr.bf16.mxu1 %v2321_v39  ;;  %v2217_v59 = vpack.c.bf16 %v1220_v24, %v1218_v47  ;;  %v1224_v14 = vld [vmem:[#allocation4 + $0x2d8] sm:$0xff]  ;;  %v2219_v30 = vpack.c.bf16 %v1219_v44, %v1217_v31  ;;  %v1227_v32 = vld [vmem:[#allocation4 + $0x2f0] sm:$0xff]  ;;  %v1230_v23 = vld [vmem:[#allocation4 + $0x308] sm:$0xff] }
 0x1e3   :  { %v1083_v25 = vmax.f32 %v1081_v15, %v1082_v58  ;;  %v1127_v0 = vmul.f32 0.0078125, %v1125_v37  ;;  %v2221_v54 = vpack.c.bf16 %v1224_v14, %v1222_v12  ;;  %v2223_v15 = vpack.c.bf16 %v1223_v33, %v1221_v27  ;;  %v1231_v37 = vld [vmem:[#allocation4 + $0x310] sm:$0xff]  ;;  %v1236_v39 = vld [vmem:[#allocation4 + $0x338] sm:$0xff]  ;;  %v1245_v38 = vld [vmem:[#allocation4 + $0x380] sm:$0xff] }
 0x1e4   :  { %v1129_v4 = vsel %vm1128_vm1, %v976_v46, %v1062_v18  ;;  %v3562_v61 = vsel %vm1128_vm1, %v1040_v19, %v1126_v22  ;;  %v2225_v9 = vpack.c.bf16 %v1228_v26, %v1226_v16  ;;  %v2227_v58 = vpack.c.bf16 %v1227_v32, %v1225_v6  ;;  %v1235_v19 = vld [vmem:[#allocation4 + $0x330] sm:$0xff]  ;;  %v1238_v22 = vld [vmem:[#allocation4 + $0x348] sm:$0xff]  ;;  %v1248_v5 = vld [vmem:[#allocation4 + $0x398] sm:$0xff] }
 0x1e5   :  { %v1130_v29 = vsel %vm1128_vm1, %v997_v48, %v1083_v25  ;;  %v1132_v50 = vsel %vm1128_vm1, %v1041_v3, %v1127_v0  ;;  %2324 = vmatpush1.bf16.msra.mxu1 %v2323_v28  ;;  %v2229_v60 = vpack.c.bf16 %v1232_v10, %v1230_v23  ;;  %v2231_v46 = vpack.c.bf16 %v1231_v37, %v1229_v34  ;;  %v1237_v25 = vld [vmem:[#allocation4 + $0x340] sm:$0xff]  ;;  %v1239_v3 = vld [vmem:[#allocation4 + $0x350] sm:$0xff]  ;;  %v1242_v0 = vld [vmem:[#allocation4 + $0x368] sm:$0xff] }
 0x1e6   :  { %1336 = vmatprep.mubr.f32.mxu0 %v1130_v29  ;;  %v2233_v18 = vpack.c.bf16 %v1236_v39, %v1234_v40  ;;  %v2235_v53 = vpack.c.bf16 %v1235_v19, %v1233_v41  ;;  %v2237_v48 = vpack.c.bf16 %v1240_v36, %v1238_v22  ;;  %v2245_v2 = vpack.c.bf16 %v1248_v5, %v1246_v57  ;;  %v1252_v62 = vld [vmem:[#allocation4 + $0x3b8] sm:$0xff]  ;;  %v1249_v35 = vld [vmem:[#allocation4 + $0x3a0] sm:$0xff]  ;;  %v1722_v14 = vld [vmem:[%s4184_s5 + $0x8] sm:$0xff] }
 0x1e7   :  { %1337 = vmatmul.mubr.f32.vlgmr.msra.gmra.mrb[32].mxu0 %v1129_v4  ;;  %v1244_v4 = vld [vmem:[#allocation4 + $0x378] sm:$0xff]  ;;  %v1253_v42 = vld [vmem:[#allocation4 + $0x3c0] sm:$0xff]  ;;  %v1723_v27 = vld [vmem:[%s4184_s5 + $0x10] sm:$0xff] }
 0x1e8   :  { %2200 = vmatpush1.bf16.msra.mxu0 %v2199_v1  ;;  %1407 = vmatprep.mubr.f32.mxu0 %v1132_v50  ;;  %v2239_v1 = vpack.c.bf16 %v1239_v3, %v1237_v25  ;;  %v2241_v29 = vpack.c.bf16 %v1244_v4, %v1242_v0  ;;  %v1241_v50 = vld [vmem:[#allocation4 + $0x360] sm:$0xff]  ;;  %v1256_v13 = vld [vmem:[#allocation4 + $0x3d8] sm:$0xff]  ;;  %v1726_v33 = vld [vmem:[%s4184_s5 + $0x28] sm:$0xff] }
 0x1e9   :  { %2202 = vmatprep.subr.bf16.mxu0 %v2201_v20  ;;  %v1243_v20 = vld [vmem:[#allocation4 + $0x370] sm:$0xff]  ;;  %v1260_v55 = vld [vmem:[#allocation4 + $0x3f8] sm:$0xff]  ;;  %v1257_v24 = vld [vmem:[#allocation4 + $0x3e0] sm:$0xff] }
 0x1ea   :  { %v2243_v28 = vpack.c.bf16 %v1243_v20, %v1241_v50  ;;  %v1429_v31 = vld [vmem:[%s4183_s4 + $0x18] sm:$0xff]  ;;  %v1727_v6 = vld [vmem:[%s4184_s5 + $0x30] sm:$0xff]  ;;  %v1730_v32 = vld [vmem:[%s4184_s5 + $0x48] sm:$0xff] }
 0x1eb   :  { %v1433_v44 = vld [vmem:[%s4183_s4 + $0x38] sm:$0xff]  ;;  %v1731_v34 = vld [vmem:[%s4184_s5 + $0x50] sm:$0xff]  ;;  %v1734_v37 = vld [vmem:[%s4184_s5 + $0x68] sm:$0xff] }
 0x1ec   :  { %2204 = vmatpush1.bf16.msra.mxu0 %v2203_v43  ;;  %v1247_v43 = vld [vmem:[#allocation4 + $0x390] sm:$0xff]  ;;  %v2325_v12 = vpack.c.bf16 %v1433_v44, %v1429_v31  ;;  %v1728_v16 = vld [vmem:[%s4184_s5 + $0x38] sm:$0xff]  ;;  %v1738_v19 = vld [vmem:[%s4184_s5 + $0x88] sm:$0xff] }
 0x1ed   :  { %2206 = vmatprep.subr.bf16.mxu0 %v2205_v7  ;;  %v1250_v7 = vld [vmem:[#allocation4 + $0x3a8] sm:$0xff]  ;;  %v2247_v8 = vpack.c.bf16 %v1247_v43, %v1245_v38  ;;  %v1732_v23 = vld [vmem:[%s4184_s5 + $0x58] sm:$0xff]  ;;  %v1735_v41 = vld [vmem:[%s4184_s5 + $0x70] sm:$0xff] }
 0x1ee   :  { %v2249_v51 = vpack.c.bf16 %v1252_v62, %v1250_v7  ;;  %2326 = vmatprep.subr.bf16.mxu1 %v2325_v12  ;;  %v1736_v40 = vld [vmem:[%s4184_s5 + $0x78] sm:$0xff]  ;;  %v1739_v25 = vld [vmem:[%s4184_s5 + $0x90] sm:$0xff]  ;;  %v1742_v3 = vld [vmem:[%s4184_s5 + $0xa8] sm:$0xff] }
 0x1ef   :  { %v1740_v22 = vld [vmem:[%s4184_s5 + $0x98] sm:$0xff]  ;;  %v1743_v50 = vld [vmem:[%s4184_s5 + $0xb0] sm:$0xff]  ;;  %v1746_v20 = vld [vmem:[%s4184_s5 + $0xc8] sm:$0xff] }
 0x1f0   :  { %2208 = vmatpush1.bf16.msra.mxu0 %v2207_v17  ;;  %v1251_v17 = vld [vmem:[#allocation4 + $0x3b0] sm:$0xff]  ;;  %v1744_v0 = vld [vmem:[%s4184_s5 + $0xb8] sm:$0xff]  ;;  %v1750_v43 = vld [vmem:[%s4184_s5 + $0xe8] sm:$0xff] }
 0x1f1   :  { %2210 = vmatprep.subr.bf16.mxu0 %v2209_v49  ;;  %v1254_v49 = vld [vmem:[#allocation4 + $0x3c8] sm:$0xff]  ;;  %v2251_v21 = vpack.c.bf16 %v1251_v17, %v1249_v35  ;;  %v1748_v57 = vld [vmem:[%s4184_s5 + $0xd8] sm:$0xff]  ;;  %v1747_v38 = vld [vmem:[%s4184_s5 + $0xd0] sm:$0xff] }
 0x1f2   :  { %v2253_v63 = vpack.c.bf16 %v1256_v13, %v1254_v49  ;;  %v1752_v7 = vld [vmem:[%s4184_s5 + $0xf8] sm:$0xff]  ;;  %v1751_v35 = vld [vmem:[%s4184_s5 + $0xf0] sm:$0xff]  ;;  %v1754_v17 = vld [vmem:[%s4184_s5 + $0x108] sm:$0xff] }
 0x1f3   :  { %v1756_v49 = vld [vmem:[%s4184_s5 + $0x118] sm:$0xff]  ;;  %v1761_v12 = vld [vmem:[%s4184_s5 + $0x140] sm:$0xff] }
 0x1f4   :  { %2212 = vmatpush1.bf16.msra.mxu0 %v2211_v11  ;;  %v1255_v11 = vld [vmem:[#allocation4 + $0x3d0] sm:$0xff] }
 0x1f5   :  { %2214 = vmatprep.subr.bf16.mxu0 %v2213_v45  ;;  %v1258_v45 = vld [vmem:[#allocation4 + $0x3e8] sm:$0xff]  ;;  %v2255_v56 = vpack.c.bf16 %v1255_v11, %v1253_v42  ;;  %v1755_v42 = vld [vmem:[%s4184_s5 + $0x110] sm:$0xff] }
 0x1f6   :  { %v2257_v47 = vpack.c.bf16 %v1260_v55, %v1258_v45  ;;  %v1758_v11 = vld [vmem:[%s4184_s5 + $0x128] sm:$0xff]  ;;  %v1760_v45 = vld [vmem:[%s4184_s5 + $0x138] sm:$0xff] }
 0x1f8   :  { %2216 = vmatpush1.bf16.msra.mxu0 %v2215_v52  ;;  %v1259_v52 = vld [vmem:[#allocation4 + $0x3f0] sm:$0xff] }
 0x1f9   :  { %2218 = vmatprep.subr.bf16.mxu0 %v2217_v59  ;;  %v2259_v59 = vpack.c.bf16 %v1259_v52, %v1257_v24  ;;  %v1759_v24 = vld [vmem:[%s4184_s5 + $0x130] sm:$0xff]  ;;  %v1762_v52 = vld [vmem:[%s4184_s5 + $0x148] sm:$0xff] }
 0x1fc   :  { %2220 = vmatpush1.bf16.msra.mxu0 %v2219_v30  ;;  %v1724_v30 = vld [vmem:[%s4184_s5 + $0x18] sm:$0xff] }
 0x1fd   :  { %2222 = vmatprep.subr.bf16.mxu0 %v2221_v54  ;;  %v2389_v54 = vpack.c.bf16 %v1724_v30, %v1722_v14  ;;  %v1763_v14 = vld [vmem:[%s4184_s5 + $0x150] sm:$0xff]  ;;  %v1766_v30 = vld [vmem:[%s4184_s5 + $0x168] sm:$0xff] }
 0x200   :  { %2224 = vmatpush1.bf16.msra.mxu0 %v2223_v15  ;;  %v2393_v15 = vpack.c.bf16 %v1728_v16, %v1726_v33  ;;  %v1765_v33 = vld [vmem:[%s4184_s5 + $0x160] sm:$0xff]  ;;  %v1767_v16 = vld [vmem:[%s4184_s5 + $0x170] sm:$0xff] }
 0x201   :  { %2226 = vmatprep.subr.bf16.mxu0 %v2225_v9  ;;  %v1725_v9 = vld [vmem:[%s4184_s5 + $0x20] sm:$0xff] }
 0x202   :  { %v2395_v10 = vpack.c.bf16 %v1727_v6, %v1725_v9  ;;  %v2435_v9 = vpack.c.bf16 %v1767_v16, %v1765_v33  ;;  %v1481_v33 = vld [vmem:[%s4183_s4 + $0x1b8] sm:$0xff] }
 0x204   :  { %2228 = vmatpush1.bf16.msra.mxu0 %v2227_v58  ;;  %v2397_v58 = vpack.c.bf16 %v1732_v23, %v1730_v32  ;;  %v1769_v32 = vld [vmem:[%s4184_s5 + $0x180] sm:$0xff]  ;;  %v1771_v23 = vld [vmem:[%s4184_s5 + $0x190] sm:$0xff] }
 0x205   :  { %2230 = vmatprep.subr.bf16.mxu0 %v2229_v60  ;;  %v1729_v60 = vld [vmem:[%s4184_s5 + $0x40] sm:$0xff] }
 0x206   :  { %v2399_v39 = vpack.c.bf16 %v1731_v34, %v1729_v60  ;;  %v2439_v60 = vpack.c.bf16 %v1771_v23, %v1769_v32  ;;  %v1489_v32 = vld [vmem:[%s4183_s4 + $0x1f8] sm:$0xff] }
 0x208   :  { %2232 = vmatpush1.bf16.msra.mxu0 %v2231_v46  ;;  %v2401_v46 = vpack.c.bf16 %v1736_v40, %v1734_v37  ;;  %v1773_v37 = vld [vmem:[%s4184_s5 + $0x1a0] sm:$0xff]  ;;  %v1775_v40 = vld [vmem:[%s4184_s5 + $0x1b0] sm:$0xff] }
 0x209   :  { %2234 = vmatprep.subr.bf16.mxu0 %v2233_v18  ;;  %v1733_v18 = vld [vmem:[%s4184_s5 + $0x60] sm:$0xff] }
 0x20a   :  { %v2403_v36 = vpack.c.bf16 %v1735_v41, %v1733_v18  ;;  %v2443_v18 = vpack.c.bf16 %v1775_v40, %v1773_v37  ;;  %v2024_v41 = vld [vmem:[%s4181_s2 + $0x1] ss:$4 sm:$0x3]  ;;  %v1497_v37 = vld [vmem:[%s4183_s4 + $0x238] sm:$0xff] }
 0x20c   :  { %2236 = vmatpush1.bf16.msra.mxu0 %v2235_v53  ;;  %v2405_v53 = vpack.c.bf16 %v1740_v22, %v1738_v19  ;;  %v1777_v22 = vld [vmem:[%s4184_s5 + $0x1c0] sm:$0xff] }
 0x20d   :  { %2238 = vmatprep.subr.bf16.mxu0 %v2237_v48  ;;  %v1737_v48 = vld [vmem:[%s4184_s5 + $0x80] sm:$0xff] }
 0x20e   :  { %v2407_v4 = vpack.c.bf16 %v1739_v25, %v1737_v48 }
 0x210   :  { %2240 = vmatpush1.bf16.msra.mxu0 %v2239_v1  ;;  %v2409_v1 = vpack.c.bf16 %v1744_v0, %v1742_v3  ;;  %v4253_v3 = vld [vmem:[#allocation33_spill] sm:$0xff] }
 0x211   :  { %2242 = vmatprep.subr.bf16.mxu0 %v2241_v29  ;;  %v1741_v29 = vld [vmem:[%s4184_s5 + $0xa0] sm:$0xff]  ;;  %v1269_v0 = vrot.slane %v2024_v41, %v4253_v3 }
 0x212   :  { %v2411_v5 = vpack.c.bf16 %v1743_v50, %v1741_v29  ;;  %v1437_v50 = vld [vmem:[%s4183_s4 + $0x58] sm:$0xff] }
 0x214   :  { %2244 = vmatpush1.bf16.msra.mxu0 %v2243_v28  ;;  %v2413_v28 = vpack.c.bf16 %v1748_v57, %v1746_v20  ;;  %v1441_v20 = vld [vmem:[%s4183_s4 + $0x78] sm:$0xff] }
 0x215   :  { %2246 = vmatprep.subr.bf16.mxu0 %v2245_v2  ;;  %v1745_v2 = vld [vmem:[%s4184_s5 + $0xc0] sm:$0xff] }
 0x216   :  { %v2415_v62 = vpack.c.bf16 %v1747_v38, %v1745_v2  ;;  %v2329_v38 = vpack.c.bf16 %v1441_v20, %v1437_v50  ;;  %v1508_v50 = vld [vmem:[%s4183_s4 + $0x290] sm:$0xff] }
 0x217   :  { %v1512_v20 = vld [vmem:[%s4183_s4 + $0x2b0] sm:$0xff] }
 0x218   :  { %2248 = vmatpush1.bf16.msra.mxu0 %v2247_v8  ;;  %v2417_v8 = vpack.c.bf16 %v1752_v7, %v1750_v43  ;;  %v1436_v43 = vld [vmem:[%s4183_s4 + $0x50] sm:$0xff] }
 0x219   :  { %2250 = vmatprep.subr.bf16.mxu0 %v2249_v51  ;;  %v1749_v51 = vld [vmem:[%s4184_s5 + $0xe0] sm:$0xff]  ;;  %v1440_v7 = vld [vmem:[%s4183_s4 + $0x70] sm:$0xff] }
 0x21a   :  { %v2419_v13 = vpack.c.bf16 %v1751_v35, %v1749_v51  ;;  %v1449_v51 = vld [vmem:[%s4183_s4 + $0xb8] sm:$0xff]  ;;  %v2331_v35 = vpack.c.bf16 %v1440_v7, %v1436_v43  ;;  %v1516_v43 = vld [vmem:[%s4183_s4 + $0x2d0] sm:$0xff] }
 0x21b   :  { %v1520_v7 = vld [vmem:[%s4183_s4 + $0x2f0] sm:$0xff] }
 0x21c   :  { %2252 = vmatpush1.bf16.msra.mxu0 %v2251_v21  ;;  %v2421_v21 = vpack.c.bf16 %v1756_v49, %v1754_v17  ;;  %v1444_v49 = vld [vmem:[%s4183_s4 + $0x90] sm:$0xff] }
 0x21d   :  { %2254 = vmatprep.subr.bf16.mxu0 %v2253_v63  ;;  %v1753_v63 = vld [vmem:[%s4184_s5 + $0x100] sm:$0xff] }
 0x21e   :  { %v2423_v55 = vpack.c.bf16 %v1755_v42, %v1753_v63  ;;  %v1457_v63 = vld [vmem:[%s4183_s4 + $0xf8] sm:$0xff] }
 0x220   :  { %2256 = vmatpush1.bf16.msra.mxu0 %v2255_v56  ;;  %v2425_v56 = vpack.c.bf16 %v1760_v45, %v1758_v11  ;;  %v1452_v45 = vld [vmem:[%s4183_s4 + $0xd0] sm:$0xff] }
 0x221   :  { %2258 = vmatprep.subr.bf16.mxu0 %v2257_v47  ;;  %v1757_v47 = vld [vmem:[%s4184_s5 + $0x120] sm:$0xff] }
 0x222   :  { %v2427_v31 = vpack.c.bf16 %v1759_v24, %v1757_v47  ;;  %v1465_v47 = vld [vmem:[%s4183_s4 + $0x138] sm:$0xff] }
 0x224   :  { %2260 = vmatpush1.bf16.msra.mxu0 %v2259_v59  ;;  %v1764_v59 = vld [vmem:[%s4184_s5 + $0x158] sm:$0xff] }
 0x225   :  { %2390 = vmatprep.subr.bf16.mxu0 %v2389_v54  ;;  %v2429_v44 = vpack.c.bf16 %v1764_v59, %v1762_v52  ;;  %v2431_v54 = vpack.c.bf16 %v1763_v14, %v1761_v12  ;;  %v1460_v59 = vld [vmem:[%s4183_s4 + $0x110] sm:$0xff]  ;;  %v1473_v12 = vld [vmem:[%s4183_s4 + $0x178] sm:$0xff] }
 0x227   :  { %1408 = vmatmul.mubr.f32.vlgmr.msra.gmra.mrb[32].mxu0 %v3562_v61  ;;  %v1721_v61 = vld [vmem:[%s4184_s5] sm:$0xff] }
 0x228   :  { %v2391_v26 = vpack.c.bf16 %v1723_v27, %v1721_v61  ;;  %v1768_v61 = vld [vmem:[%s4184_s5 + $0x178] sm:$0xff] }
 0x229   :  { %v2433_v27 = vpack.c.bf16 %v1768_v61, %v1766_v30  ;;  %v1468_v61 = vld [vmem:[%s4183_s4 + $0x150] sm:$0xff] }
 0x22a   :  { %2392 = vmatpush1.bf16.msra.mxu0 %v2391_v26  ;;  %v1770_v26 = vld [vmem:[%s4184_s5 + $0x188] sm:$0xff] }
 0x22b   :  { %2394 = vmatprep.subr.bf16.mxu0 %v2393_v15  ;;  %v1772_v15 = vld [vmem:[%s4184_s5 + $0x198] sm:$0xff] }
 0x22c   :  { %v2437_v6 = vpack.c.bf16 %v1772_v15, %v1770_v26  ;;  %v1476_v15 = vld [vmem:[%s4183_s4 + $0x190] sm:$0xff] }
 0x22e   :  { %2396 = vmatpush1.bf16.msra.mxu0 %v2395_v10  ;;  %v1774_v10 = vld [vmem:[%s4184_s5 + $0x1a8] sm:$0xff] }
 0x22f   :  { %2398 = vmatprep.subr.bf16.mxu0 %v2397_v58  ;;  %v1776_v58 = vld [vmem:[%s4184_s5 + $0x1b8] sm:$0xff] }
 0x230   :  { %v2441_v34 = vpack.c.bf16 %v1776_v58, %v1774_v10  ;;  %v1484_v58 = vld [vmem:[%s4183_s4 + $0x1d0] sm:$0xff] }
 0x232   :  { %2400 = vmatpush1.bf16.msra.mxu0 %v2399_v39  ;;  %v1778_v39 = vld [vmem:[%s4184_s5 + $0x1c8] sm:$0xff] }
 0x233   :  { %2402 = vmatprep.subr.bf16.mxu0 %v2401_v46  ;;  %v1780_v46 = vld [vmem:[%s4184_s5 + $0x1d8] sm:$0xff] }
 0x234   :  { %v2445_v19 = vpack.c.bf16 %v1780_v46, %v1778_v39  ;;  %v1492_v46 = vld [vmem:[%s4183_s4 + $0x210] sm:$0xff] }
 0x236   :  { %2404 = vmatpush1.bf16.msra.mxu0 %v2403_v36  ;;  %v1779_v36 = vld [vmem:[%s4184_s5 + $0x1d0] sm:$0xff] }
 0x237   :  { %2406 = vmatprep.subr.bf16.mxu0 %v2405_v53  ;;  %v4252_v53 = vld [vmem:[#allocation31_spill] sm:$0xff]  ;;  %v2447_v25 = vpack.c.bf16 %v1779_v36, %v1777_v22 }
 0x238   :  { %v1265_v48 = vrot.slane %v2024_v41, %v4252_v53  ;;  %v1501_v41 = vld [vmem:[%s4183_s4 + $0x258] sm:$0xff] }
 0x23a   :  { %2408 = vmatpush1.bf16.msra.mxu0 %v2407_v4  ;;  %v1428_v4 = vld [vmem:[%s4183_s4 + $0x10] sm:$0xff] }
 0x23b   :  { %2410 = vmatprep.subr.bf16.mxu0 %v2409_v1  ;;  %v1432_v1 = vld [vmem:[%s4183_s4 + $0x30] sm:$0xff] }
 0x23c   :  { %v2327_v2 = vpack.c.bf16 %v1432_v1, %v1428_v4  ;;  %v1513_v4 = vld [vmem:[%s4183_s4 + $0x2b8] sm:$0xff] }
 0x23e   :  { %2412 = vmatpush1.bf16.msra.mxu0 %v2411_v5 }
 0x23f   :  { %2414 = vmatprep.subr.bf16.mxu0 %v2413_v28 }
 0x242   :  { %2416 = vmatpush1.bf16.msra.mxu0 %v2415_v62 }
 0x243   :  { %2418 = vmatprep.subr.bf16.mxu0 %v2417_v8  ;;  %v1445_v8 = vld [vmem:[%s4183_s4 + $0x98] sm:$0xff] }
 0x244   :  { %v2333_v17 = vpack.c.bf16 %v1449_v51, %v1445_v8  ;;  %v1529_v8 = vld [vmem:[%s4183_s4 + $0x338] sm:$0xff]  ;;  %v2371_v51 = vpack.c.bf16 %v1520_v7, %v1516_v43  ;;  %v1797_v7 = vld [vmem:[%s4184_s5 + $0x260] sm:$0xff] }
 0x246   :  { %2420 = vmatpush1.bf16.msra.mxu0 %v2419_v13  ;;  %v1448_v13 = vld [vmem:[%s4183_s4 + $0xb0] sm:$0xff] }
 0x247   :  { %2422 = vmatprep.subr.bf16.mxu0 %v2421_v21  ;;  %v1453_v21 = vld [vmem:[%s4183_s4 + $0xd8] sm:$0xff]  ;;  %v2335_v42 = vpack.c.bf16 %v1448_v13, %v1444_v49  ;;  %v1528_v49 = vld [vmem:[%s4183_s4 + $0x330] sm:$0xff] }
 0x248   :  { %v2337_v11 = vpack.c.bf16 %v1457_v63, %v1453_v21  ;;  %v1533_v13 = vld [vmem:[%s4183_s4 + $0x358] sm:$0xff] }
 0x249   :  { %v1537_v21 = vld [vmem:[%s4183_s4 + $0x378] sm:$0xff] }
 0x24a   :  { %2424 = vmatpush1.bf16.msra.mxu0 %v2423_v55  ;;  %v1456_v55 = vld [vmem:[%s4183_s4 + $0xf0] sm:$0xff] }
 0x24b   :  { %2426 = vmatprep.subr.bf16.mxu0 %v2425_v56  ;;  %v1461_v56 = vld [vmem:[%s4183_s4 + $0x118] sm:$0xff]  ;;  %v2339_v24 = vpack.c.bf16 %v1456_v55, %v1452_v45  ;;  %v1536_v45 = vld [vmem:[%s4183_s4 + $0x370] sm:$0xff] }
 0x24c   :  { %v2341_v52 = vpack.c.bf16 %v1465_v47, %v1461_v56  ;;  %v1541_v55 = vld [vmem:[%s4183_s4 + $0x398] sm:$0xff] }
 0x24d   :  { %v1545_v56 = vld [vmem:[%s4183_s4 + $0x3b8] sm:$0xff] }
 0x24e   :  { %2428 = vmatpush1.bf16.msra.mxu0 %v2427_v31  ;;  %v1464_v31 = vld [vmem:[%s4183_s4 + $0x130] sm:$0xff] }
 0x24f   :  { %2430 = vmatprep.subr.bf16.mxu0 %v2429_v44  ;;  %v1469_v44 = vld [vmem:[%s4183_s4 + $0x158] sm:$0xff]  ;;  %v2343_v14 = vpack.c.bf16 %v1464_v31, %v1460_v59  ;;  %v1544_v59 = vld [vmem:[%s4183_s4 + $0x3b0] sm:$0xff] }
 0x250   :  { %v2345_v30 = vpack.c.bf16 %v1473_v12, %v1469_v44  ;;  %v1549_v31 = vld [vmem:[%s4183_s4 + $0x3d8] sm:$0xff] }
 0x251   :  { %v1553_v44 = vld [vmem:[%s4183_s4 + $0x3f8] sm:$0xff] }
 0x252   :  { %2432 = vmatpush1.bf16.msra.mxu0 %v2431_v54  ;;  %v1472_v54 = vld [vmem:[%s4183_s4 + $0x170] sm:$0xff] }
 0x253   :  { %2434 = vmatprep.subr.bf16.mxu0 %v2433_v27  ;;  %v1477_v27 = vld [vmem:[%s4183_s4 + $0x198] sm:$0xff]  ;;  %v2347_v16 = vpack.c.bf16 %v1472_v54, %v1468_v61  ;;  %v1552_v61 = vld [vmem:[%s4183_s4 + $0x3f0] sm:$0xff] }
 0x254   :  { %v2349_v26 = vpack.c.bf16 %v1481_v33, %v1477_v27  ;;  %v1782_v27 = vld [vmem:[%s4184_s5 + $0x1e8] sm:$0xff]  ;;  %v1784_v33 = vld [vmem:[%s4184_s5 + $0x1f8] sm:$0xff] }
 0x256   :  { %2436 = vmatpush1.bf16.msra.mxu0 %v2435_v9  ;;  %v1480_v9 = vld [vmem:[%s4183_s4 + $0x1b0] sm:$0xff] }
 0x257   :  { %2438 = vmatprep.subr.bf16.mxu0 %v2437_v6  ;;  %v1485_v6 = vld [vmem:[%s4183_s4 + $0x1d8] sm:$0xff]  ;;  %v2351_v23 = vpack.c.bf16 %v1480_v9, %v1476_v15  ;;  %v1783_v15 = vld [vmem:[%s4184_s5 + $0x1f0] sm:$0xff] }
 0x258   :  { %v2353_v10 = vpack.c.bf16 %v1489_v32, %v1485_v6  ;;  %v1788_v6 = vld [vmem:[%s4184_s5 + $0x218] sm:$0xff] }
 0x25a   :  { %2440 = vmatpush1.bf16.msra.mxu0 %v2439_v60  ;;  %v1488_v60 = vld [vmem:[%s4183_s4 + $0x1f0] sm:$0xff] }
 0x25b   :  { %2442 = vmatprep.subr.bf16.mxu0 %v2441_v34  ;;  %v1493_v34 = vld [vmem:[%s4183_s4 + $0x218] sm:$0xff]  ;;  %v2355_v40 = vpack.c.bf16 %v1488_v60, %v1484_v58 }
 0x25c   :  { %v2357_v39 = vpack.c.bf16 %v1497_v37, %v1493_v34 }
 0x25e   :  { %2444 = vmatpush1.bf16.msra.mxu0 %v2443_v18  ;;  %v1496_v18 = vld [vmem:[%s4183_s4 + $0x230] sm:$0xff] }
 0x25f   :  { %2446 = vmatprep.subr.bf16.mxu0 %v2445_v19  ;;  %v1505_v19 = vld [vmem:[%s4183_s4 + $0x278] sm:$0xff]  ;;  %v2359_v22 = vpack.c.bf16 %v1496_v18, %v1492_v46  ;;  %v1790_v18 = vld [vmem:[%s4184_s5 + $0x228] sm:$0xff] }
 0x260   :  { %v2361_v36 = vpack.c.bf16 %v1505_v19, %v1501_v41  ;;  %v1792_v41 = vld [vmem:[%s4184_s5 + $0x238] sm:$0xff] }
 0x262   :  { %2448 = vmatpush1.bf16.msra.mxu0 %v2447_v25  ;;  %v1504_v25 = vld [vmem:[%s4183_s4 + $0x270] sm:$0xff] }
 0x2fa   :  { %v1409_v29 = vpop.f32.mrb[32].mxu0 }
 0x2fb   :  { %v3770_v57 = vadd.f32 %v1409_v29, %v1265_v48  ;;  %v1411_v5 = vpop.f32.mrb[33].mxu0  ;;  %v1500_v48 = vld [vmem:[%s4183_s4 + $0x250] sm:$0xff] }
 0x2fc   :  { %v2528_v28 = vadd.f32 %v1411_v5, %v1269_v0  ;;  %v1509_v0 = vld [vmem:[%s4183_s4 + $0x298] sm:$0xff]  ;;  %v2363_v1 = vpack.c.bf16 %v1504_v25, %v1500_v48  ;;  %v2457_v48 = vpack.c.bf16 %v1792_v41, %v1790_v18  ;;  %v1789_v25 = vld [vmem:[%s4184_s5 + $0x220] sm:$0xff]  ;;  %v1827_v18 = vld [vmem:[%s4184_s5 + $0x350] sm:$0xff] }
 0x2fd   :  { %v2365_v29 = vpack.c.bf16 %v1513_v4, %v1509_v0  ;;  %v1517_v5 = vld [vmem:[%s4183_s4 + $0x2d8] sm:$0xff]  ;;  %v1791_v0 = vld [vmem:[%s4184_s5 + $0x230] sm:$0xff]  ;;  %v1794_v4 = vld [vmem:[%s4184_s5 + $0x248] sm:$0xff] }
 0x2fe   :  { %v1416_v62 = vcombine.low %v3770_v57, %v2528_v28  ;;  %1639 = vmatprep.mubr.f32.mxu1 %v2528_v28  ;;  %v1830_v41 = vld [vmem:[%s4184_s5 + $0x368] sm:$0xff] }
 0x2ff   :  { %1640 = vmatmul.mubr.f32.vlgmr.msra.gmra.mrb[96].mxu1 %v3770_v57 }
 0x300   :  { %2091 = vst.sshfl [vmem:[%s4185_s6] sm:$0x33 pattern:$0x76325410] %v1416_v62  ;;  %2328 = vmatpush1.bf16.msra.mxu1 %v2327_v2  ;;  %1710 = vmatprep.mubr.f32.mxu1 %v2528_v28  ;;  %v1521_v28 = vld [vmem:[%s4183_s4 + $0x2f8] sm:$0xff]  ;;  %v2367_v2 = vpack.c.bf16 %v1512_v20, %v1508_v50  ;;  %v1793_v20 = vld [vmem:[%s4184_s5 + $0x240] sm:$0xff] }
 0x301   :  { %2330 = vmatprep.subr.bf16.mxu1 %v2329_v38  ;;  %v2369_v38 = vpack.c.bf16 %v1521_v28, %v1517_v5  ;;  %v1525_v62 = vld [vmem:[%s4183_s4 + $0x318] sm:$0xff]  ;;  %v1795_v5 = vld [vmem:[%s4184_s5 + $0x250] sm:$0xff]  ;;  %v1798_v28 = vld [vmem:[%s4184_s5 + $0x268] sm:$0xff] }
 0x304   :  { %2332 = vmatpush1.bf16.msra.mxu1 %v2331_v35  ;;  %v2373_v35 = vpack.c.bf16 %v1529_v8, %v1525_v62  ;;  %v1799_v62 = vld [vmem:[%s4184_s5 + $0x270] sm:$0xff]  ;;  %v1802_v8 = vld [vmem:[%s4184_s5 + $0x288] sm:$0xff] }
 0x305   :  { %2334 = vmatprep.subr.bf16.mxu1 %v2333_v17  ;;  %v1524_v17 = vld [vmem:[%s4183_s4 + $0x310] sm:$0xff] }
 0x306   :  { %v2375_v63 = vpack.c.bf16 %v1528_v49, %v1524_v17  ;;  %v1801_v49 = vld [vmem:[%s4184_s5 + $0x280] sm:$0xff] }
 0x308   :  { %2336 = vmatpush1.bf16.msra.mxu1 %v2335_v42  ;;  %v2377_v42 = vpack.c.bf16 %v1537_v21, %v1533_v13  ;;  %v1803_v13 = vld [vmem:[%s4184_s5 + $0x290] sm:$0xff]  ;;  %v1806_v21 = vld [vmem:[%s4184_s5 + $0x2a8] sm:$0xff] }
 0x309   :  { %2338 = vmatprep.subr.bf16.mxu1 %v2337_v11  ;;  %v1532_v11 = vld [vmem:[%s4183_s4 + $0x350] sm:$0xff] }
 0x30a   :  { %v2379_v47 = vpack.c.bf16 %v1536_v45, %v1532_v11  ;;  %v1805_v45 = vld [vmem:[%s4184_s5 + $0x2a0] sm:$0xff] }
 0x30c   :  { %2340 = vmatpush1.bf16.msra.mxu1 %v2339_v24  ;;  %v2381_v24 = vpack.c.bf16 %v1545_v56, %v1541_v55  ;;  %v1807_v55 = vld [vmem:[%s4184_s5 + $0x2b0] sm:$0xff]  ;;  %v1810_v56 = vld [vmem:[%s4184_s5 + $0x2c8] sm:$0xff] }
 0x30d   :  { %2342 = vmatprep.subr.bf16.mxu1 %v2341_v52  ;;  %v1540_v52 = vld [vmem:[%s4183_s4 + $0x390] sm:$0xff] }
 0x30e   :  { %v2383_v12 = vpack.c.bf16 %v1544_v59, %v1540_v52  ;;  %v1809_v59 = vld [vmem:[%s4184_s5 + $0x2c0] sm:$0xff] }
 0x310   :  { %2344 = vmatpush1.bf16.msra.mxu1 %v2343_v14  ;;  %v2385_v14 = vpack.c.bf16 %v1553_v44, %v1549_v31  ;;  %v1811_v31 = vld [vmem:[%s4184_s5 + $0x2d0] sm:$0xff]  ;;  %v1814_v44 = vld [vmem:[%s4184_s5 + $0x2e8] sm:$0xff] }
 0x311   :  { %2346 = vmatprep.subr.bf16.mxu1 %v2345_v30  ;;  %v1548_v30 = vld [vmem:[%s4183_s4 + $0x3d0] sm:$0xff] }
 0x312   :  { %v2387_v54 = vpack.c.bf16 %v1552_v61, %v1548_v30  ;;  %v1813_v61 = vld [vmem:[%s4184_s5 + $0x2e0] sm:$0xff] }
 0x314   :  { %2348 = vmatpush1.bf16.msra.mxu1 %v2347_v16  ;;  %v1781_v16 = vld [vmem:[%s4184_s5 + $0x1e0] sm:$0xff] }
 0x315   :  { %2350 = vmatprep.subr.bf16.mxu1 %v2349_v26  ;;  %v2449_v26 = vpack.c.bf16 %v1784_v33, %v1782_v27  ;;  %v2451_v9 = vpack.c.bf16 %v1783_v15, %v1781_v16  ;;  %v1818_v27 = vld [vmem:[%s4184_s5 + $0x308] sm:$0xff]  ;;  %v1820_v33 = vld [vmem:[%s4184_s5 + $0x318] sm:$0xff]  ;;  %v1817_v15 = vld [vmem:[%s4184_s5 + $0x300] sm:$0xff] }
 0x317   :  { %2450 = vmatprep.subr.bf16.mxu0 %v2449_v26  ;;  %v2485_v26 = vpack.c.bf16 %v1820_v33, %v1818_v27 }
 0x318   :  { %2352 = vmatpush1.bf16.msra.mxu1 %v2351_v23  ;;  %2452 = vmatpush1.bf16.msra.mxu0 %v2451_v9  ;;  %v3973_v23 = vld [vmem:[%s4181_s2 + $0x2] ss:$4 sm:$0xf]  ;;  %v1819_v9 = vld [vmem:[%s4184_s5 + $0x310] sm:$0xff] }
 0x319   :  { %2354 = vmatprep.subr.bf16.mxu1 %v2353_v10  ;;  %v1558_v10 = vrot.slane %v3973_v23, %v4252_v53  ;;  %v1562_v58 = vrot.slane %v3973_v23, %v4253_v3 }
 0x31c   :  { %2356 = vmatpush1.bf16.msra.mxu1 %v2355_v40  ;;  %v1785_v40 = vld [vmem:[%s4184_s5 + $0x200] sm:$0xff] }
 0x31d   :  { %2358 = vmatprep.subr.bf16.mxu1 %v2357_v39  ;;  %v1787_v39 = vld [vmem:[%s4184_s5 + $0x210] sm:$0xff] }
 0x320   :  { %2360 = vmatpush1.bf16.msra.mxu1 %v2359_v22  ;;  %v2455_v22 = vpack.c.bf16 %v1787_v39, %v1785_v40 }
 0x321   :  { %2362 = vmatprep.subr.bf16.mxu1 %v2361_v36 }
 0x324   :  { %2364 = vmatpush1.bf16.msra.mxu1 %v2363_v1  ;;  %v1796_v1 = vld [vmem:[%s4184_s5 + $0x258] sm:$0xff] }
 0x325   :  { %2366 = vmatprep.subr.bf16.mxu1 %v2365_v29  ;;  %v2459_v29 = vpack.c.bf16 %v1791_v0, %v1789_v25  ;;  %v2461_v50 = vpack.c.bf16 %v1796_v1, %v1794_v4  ;;  %v1831_v25 = vld [vmem:[%s4184_s5 + $0x370] sm:$0xff]  ;;  %v1834_v0 = vld [vmem:[%s4184_s5 + $0x388] sm:$0xff]  ;;  %v1836_v4 = vld [vmem:[%s4184_s5 + $0x398] sm:$0xff] }
 0x328   :  { %2368 = vmatpush1.bf16.msra.mxu1 %v2367_v2  ;;  %v1800_v2 = vld [vmem:[%s4184_s5 + $0x278] sm:$0xff] }
 0x329   :  { %2370 = vmatprep.subr.bf16.mxu1 %v2369_v38  ;;  %v2463_v38 = vpack.c.bf16 %v1795_v5, %v1793_v20  ;;  %v2465_v43 = vpack.c.bf16 %v1800_v2, %v1798_v28  ;;  %v1835_v20 = vld [vmem:[%s4184_s5 + $0x390] sm:$0xff]  ;;  %v1838_v5 = vld [vmem:[%s4184_s5 + $0x3a8] sm:$0xff]  ;;  %v1840_v28 = vld [vmem:[%s4184_s5 + $0x3b8] sm:$0xff] }
 0x32c   :  { %2372 = vmatpush1.bf16.msra.mxu1 %v2371_v51  ;;  %v1804_v51 = vld [vmem:[%s4184_s5 + $0x298] sm:$0xff] }
 0x32d   :  { %2374 = vmatprep.subr.bf16.mxu1 %v2373_v35  ;;  %v2467_v35 = vpack.c.bf16 %v1799_v62, %v1797_v7  ;;  %v2469_v17 = vpack.c.bf16 %v1804_v51, %v1802_v8  ;;  %v1839_v7 = vld [vmem:[%s4184_s5 + $0x3b0] sm:$0xff]  ;;  %v1842_v62 = vld [vmem:[%s4184_s5 + $0x3c8] sm:$0xff]  ;;  %v1844_v8 = vld [vmem:[%s4184_s5 + $0x3d8] sm:$0xff] }
 0x330   :  { %2376 = vmatpush1.bf16.msra.mxu1 %v2375_v63  ;;  %v1808_v63 = vld [vmem:[%s4184_s5 + $0x2b8] sm:$0xff] }
 0x331   :  { %2378 = vmatprep.subr.bf16.mxu1 %v2377_v42  ;;  %v2471_v42 = vpack.c.bf16 %v1803_v13, %v1801_v49  ;;  %v2473_v11 = vpack.c.bf16 %v1808_v63, %v1806_v21  ;;  %v1843_v49 = vld [vmem:[%s4184_s5 + $0x3d0] sm:$0xff]  ;;  %v1846_v13 = vld [vmem:[%s4184_s5 + $0x3e8] sm:$0xff]  ;;  %v1848_v21 = vld [vmem:[%s4184_s5 + $0x3f8] sm:$0xff] }
 0x334   :  { %2380 = vmatpush1.bf16.msra.mxu1 %v2379_v47  ;;  %v1812_v47 = vld [vmem:[%s4184_s5 + $0x2d8] sm:$0xff] }
 0x335   :  { %2382 = vmatprep.subr.bf16.mxu1 %v2381_v24  ;;  %v2475_v24 = vpack.c.bf16 %v1807_v55, %v1805_v45  ;;  %v2477_v52 = vpack.c.bf16 %v1812_v47, %v1810_v56  ;;  %v2513_v55 = vpack.c.bf16 %v1848_v21, %v1846_v13  ;;  %v1845_v56 = vld [vmem:[%s4184_s5 + $0x3e0] sm:$0xff]  ;;  %v1847_v47 = vld [vmem:[%s4184_s5 + $0x3f0] sm:$0xff] }
 0x338   :  { %2384 = vmatpush1.bf16.msra.mxu1 %v2383_v12  ;;  %v1816_v12 = vld [vmem:[%s4184_s5 + $0x2f8] sm:$0xff] }
 0x339   :  { %2386 = vmatprep.subr.bf16.mxu1 %v2385_v14  ;;  %v2479_v14 = vpack.c.bf16 %v1811_v31, %v1809_v59  ;;  %v2481_v30 = vpack.c.bf16 %v1816_v12, %v1814_v44  ;;  %v2515_v31 = vpack.c.bf16 %v1847_v47, %v1845_v56 }
 0x33c   :  { %2388 = vmatpush1.bf16.msra.mxu1 %v2387_v54  ;;  %v1815_v54 = vld [vmem:[%s4184_s5 + $0x2f0] sm:$0xff] }
 0x33d   :  { %v2483_v16 = vpack.c.bf16 %v1815_v54, %v1813_v61  ;;  %v2026_v54 = vld [vmem:[%s4181_s2 + $0x3] ss:$4 sm:$0x3] }
 0x33e   :  { %v1853_v27 = vrot.slane %v2026_v54, %v4252_v53 }
 0x33f   :  { %1711 = vmatmul.mubr.f32.vlgmr.msra.gmra.mrb[98].mxu1 %v3770_v57  ;;  %v1786_v57 = vld [vmem:[%s4184_s5 + $0x208] sm:$0xff] }
 0x340   :  { %v2453_v32 = vpack.c.bf16 %v1788_v6, %v1786_v57  ;;  %v1822_v57 = vld [vmem:[%s4184_s5 + $0x328] sm:$0xff]  ;;  %v1824_v6 = vld [vmem:[%s4184_s5 + $0x338] sm:$0xff] }
 0x342   :  { %2454 = vmatprep.subr.bf16.mxu0 %v2453_v32  ;;  %v2487_v32 = vpack.c.bf16 %v1819_v9, %v1817_v15 }
 0x3d2   :  { %v1641_v60 = vpop.f32.mrb[96].mxu1 }
 0x3d3   :  { %v1642_v34 = vadd.f32 %v1641_v60, %v1558_v10  ;;  %v1643_v37 = vpop.f32.mrb[97].mxu1  ;;  %v2489_v10 = vpack.c.bf16 %v1824_v6, %v1822_v57  ;;  %v1823_v60 = vld [vmem:[%s4184_s5 + $0x330] sm:$0xff] }
 0x3d4   :  { %v1644_v46 = vadd.f32 %v1643_v37, %v1562_v58  ;;  %v1821_v58 = vld [vmem:[%s4184_s5 + $0x320] sm:$0xff]  ;;  %v1828_v37 = vld [vmem:[%s4184_s5 + $0x358] sm:$0xff] }
 0x3d5   :  { %v1717_v36 = vmax.f32 %v1642_v34, 0.0  ;;  %v1826_v34 = vld [vmem:[%s4184_s5 + $0x348] sm:$0xff]  ;;  %v2491_v40 = vpack.c.bf16 %v1823_v60, %v1821_v58 }
 0x3d6   :  { %v1718_v19 = vmax.f32 %v1644_v46, 0.0  ;;  %v2493_v39 = vpack.c.bf16 %v1828_v37, %v1826_v34  ;;  %v1825_v46 = vld [vmem:[%s4184_s5 + $0x340] sm:$0xff] }
 0x3d8   :  { %1924 = vmatprep.mubr.f32.mxu0 %v1718_v19  ;;  %v1832_v19 = vld [vmem:[%s4184_s5 + $0x378] sm:$0xff] }
 0x3d9   :  { %1925 = vmatmul.mubr.f32.vlgmr.msra.gmra.mrb[34].mxu0 %v1717_v36  ;;  %v2497_v36 = vpack.c.bf16 %v1832_v19, %v1830_v41 }
 0x3da   :  { %2456 = vmatpush1.bf16.msra.mxu0 %v2455_v22  ;;  %v2495_v22 = vpack.c.bf16 %v1827_v18, %v1825_v46 }
 0x3db   :  { %2458 = vmatprep.subr.bf16.mxu0 %v2457_v48  ;;  %v1829_v48 = vld [vmem:[%s4184_s5 + $0x360] sm:$0xff] }
 0x3dc   :  { %v2499_v1 = vpack.c.bf16 %v1831_v25, %v1829_v48 }
 0x3de   :  { %2460 = vmatpush1.bf16.msra.mxu0 %v2459_v29  ;;  %v2501_v29 = vpack.c.bf16 %v1836_v4, %v1834_v0 }
 0x3df   :  { %2462 = vmatprep.subr.bf16.mxu0 %v2461_v50  ;;  %v1833_v50 = vld [vmem:[%s4184_s5 + $0x380] sm:$0xff] }
 0x3e0   :  { %v2503_v2 = vpack.c.bf16 %v1835_v20, %v1833_v50 }
 0x3e2   :  { %2464 = vmatpush1.bf16.msra.mxu0 %v2463_v38  ;;  %v2505_v38 = vpack.c.bf16 %v1840_v28, %v1838_v5 }
 0x3e3   :  { %2466 = vmatprep.subr.bf16.mxu0 %v2465_v43  ;;  %v1837_v43 = vld [vmem:[%s4184_s5 + $0x3a0] sm:$0xff] }
 0x3e4   :  { %v2507_v51 = vpack.c.bf16 %v1839_v7, %v1837_v43 }
 0x3e6   :  { %2468 = vmatpush1.bf16.msra.mxu0 %v2467_v35  ;;  %v2509_v35 = vpack.c.bf16 %v1844_v8, %v1842_v62 }
 0x3e7   :  { %2470 = vmatprep.subr.bf16.mxu0 %v2469_v17  ;;  %v1841_v17 = vld [vmem:[%s4184_s5 + $0x3c0] sm:$0xff] }
 0x3e8   :  { %v2511_v63 = vpack.c.bf16 %v1843_v49, %v1841_v17 }
 0x3ea   :  { %2472 = vmatpush1.bf16.msra.mxu0 %v2471_v42  ;;  %v4254_v42 = vld [vmem:[#allocation28_spill] sm:$0xff] }
 0x3eb   :  { %2474 = vmatprep.subr.bf16.mxu0 %v2473_v11  ;;  %v4255_v11 = vsub.s32 2, %v4254_v42 }
 0x3ed   :  { %v1566_v45 = vrot.slane %v3973_v23, %v4255_v11 }
 0x3ee   :  { %2476 = vmatpush1.bf16.msra.mxu0 %v2475_v24  ;;  %v4256_v24 = vsub.s32 3, %v4254_v42 }
 0x3ef   :  { %2478 = vmatprep.subr.bf16.mxu0 %v2477_v52 }
 0x3f0   :  { %v1570_v52 = vrot.slane %v3973_v23, %v4256_v24  ;;  %v1857_v23 = vrot.slane %v2026_v54, %v4253_v3 }
 0x3f2   :  { %2480 = vmatpush1.bf16.msra.mxu0 %v2479_v14 }
 0x3f3   :  { %2482 = vmatprep.subr.bf16.mxu0 %v2481_v30 }
 0x3f6   :  { %2484 = vmatpush1.bf16.msra.mxu0 %v2483_v16 }
 0x3f7   :  { %2486 = vmatprep.subr.bf16.mxu0 %v2485_v26 }
 0x3fa   :  { %2488 = vmatpush1.bf16.msra.mxu0 %v2487_v32 }
 0x3fb   :  { %2490 = vmatprep.subr.bf16.mxu0 %v2489_v10 }
 0x3fe   :  { %2492 = vmatpush1.bf16.msra.mxu0 %v2491_v40 }
 0x3ff   :  { %2494 = vmatprep.subr.bf16.mxu0 %v2493_v39 }
 0x402   :  { %2496 = vmatpush1.bf16.msra.mxu0 %v2495_v22 }
 0x403   :  { %2498 = vmatprep.subr.bf16.mxu0 %v2497_v36 }
 0x406   :  { %2500 = vmatpush1.bf16.msra.mxu0 %v2499_v1 }
 0x407   :  { %2502 = vmatprep.subr.bf16.mxu0 %v2501_v29 }
 0x40a   :  { %2504 = vmatpush1.bf16.msra.mxu0 %v2503_v2 }
 0x40b   :  { %2506 = vmatprep.subr.bf16.mxu0 %v2505_v38 }
 0x40e   :  { %2508 = vmatpush1.bf16.msra.mxu0 %v2507_v51 }
 0x40f   :  { %2510 = vmatprep.subr.bf16.mxu0 %v2509_v35 }
 0x412   :  { %v1712_v59 = vpop.f32.mrb[98].mxu1  ;;  %2512 = vmatpush1.bf16.msra.mxu0 %v2511_v63 }
 0x413   :  { %v1713_v44 = vadd.f32 %v1712_v59, %v1566_v45  ;;  %v1714_v12 = vpop.f32.mrb[99].mxu1  ;;  %2514 = vmatprep.subr.bf16.mxu0 %v2513_v55 }
 0x414   :  { %v1715_v14 = vadd.f32 %v1714_v12, %v1570_v52 }
 0x415   :  { %v1719_v61 = vmax.f32 %v1713_v44, 0.0 }
 0x416   :  { %v1720_v30 = vmax.f32 %v1715_v14, 0.0  ;;  %2516 = vmatpush1.bf16.msra.mxu0 %v2515_v31 }
 0x418   :  { %1995 = vmatprep.mubr.f32.mxu0 %v1720_v30 }
 0x419   :  { %1996 = vmatmul.mubr.f32.vlgmr.msra.gmra.mrb[34].mxu0 %v1719_v61 }
 0x4ec   :  { %v1997_v33 = vpop.f32.mrb[34].mxu0 }
 0x4ed   :  { %v2529_v16 = vadd.f32 %v1997_v33, %v1853_v27  ;;  %v1999_v26 = vpop.f32.mrb[35].mxu0 }
 0x4ee   :  { %v2530_v15 = vadd.f32 %v1999_v26, %v1857_v23 }
 0x4f0   :  { %v2004_v9 = vcombine.low %v2529_v16, %v2530_v15 }
 0x4f2   :  { %2092 = vst.sshfl [vmem:[%s4186_s7] sm:$0x33 pattern:$0x76325410] %v2004_v9 }
 0x4f3   :  { %2022 = vsyncpa [#allocation3], 1 }
 0x4f4   :  { %2023 = vsyncpa [#allocation5], 1 }

</bundles_post_ra>
